<compile_context>
chip_gen: v6e
topology: v6e:2x2x1
jax: 0.10.0
libtpu: 0.0.40
codegen_flags: <defaults>
</compile_context>

<pallas_src>
import functools

import jax
import jax.numpy as jnp
from jax import lax
from jax.experimental import pallas as pl
from jax.experimental.pallas import tpu as pltpu

NEG_INF = -1e30


def _round_up(x, m):
    return (x + m - 1) // m * m


# ---------------------------------------------------------------------------
# Kernel 1: fused query/key/value 1x1 convolutions as ONE tiled channel matmul.
#   x2d: (M_pad, Cin) bf16 ; w: (Cin, Cout_pad) bf16 ; b: (1, Cout_pad) f32.
# ---------------------------------------------------------------------------
def _proj_kernel(x_ref, w_ref, b_ref, o_ref):
    acc = jnp.dot(x_ref[...], w_ref[...], preferred_element_type=jnp.float32)
    o_ref[...] = (acc + b_ref[...]).astype(o_ref.dtype)


def _project(x2d, w_fused, b_fused, tm):
    m_pad, cin = x2d.shape
    cout_pad = w_fused.shape[1]
    return pl.pallas_call(
        _proj_kernel,
        out_shape=jax.ShapeDtypeStruct((m_pad, cout_pad), jnp.bfloat16),
        grid=(m_pad // tm,),
        in_specs=[
            pl.BlockSpec((tm, cin), lambda i: (i, 0)),
            pl.BlockSpec((cin, cout_pad), lambda i: (0, 0)),
            pl.BlockSpec((1, cout_pad), lambda i: (0, 0)),
        ],
        out_specs=pl.BlockSpec((tm, cout_pad), lambda i: (i, 0)),
        compiler_params=pltpu.CompilerParams(dimension_semantics=("parallel",)),
    )(x2d, w_fused, b_fused)


# ---------------------------------------------------------------------------
# Kernel 2: sparse criss-cross attention + residual.
# Grid = (batch, query-row tiles).  Per step:
#   * fused qkv row tile in row-major layout (1, tr, w, cpad),
#   * the full per-batch fused qkv in column-major layout (1, w, h, cpad)
#     (constant block index across row tiles -> no re-DMA),
#   * residual x row tile (f32) which also aliases the output buffer.
# Channels are split in-kernel (static lane slices of the fused block).
# ---------------------------------------------------------------------------
def _make_cca_kernel(cq, c):
    def kernel(gamma_ref, qkvr_ref, qkvc_ref, x_ref, o_ref):
        tr = qkvr_ref.shape[1]
        w = qkvr_ref.shape[2]
        h = qkvc_ref.shape[2]
        r0 = pl.program_id(1) * tr
        gamma = gamma_ref[0]

        qkv_r = qkvr_ref[0]                        # (tr, w, cpad) bf16
        qkv_c = qkvc_ref[0]                        # (w, h, cpad)  bf16
        x = x_ref[0]                               # (tr, w, c)    f32

        q = qkv_r[:, :, 0:cq]                      # (tr, w, cq)
        k_r = qkv_r[:, :, cq:2 * cq]               # (tr, w, cq)
        v_r = qkv_r[:, :, 2 * cq:2 * cq + c]       # (tr, w, c)
        k_c = qkv_c[:, :, cq:2 * cq]               # (w, h, cq)
        v_c = qkv_c[:, :, 2 * cq:2 * cq + c]       # (w, h, c)

        # Column-major query view.  When tr == h it is already resident in the
        # column-major block (free); otherwise a small leading-dim swap.
        if tr == h:
            q_t = qkv_c[:, :, 0:cq]                # (w, tr, cq)
        else:
            q_t = jnp.swapaxes(q, 0, 1)            # (w, tr, cq)

        # --- criss-cross energies (sparse: row part + column part) ----------
        # row: e_row[r, j, k] = <q[r0+r, j], k[r0+r, k]>
        e_row = jnp.einsum('rjc,rkc->rjk', q, k_r,
                           preferred_element_type=jnp.float32)   # (tr, w, w)
        # col: e_col[r, j, i] = <q[r0+r, j], k[i, j]>
        # TODO(synk): on v6e/v7x, when tr*w <= 256, these tiny batched matmuls
        # could be fused into one dense MXU push + block-diag mask; not done
        # here because the masked exp blow-up does not scale to CCNet sizes.
        e_col = jnp.swapaxes(
            jnp.einsum('jrc,jic->jri', q_t, k_c,
                       preferred_element_type=jnp.float32),
            0, 1)                                                # (tr, w, h)

        # Self position is already counted in the row part -> mask it in the
        # column part (in-kernel iota, no mask tensor from HBM).
        qrow = r0 + lax.broadcasted_iota(jnp.int32, (tr, w, h), 0)
        krow = lax.broadcasted_iota(jnp.int32, (tr, w, h), 2)
        e_col = jnp.where(krow == qrow, NEG_INF, e_col)

        # --- single softmax over the (w + h - 1) criss-cross neighbourhood --
        e = jnp.concatenate([e_row, e_col], axis=-1)             # (tr, w, w+h)
        m = jnp.max(e, axis=-1, keepdims=True)
        p = jnp.exp(e - m)
        inv = pl.reciprocal(jnp.sum(p, axis=-1, keepdims=True), approx=True)
        p = p * inv                                              # normalized

        p_row = p[:, :, :w].astype(v_r.dtype)                    # (tr, w, w)
        p_col = jnp.swapaxes(p[:, :, w:], 0, 1).astype(v_c.dtype)  # (w, tr, h)

        # --- aggregation (A @ V): probabilities are already normalized ------
        out_row = jnp.einsum('rjk,rkc->rjc', p_row, v_r,
                             preferred_element_type=jnp.float32)   # (tr, w, c)
        out_col = jnp.einsum('jri,jic->jrc', p_col, v_c,
                             preferred_element_type=jnp.float32)   # (w, tr, c)
        out = out_row + jnp.swapaxes(out_col, 0, 1)                # (tr, w, c)

        # Single whole-tile store (residual add in f32).
        o_ref[0] = (gamma * out + x).astype(o_ref.dtype)

    return kernel


def _cca_attention(gamma, qkv_r, qkv_c, x, cq, c, tr):
    n, h, w, cpad = qkv_r.shape
    kernel = _make_cca_kernel(cq, c)

    flops = 2 * n * h * w * (w + h) * (cq + c)
    transcendentals = n * h * w * (w + h)
    bytes_accessed = (qkv_r.size + qkv_c.size) * 2 + 2 * x.size * 4

    in_specs = [
        pl.BlockSpec(memory_space=pltpu.MemorySpace.SMEM),            # gamma
        pl.BlockSpec((1, tr, w, cpad), lambda b, r: (b, r, 0, 0)),    # qkv rows
        pl.BlockSpec((1, w, h, cpad), lambda b, r: (b, 0, 0, 0)),     # qkv cols
        pl.BlockSpec((1, tr, w, c), lambda b, r: (b, r, 0, 0)),       # x residual
    ]
    x_index = len(in_specs) - 1    # residual x is the last operand

    return pl.pallas_call(
        kernel,
        out_shape=jax.ShapeDtypeStruct((n, h, w, c), jnp.float32),
        grid=(n, h // tr),
        in_specs=in_specs,
        out_specs=pl.BlockSpec((1, tr, w, c), lambda b, r: (b, r, 0, 0)),
        input_output_aliases={x_index: 0},   # residual aliases the output
        compiler_params=pltpu.CompilerParams(
            dimension_semantics=("parallel", "parallel")),
        cost_estimate=pl.CostEstimate(flops=flops,
                                      transcendentals=transcendentals,
                                      bytes_accessed=bytes_accessed),
    )(gamma, qkv_r, qkv_c, x)


# ---------------------------------------------------------------------------
# Module wrapper (layout glue: NCHW <-> channels-last, weight fusion).
# TODO(synk): in a real pipeline accept NHWC directly so the two wrapper
# transposes (NCHW->NHWC and back) disappear from the layout contract.
# ---------------------------------------------------------------------------
@jax.jit
def cca_forward(x_nchw, params):
    wq, bq, wk, bk, wv, bv, gamma = params
    n, c, h, w = x_nchw.shape
    cq = wq.shape[1]

    x_nhwc = jnp.transpose(x_nchw, (0, 2, 3, 1)).astype(jnp.float32)  # (n,h,w,c)

    # --- fused, lane-dense, tiled projection --------------------------------
    cout = 2 * cq + c
    cout_pad = _round_up(cout, 128)
    w_fused = jnp.concatenate([wq, wk, wv], axis=1).astype(jnp.bfloat16)
    w_fused = jnp.pad(w_fused, ((0, 0), (0, cout_pad - cout)))
    b_fused = jnp.pad(jnp.concatenate([bq, bk, bv]).astype(jnp.float32),
                      (0, cout_pad - cout)).reshape(1, cout_pad)

    m = n * h * w
    tm = min(1024, _round_up(m, 128))       # HBM-bound matmul: big row tiles
    m_pad = _round_up(m, tm)
    x2d = x_nhwc.reshape(m, c).astype(jnp.bfloat16)
    if m_pad != m:
        x2d = jnp.pad(x2d, ((0, m_pad - m), (0, 0)))

    qkv = _project(x2d, w_fused, b_fused, tm)[:m]      # (m, cout_pad) bf16
    qkv_r = qkv.reshape(n, h, w, cout_pad)             # free reshape
    # Single wrapper relayout: column-major copy of the fused buffer so the
    # column branch runs as plain batched matmuls (no in-kernel K/V transpose).
    qkv_c = jnp.transpose(qkv_r, (0, 2, 1, 3))         # (n, w, h, cout_pad)

    # Query-row tile: one step per batch for small images, otherwise the
    # largest aligned tile (amortizes per-step overhead, bigger matmul M dim).
    if h <= 32:
        tr = h
    elif h % 32 == 0:
        tr = 32
    elif h % 16 == 0:
        tr = 16
    elif h % 8 == 0:
        tr = 8
    else:
        tr = h   # TODO(synk): pad h to a multiple of 8 instead of tr = h.

    out = _cca_attention(gamma.astype(jnp.float32), qkv_r, qkv_c, x_nhwc,
                         cq, c, tr)
    return jnp.transpose(out, (0, 3, 1, 2)).astype(x_nchw.dtype)


# Pure-JAX f32 reference (sparse row/column formulation of CCNet) for self-check.
def cca_reference(x, params):
    wq, bq, wk, bk, wv, bv, gamma = params
    n, c, h, w = x.shape
    q = jnp.einsum('nchw,co->nohw', x, wq) + bq[None, :, None, None]
    k = jnp.einsum('nchw,co->nohw', x, wk) + bk[None, :, None, None]
    v = jnp.einsum('nchw,co->nohw', x, wv) + bv[None, :, None, None]
    e_row = jnp.einsum('nchw,nchi->nhwi', q, k)                   # (n,h,w,w)
    e_col = jnp.einsum('nchw,nciw->nhwi', q, k)                   # (n,h,w,h)
    ii = jnp.arange(h)[None, None, None, :]
    yy = jnp.arange(h)[None, :, None, None]
    e_col = jnp.where(ii == yy, NEG_INF, e_col)                   # self counted once
    a = jax.nn.softmax(jnp.concatenate([e_row, e_col], axis=-1), axis=-1)
    a_row, a_col = a[..., :w], a[..., w:]
    out = (jnp.einsum('nhwi,nchi->nchw', a_row, v)
           + jnp.einsum('nhwi,nciw->nchw', a_col, v))
    return gamma * out + x


if __name__ == "__main__":
    inplanes = 64
    N, H, W = 2, 16, 16
    Cq = inplanes // 8

    key = jax.random.PRNGKey(0)
    kx, kwq, kbq, kwk, kbk, kwv, kbv = jax.random.split(key, 7)
    x = jax.random.normal(kx, (N, inplanes, H, W), jnp.float32)

    # Deterministic parameter init (Conv2d 1x1 weights stored as (Cin, Cout)).
    wq = 0.1 * jax.random.normal(kwq, (inplanes, Cq), jnp.float32)
    bq = 0.1 * jax.random.normal(kbq, (Cq,), jnp.float32)
    wk = 0.1 * jax.random.normal(kwk, (inplanes, Cq), jnp.float32)
    bk = 0.1 * jax.random.normal(kbk, (Cq,), jnp.float32)
    wv = 0.1 * jax.random.normal(kwv, (inplanes, inplanes), jnp.float32)
    bv = 0.1 * jax.random.normal(kbv, (inplanes,), jnp.float32)
    gamma = jnp.zeros((1,), jnp.float32)          # nn.Parameter(torch.zeros(1))

    params = (wq, bq, wk, bk, wv, bv, gamma)
    out = jax.block_until_ready(cca_forward(x, params))
    assert out.shape == x.shape and out.dtype == x.dtype
    # With gamma initialized to zero (as in CCA.__init__) the output equals x.
    assert jnp.allclose(out, x, atol=1e-5)

    # Exercise the full criss-cross path with a nonzero gamma and compare
    # against the independent f32 reference.  Tolerances reflect the bf16
    # matmul operands and the approximate reciprocal (softmax stats and the
    # residual add stay in f32).
    params_nz = (wq, bq, wk, bk, wv, bv, jnp.full((1,), 0.5, jnp.float32))
    out_nz = jax.block_until_ready(cca_forward(x, params_nz))
    ref_nz = cca_reference(x, params_nz)
    err = jnp.abs(out_nz - ref_nz)
    assert jnp.allclose(out_nz, ref_nz, atol=5e-2, rtol=5e-2), float(jnp.max(err))
    assert float(jnp.mean(err)) < 5e-3, float(jnp.mean(err))

    print("KERNEL_OK")
</pallas_src>

<mosaic_0001>
module attributes {stable_mosaic.version = 11 : i64} {
  func.func @_proj_kernel(%arg0: i32, %arg1: memref<512x64xbf16, #tpu.memory_space<vmem>>, %arg2: memref<64x128xbf16, #tpu.memory_space<vmem>>, %arg3: memref<1x128xf32, #tpu.memory_space<vmem>>, %arg4: memref<512x128xbf16, #tpu.memory_space<vmem>>) attributes {dimension_semantics = [#tpu.dimension_semantics<parallel>], iteration_bounds = array<i64: 1>, scalar_prefetch = 0 : i64, scratch_operands = 0 : i64, tpu.core_type = #tpu.core_type<tc>, window_params = [{transform_indices = @transform_0, window_bounds = array<i64: 512, 64>}, {pipeline_mode = #tpu.pipeline_mode<synchronous>, transform_indices = @transform_1, window_bounds = array<i64: 64, 128>}, {pipeline_mode = #tpu.pipeline_mode<synchronous>, transform_indices = @transform_2, window_bounds = array<i64: 1, 128>}, {transform_indices = @transform_3, window_bounds = array<i64: 512, 128>}]} {
    %c0 = arith.constant 0 : index
    %c0_0 = arith.constant 0 : index
    %0 = vector.load %arg1[%c0, %c0_0] : memref<512x64xbf16, #tpu.memory_space<vmem>>, vector<512x64xbf16>
    %c0_1 = arith.constant 0 : index
    %c0_2 = arith.constant 0 : index
    %1 = vector.load %arg2[%c0_1, %c0_2] : memref<64x128xbf16, #tpu.memory_space<vmem>>, vector<64x128xbf16>
    %cst = arith.constant dense<0.000000e+00> : vector<512x128xf32>
    %2 = tpu.matmul %0, %1, %cst {dimension_numbers = #tpu.dot_dimension_numbers<[1], [0], [0], [1], [0, 0, 1, 1], [], []>} : vector<512x64xbf16>, vector<64x128xbf16>, vector<512x128xf32> -> vector<512x128xf32>
    %c0_3 = arith.constant 0 : index
    %c0_4 = arith.constant 0 : index
    %3 = vector.load %arg3[%c0_3, %c0_4] : memref<1x128xf32, #tpu.memory_space<vmem>>, vector<1x128xf32>
    %4 = vector.broadcast %3 : vector<1x128xf32> to vector<512x128xf32>
    %5 = arith.addf %2, %4 : vector<512x128xf32>
    %6 = arith.truncf %5 : vector<512x128xf32> to vector<512x128xbf16>
    %c0_5 = arith.constant 0 : index
    %c0_6 = arith.constant 0 : index
    %7 = vector.load %arg4[%c0_5, %c0_6] : memref<512x128xbf16, #tpu.memory_space<vmem>>, vector<512x128xbf16>
    tpu.vector_store %arg4[%c0_5, %c0_6], %6 {strides = array<i32>} : memref<512x128xbf16, #tpu.memory_space<vmem>>, vector<512x128xbf16>,
    return
  }
  func.func @transform_0(%arg0: i32) -> (i32, i32) {
    %c0_i32 = arith.constant 0 : i32
    %c0_i32_0 = arith.constant 0 : i32
    return %arg0, %c0_i32 : i32, i32
  }
  func.func @transform_1(%arg0: i32) -> (i32, i32) {
    %c0_i32 = arith.constant 0 : i32
    %c0_i32_0 = arith.constant 0 : i32
    %c0_i32_1 = arith.constant 0 : i32
    return %c0_i32, %c0_i32_0 : i32, i32
  }
  func.func @transform_2(%arg0: i32) -> (i32, i32) {
    %c0_i32 = arith.constant 0 : i32
    %c0_i32_0 = arith.constant 0 : i32
    %c0_i32_1 = arith.constant 0 : i32
    return %c0_i32, %c0_i32_0 : i32, i32
  }
  func.func @transform_3(%arg0: i32) -> (i32, i32) {
    %c0_i32 = arith.constant 0 : i32
    %c0_i32_0 = arith.constant 0 : i32
    return %arg0, %c0_i32 : i32, i32
  }
}

module attributes {stable_mosaic.version = 11 : i64} {
  func.func @kernel(%arg0: i32, %arg1: i32, %arg2: memref<1xf32, #tpu.memory_space<smem>>, %arg3: memref<1x16x16x128xbf16, #tpu.memory_space<vmem>>, %arg4: memref<1x16x16x128xbf16, #tpu.memory_space<vmem>>, %arg5: memref<1x16x16x64xf32, #tpu.memory_space<vmem>>, %arg6: memref<1x16x16x64xf32, #tpu.memory_space<vmem>>) attributes {dimension_semantics = [#tpu.dimension_semantics<parallel>, #tpu.dimension_semantics<parallel>], iteration_bounds = array<i64: 2, 1>, scalar_prefetch = 0 : i64, scratch_operands = 0 : i64, tpu.core_type = #tpu.core_type<tc>, window_params = [{transform_indices = @transform_0, window_bounds = array<i64: 1>}, {transform_indices = @transform_1, window_bounds = array<i64: 1, 16, 16, 128>}, {transform_indices = @transform_2, window_bounds = array<i64: 1, 16, 16, 128>}, {transform_indices = @transform_3, window_bounds = array<i64: 1, 16, 16, 64>}, {transform_indices = @transform_4, window_bounds = array<i64: 1, 16, 16, 64>}]} {
    %c16_i32 = arith.constant 16 : i32
    %0 = arith.muli %arg1, %c16_i32 : i32
    %c0 = arith.constant 0 : index
    %1 = memref.load %arg2[%c0] : memref<1xf32, #tpu.memory_space<smem>>
    %c0_0 = arith.constant 0 : index
    %c0_1 = arith.constant 0 : index
    %c0_2 = arith.constant 0 : index
    %c0_3 = arith.constant 0 : index
    %2 = vector.load %arg3[%c0_0, %c0_1, %c0_2, %c0_3] : memref<1x16x16x128xbf16, #tpu.memory_space<vmem>>, vector<1x16x16x128xbf16>
    %3 = vector.shape_cast %2 : vector<1x16x16x128xbf16> to vector<16x16x128xbf16>
    %c0_4 = arith.constant 0 : index
    %c0_5 = arith.constant 0 : index
    %c0_6 = arith.constant 0 : index
    %c0_7 = arith.constant 0 : index
    %4 = vector.load %arg4[%c0_4, %c0_5, %c0_6, %c0_7] : memref<1x16x16x128xbf16, #tpu.memory_space<vmem>>, vector<1x16x16x128xbf16>
    %5 = vector.shape_cast %4 : vector<1x16x16x128xbf16> to vector<16x16x128xbf16>
    %c0_8 = arith.constant 0 : index
    %c0_9 = arith.constant 0 : index
    %c0_10 = arith.constant 0 : index
    %c0_11 = arith.constant 0 : index
    %6 = vector.load %arg5[%c0_8, %c0_9, %c0_10, %c0_11] : memref<1x16x16x64xf32, #tpu.memory_space<vmem>>, vector<1x16x16x64xf32>
    %7 = vector.shape_cast %6 : vector<1x16x16x64xf32> to vector<16x16x64xf32>
    %8 = vector.extract_strided_slice %3 {offsets = [0, 0, 0], sizes = [16, 16, 8], strides = [1, 1, 1]} : vector<16x16x128xbf16> to vector<16x16x8xbf16>
    %9 = vector.extract_strided_slice %3 {offsets = [0, 0, 8], sizes = [16, 16, 8], strides = [1, 1, 1]} : vector<16x16x128xbf16> to vector<16x16x8xbf16>
    %10 = vector.extract_strided_slice %3 {offsets = [0, 0, 16], sizes = [16, 16, 64], strides = [1, 1, 1]} : vector<16x16x128xbf16> to vector<16x16x64xbf16>
    %11 = vector.extract_strided_slice %5 {offsets = [0, 0, 8], sizes = [16, 16, 8], strides = [1, 1, 1]} : vector<16x16x128xbf16> to vector<16x16x8xbf16>
    %12 = vector.extract_strided_slice %5 {offsets = [0, 0, 16], sizes = [16, 16, 64], strides = [1, 1, 1]} : vector<16x16x128xbf16> to vector<16x16x64xbf16>
    %13 = vector.extract_strided_slice %5 {offsets = [0, 0, 0], sizes = [16, 16, 8], strides = [1, 1, 1]} : vector<16x16x128xbf16> to vector<16x16x8xbf16>
    "tpu.trace_start"() <{level = 10 : i32, message = "rjc,rkc->rjk"}> : () -> ()
    %cst = arith.constant dense<0.000000e+00> : vector<16x16x16xf32>
    %14 = tpu.matmul %8, %9, %cst {dimension_numbers = #tpu.dot_dimension_numbers<[2], [2], [1], [1], [0, 0, 0, 1, 1, 1], [0], [0]>} : vector<16x16x8xbf16>, vector<16x16x8xbf16>, vector<16x16x16xf32> -> vector<16x16x16xf32>
    "tpu.trace_stop"() : () -> ()
    "tpu.trace_start"() <{level = 10 : i32, message = "jrc,jic->jri"}> : () -> ()
    %cst_12 = arith.constant dense<0.000000e+00> : vector<16x16x16xf32>
    %15 = tpu.matmul %13, %11, %cst_12 {dimension_numbers = #tpu.dot_dimension_numbers<[2], [2], [1], [1], [0, 0, 0, 1, 1, 1], [0], [0]>} : vector<16x16x8xbf16>, vector<16x16x8xbf16>, vector<16x16x16xf32> -> vector<16x16x16xf32>
    "tpu.trace_stop"() : () -> ()
    %16 = tpu.transpose %15, [1, 0, 2] : vector<16x16x16xf32> -> vector<16x16x16xf32>
    %17 = tpu.iota {dimensions = array<i32: 0>} : vector<16x16x16xi32>
    %18 = vector.broadcast %0 : i32 to vector<16x16x16xi32>
    %19 = arith.addi %18, %17 : vector<16x16x16xi32>
    %20 = tpu.iota {dimensions = array<i32: 2>} : vector<16x16x16xi32>
    %21 = arith.cmpi eq, %20, %19 : vector<16x16x16xi32>
    %cst_13 = arith.constant -1.000000e+30 : f32
    %22 = vector.broadcast %cst_13 : f32 to vector<16x16x16xf32>
    %23 = arith.select %21, %22, %16 : vector<16x16x16xi1>, vector<16x16x16xf32>
    %24 = tpu.concatenate %14, %23 in 2 : vector<16x16x16xf32>, vector<16x16x16xf32> -> vector<16x16x32xf32>
    %cst_14 = arith.constant dense<0xFF800000> : vector<16x16xf32>
    %25 = vector.multi_reduction <maximumf>, %24, %cst_14 [2] : vector<16x16x32xf32> to vector<16x16xf32>
    %26 = vector.shape_cast %25 : vector<16x16xf32> to vector<16x16x1xf32>
    %27 = vector.broadcast %26 : vector<16x16x1xf32> to vector<16x16x32xf32>
    %28 = arith.subf %24, %27 : vector<16x16x32xf32>
    %29 = math.exp %28 : vector<16x16x32xf32>
    %cst_15 = arith.constant dense<0.000000e+00> : vector<16x16xf32>
    %30 = vector.multi_reduction <add>, %29, %cst_15 [2] : vector<16x16x32xf32> to vector<16x16xf32>
    %31 = vector.shape_cast %30 : vector<16x16xf32> to vector<16x16x1xf32>
    %32 = tpu.reciprocal %31 {approx = true} : vector<16x16x1xf32> -> vector<16x16x1xf32>
    %33 = vector.broadcast %32 : vector<16x16x1xf32> to vector<16x16x32xf32>
    %34 = arith.mulf %29, %33 : vector<16x16x32xf32>
    %35 = vector.extract_strided_slice %34 {offsets = [0, 0, 0], sizes = [16, 16, 16], strides = [1, 1, 1]} : vector<16x16x32xf32> to vector<16x16x16xf32>
    %36 = arith.truncf %35 : vector<16x16x16xf32> to vector<16x16x16xbf16>
    %37 = vector.extract_strided_slice %34 {offsets = [0, 0, 16], sizes = [16, 16, 16], strides = [1, 1, 1]} : vector<16x16x32xf32> to vector<16x16x16xf32>
    %38 = tpu.transpose %37, [1, 0, 2] : vector<16x16x16xf32> -> vector<16x16x16xf32>
    %39 = arith.truncf %38 : vector<16x16x16xf32> to vector<16x16x16xbf16>
    "tpu.trace_start"() <{level = 10 : i32, message = "rjk,rkc->rjc"}> : () -> ()
    %cst_16 = arith.constant dense<0.000000e+00> : vector<16x16x64xf32>
    %40 = tpu.matmul %36, %10, %cst_16 {dimension_numbers = #tpu.dot_dimension_numbers<[2], [1], [1], [2], [0, 0, 0, 1, 1, 2], [0], [0]>} : vector<16x16x16xbf16>, vector<16x16x64xbf16>, vector<16x16x64xf32> -> vector<16x16x64xf32>
    "tpu.trace_stop"() : () -> ()
    "tpu.trace_start"() <{level = 10 : i32, message = "jri,jic->jrc"}> : () -> ()
    %cst_17 = arith.constant dense<0.000000e+00> : vector<16x16x64xf32>
    %41 = tpu.matmul %39, %12, %cst_17 {dimension_numbers = #tpu.dot_dimension_numbers<[2], [1], [1], [2], [0, 0, 0, 1, 1, 2], [0], [0]>} : vector<16x16x16xbf16>, vector<16x16x64xbf16>, vector<16x16x64xf32> -> vector<16x16x64xf32>
    "tpu.trace_stop"() : () -> ()
    %42 = tpu.transpose %41, [1, 0, 2] : vector<16x16x64xf32> -> vector<16x16x64xf32>
    %43 = arith.addf %40, %42 : vector<16x16x64xf32>
    %44 = vector.broadcast %1 : f32 to vector<16x16x64xf32>
    %45 = arith.mulf %44, %43 : vector<16x16x64xf32>
    %46 = arith.addf %45, %7 : vector<16x16x64xf32>
    %c0_18 = arith.constant 0 : index
    %c0_19 = arith.constant 0 : index
    %c0_20 = arith.constant 0 : index
    %c0_21 = arith.constant 0 : index
    %47 = vector.load %arg6[%c0_18, %c0_19, %c0_20, %c0_21] : memref<1x16x16x64xf32, #tpu.memory_space<vmem>>, vector<1x16x16x64xf32>
    %48 = vector.shape_cast %47 : vector<1x16x16x64xf32> to vector<16x16x64xf32>
    %49 = vector.shape_cast %46 : vector<16x16x64xf32> to vector<1x16x16x64xf32>
    tpu.vector_store %arg6[%c0_18, %c0_19, %c0_20, %c0_21], %49 {strides = array<i32>} : memref<1x16x16x64xf32, #tpu.memory_space<vmem>>, vector<1x16x16x64xf32>,
    return
  }
  func.func @transform_0(%arg0: i32, %arg1: i32) -> i32 {
    %c0_i32 = arith.constant 0 : i32
    %c0_i32_0 = arith.constant 0 : i32
    return %c0_i32 : i32
  }
  func.func @transform_1(%arg0: i32, %arg1: i32) -> (i32, i32, i32, i32) {
    %c0_i32 = arith.constant 0 : i32
    %c0_i32_0 = arith.constant 0 : i32
    %c0_i32_1 = arith.constant 0 : i32
    return %arg0, %arg1, %c0_i32, %c0_i32_0 : i32, i32, i32, i32
  }
  func.func @transform_2(%arg0: i32, %arg1: i32) -> (i32, i32, i32, i32) {
    %c0_i32 = arith.constant 0 : i32
    %c0_i32_0 = arith.constant 0 : i32
    %c0_i32_1 = arith.constant 0 : i32
    %c0_i32_2 = arith.constant 0 : i32
    return %arg0, %c0_i32, %c0_i32_0, %c0_i32_1 : i32, i32, i32, i32
  }
  func.func @transform_3(%arg0: i32, %arg1: i32) -> (i32, i32, i32, i32) {
    %c0_i32 = arith.constant 0 : i32
    %c0_i32_0 = arith.constant 0 : i32
    %c0_i32_1 = arith.constant 0 : i32
    return %arg0, %arg1, %c0_i32, %c0_i32_0 : i32, i32, i32, i32
  }
  func.func @transform_4(%arg0: i32, %arg1: i32) -> (i32, i32, i32, i32) {
    %c0_i32 = arith.constant 0 : i32
    %c0_i32_0 = arith.constant 0 : i32
    %c0_i32_1 = arith.constant 0 : i32
    return %arg0, %arg1, %c0_i32, %c0_i32_0 : i32, i32, i32, i32
  }
}

</mosaic_0001>

<bundles_post_ra>
// kernel: cca_forward.2
= control target key start
LH: loop header
LB: loop body
LE: loop exit
PB: predicated region body
PF: predicated region fallthrough
CT: control target
= control target key end

     0   :  { %vm278_vm0 = vcmask 523264   ;;  %s1853_s1 = inlined_call_operand.vmem [shape: bf16[64,128], index: 1, kind: input, shape index: {}]   ;;  %s1854_s0 = inlined_call_operand.vmem [shape: bf16[512,64], index: 0, kind: input, shape index: {}]   ;;  %s1855_s2 = inlined_call_operand.vmem [shape: f32[1,128], index: 2, kind: input, shape index: {}]   ;;  %s1856_s3 = inlined_call_operand.vmem [shape: bf16[512,128], index: 3, kind: output, shape index: {}]  }
   0x1   :  { %v1492_v0 = vld [vmem:[%s1853_s1 + $0x18] sm:$0xff]   ;;  %v1493_v1 = vld [vmem:[%s1853_s1 + $0x10] sm:$0xff]   ;;  %v1494_v2 = vld [vmem:[%s1853_s1 + $0x8] sm:$0xff]  }
   0x2   :  { %1412 = vmatprep.subr.bf16.mxu0 %v1492_v0  ;;  %1484 = vmatprep.subr.bf16.mxu1 %v1492_v0  ;;  %v1496_v3 = vld [vmem:[%s1854_s0] sm:$0xff]   ;;  %v1498_v6 = vld [vmem:[%s1854_s0 + $0x8] sm:$0xff]   ;;  %v1500_v8 = vld [vmem:[%s1854_s0 + $0x10] sm:$0xff]  }
   0x3   :  { %1413 = vmatpush3.bf16.msra.mxu0 %v1492_v0  ;;  %1488 = vmatpush3.bf16.msra.mxu1 %v1492_v0  ;;  %v1497_v4 = vld [vmem:[%s1854_s0 + $0x80] sm:$0xff]   ;;  %v1499_v7 = vld [vmem:[%s1854_s0 + $0x88] sm:$0xff]   ;;  %v1501_v9 = vld [vmem:[%s1854_s0 + $0x90] sm:$0xff]  }
   0x4   :  { %1414 = vmatprep.subr.bf16.mxu0 %v1493_v1  ;;  %1485 = vmatprep.subr.bf16.mxu1 %v1493_v1  ;;  %v1495_v5 = vld [vmem:[%s1853_s1] sm:$0xff]   ;;  %v1502_v10 = vld [vmem:[%s1854_s0 + $0x18] sm:$0xff]   ;;  %v1506_v14 = vld [vmem:[%s1854_s0 + $0x28] sm:$0xff]  }
   0x5   :  { %1420 = vmatprep.mubr.msk.bf16.mxu0 %vm278_vm0, %v1496_v3  ;;  %1452 = vmatprep.mubr.msk.bf16.mxu1 %vm278_vm0, %v1497_v4  ;;  %v1503_v11 = vld [vmem:[%s1854_s0 + $0x98] sm:$0xff]   ;;  %v1504_v12 = vld [vmem:[%s1854_s0 + $0x20] sm:$0xff]   ;;  %v1507_v15 = vld [vmem:[%s1854_s0 + $0xa8] sm:$0xff]  }
   0x6   :  { %v1505_v13 = vld [vmem:[%s1854_s0 + $0xa0] sm:$0xff]   ;;  %v1508_v16 = vld [vmem:[%s1854_s0 + $0x30] sm:$0xff]   ;;  %v1510_v18 = vld [vmem:[%s1854_s0 + $0x38] sm:$0xff]  }
   0x7   :  { %1415 = vmatpush3.bf16.msra.mxu0 %v1493_v1  ;;  %1489 = vmatpush3.bf16.msra.mxu1 %v1493_v1  ;;  %v1509_v17 = vld [vmem:[%s1854_s0 + $0xb0] sm:$0xff]   ;;  %v1511_v19 = vld [vmem:[%s1854_s0 + $0xb8] sm:$0xff]   ;;  %v1512_v20 = vld [vmem:[%s1854_s0 + $0x40] sm:$0xff]  }
   0x8   :  { %1416 = vmatprep.subr.bf16.mxu0 %v1494_v2  ;;  %1486 = vmatprep.subr.bf16.mxu1 %v1494_v2  ;;  %v1513_v21 = vld [vmem:[%s1854_s0 + $0xc0] sm:$0xff]   ;;  %v1514_v22 = vld [vmem:[%s1854_s0 + $0x48] sm:$0xff]   ;;  %v1516_v24 = vld [vmem:[%s1854_s0 + $0x50] sm:$0xff]  }
   0x9   :  { %v1515_v23 = vld [vmem:[%s1854_s0 + $0xc8] sm:$0xff]   ;;  %v1517_v25 = vld [vmem:[%s1854_s0 + $0xd0] sm:$0xff]   ;;  %v1518_v26 = vld [vmem:[%s1854_s0 + $0x58] sm:$0xff]  }
   0xa   :  { %v1519_v27 = vld [vmem:[%s1854_s0 + $0xd8] sm:$0xff]   ;;  %v1520_v28 = vld [vmem:[%s1854_s0 + $0x60] sm:$0xff]   ;;  %v1522_v30 = vld [vmem:[%s1854_s0 + $0x68] sm:$0xff]  }
   0xb   :  { %1417 = vmatpush3.bf16.msra.mxu0 %v1494_v2  ;;  %1490 = vmatpush3.bf16.msra.mxu1 %v1494_v2  ;;  %v1521_v29 = vld [vmem:[%s1854_s0 + $0xe0] sm:$0xff]   ;;  %v1523_v31 = vld [vmem:[%s1854_s0 + $0xe8] sm:$0xff]   ;;  %v1524_v32 = vld [vmem:[%s1854_s0 + $0x70] sm:$0xff]  }
   0xc   :  { %1418 = vmatprep.subr.bf16.mxu0 %v1495_v5  ;;  %1487 = vmatprep.subr.bf16.mxu1 %v1495_v5  ;;  %v1525_v33 = vld [vmem:[%s1854_s0 + $0xf0] sm:$0xff]   ;;  %v1526_v34 = vld [vmem:[%s1854_s0 + $0x78] sm:$0xff]   ;;  %v1691_v38 = vld [vmem:[%s1855_s2] ss:$0 sm:$0xff] }
   0xd   :  { %v1527_v35 = vld [vmem:[%s1854_s0 + $0xf8] sm:$0xff]  }
   0xf   :  { %1419 = vmatpush3.bf16.msra.mxu0 %v1495_v5  ;;  %1491 = vmatpush3.bf16.msra.mxu1 %v1495_v5 }
  0x12   :  { %1421 = vmatmul.mubr.msk.bf16.vlgmr.msra.gmra.mxu0 %vm278_vm0, %v1498_v6  ;;  %1453 = vmatmul.mubr.msk.bf16.vlgmr.msra.gmra.mxu1 %vm278_vm0, %v1499_v7 }
  0x13   :  { %1424 = vmatprep.mubr.msk.bf16.mxu0 %vm278_vm0, %v1500_v8  ;;  %1456 = vmatprep.mubr.msk.bf16.mxu1 %vm278_vm0, %v1501_v9 }
  0x1a   :  { %1425 = vmatmul.mubr.msk.bf16.gmra.mxu0 %vm278_vm0, %v1502_v10  ;;  %1457 = vmatmul.mubr.msk.bf16.gmra.mxu1 %vm278_vm0, %v1503_v11 }
  0x1b   :  { %1428 = vmatprep.mubr.msk.bf16.mxu0 %vm278_vm0, %v1504_v12  ;;  %1460 = vmatprep.mubr.msk.bf16.mxu1 %vm278_vm0, %v1505_v13 }
  0x22   :  { %1429 = vmatmul.mubr.msk.bf16.gmra.mxu0 %vm278_vm0, %v1506_v14  ;;  %1461 = vmatmul.mubr.msk.bf16.gmra.mxu1 %vm278_vm0, %v1507_v15 }
  0x23   :  { %1432 = vmatprep.mubr.msk.bf16.mxu0 %vm278_vm0, %v1508_v16  ;;  %1464 = vmatprep.mubr.msk.bf16.mxu1 %vm278_vm0, %v1509_v17 }
  0x2a   :  { %1433 = vmatmul.mubr.msk.bf16.gmra.mxu0 %vm278_vm0, %v1510_v18  ;;  %1465 = vmatmul.mubr.msk.bf16.gmra.mxu1 %vm278_vm0, %v1511_v19 }
  0x2b   :  { %1436 = vmatprep.mubr.msk.bf16.mxu0 %vm278_vm0, %v1512_v20  ;;  %1468 = vmatprep.mubr.msk.bf16.mxu1 %vm278_vm0, %v1513_v21 }
  0x32   :  { %1437 = vmatmul.mubr.msk.bf16.gmra.mxu0 %vm278_vm0, %v1514_v22  ;;  %1469 = vmatmul.mubr.msk.bf16.gmra.mxu1 %vm278_vm0, %v1515_v23 }
  0x33   :  { %1440 = vmatprep.mubr.msk.bf16.mxu0 %vm278_vm0, %v1516_v24  ;;  %1472 = vmatprep.mubr.msk.bf16.mxu1 %vm278_vm0, %v1517_v25 }
  0x3a   :  { %1441 = vmatmul.mubr.msk.bf16.gmra.mxu0 %vm278_vm0, %v1518_v26  ;;  %1473 = vmatmul.mubr.msk.bf16.gmra.mxu1 %vm278_vm0, %v1519_v27 }
  0x3b   :  { %1444 = vmatprep.mubr.msk.bf16.mxu0 %vm278_vm0, %v1520_v28  ;;  %1476 = vmatprep.mubr.msk.bf16.mxu1 %vm278_vm0, %v1521_v29 }
  0x42   :  { %1445 = vmatmul.mubr.msk.bf16.gmra.mxu0 %vm278_vm0, %v1522_v30  ;;  %1477 = vmatmul.mubr.msk.bf16.gmra.mxu1 %vm278_vm0, %v1523_v31 }
  0x43   :  { %1448 = vmatprep.mubr.msk.bf16.mxu0 %vm278_vm0, %v1524_v32  ;;  %1480 = vmatprep.mubr.msk.bf16.mxu1 %vm278_vm0, %v1525_v33 }
  0x4a   :  { %1449 = vmatmul.mubr.msk.bf16.gmra.mxu0 %vm278_vm0, %v1526_v34  ;;  %1481 = vmatmul.mubr.msk.bf16.gmra.mxu1 %vm278_vm0, %v1527_v35 }
  0xd2   :  { %v1422_v36 = vpop.f32.mrf.mxu0  ;;  %v1454_v37 = vpop.f32.mrf.mxu1 }
  0xd3   :  { %v418_v43 = vadd.f32 %v1422_v36, %v1691_v38  ;;  %v546_v44 = vadd.f32 %v1454_v37, %v1691_v38 }
  0xd4   :  { %v409_v39 = vpop.f32.mrf.mxu0  ;;  %v537_v40 = vpop.f32.mrf.mxu1 }
  0xd5   :  { %v410_v47 = vadd.f32 %v1691_v38, %v409_v39  ;;  %v538_v48 = vadd.f32 %v1691_v38, %v537_v40 }
  0xd6   :  { %v1423_v41 = vpop.f32.mrf.mxu0  ;;  %v1455_v42 = vpop.f32.mrf.mxu1 }
  0xd7   :  { %v421_v45 = vadd.f32 %v1423_v41, %v1691_v38  ;;  %v549_v46 = vadd.f32 %v1455_v42, %v1691_v38 }
  0xd8   :  { %v412_v49 = vpop.f32.mrf.mxu0  ;;  %v540_v50 = vpop.f32.mrf.mxu1 }
  0xd9   :  { %v1193_v51 = vpack.c.bf16 %v421_v45, %v418_v43  ;;  %v1273_v52 = vpack.c.bf16 %v549_v46, %v546_v44  ;;  %v413_v53 = vadd.f32 %v1691_v38, %v412_v49  ;;  %v541_v54 = vadd.f32 %v1691_v38, %v540_v50 }
  0xda   :  { %v1426_v55 = vpop.f32.mrf.mxu0  ;;  %v1458_v56 = vpop.f32.mrf.mxu1 }
  0xdb   :  { %1345 = vst [vmem:[%s1856_s3 + $0x8] sm:$0xff] %v1193_v51   ;;  %1361 = vst [vmem:[%s1856_s3 + $0x88] sm:$0xff] %v1273_v52   ;;  %v1188_v57 = vpack.c.bf16 %v413_v53, %v410_v47  ;;  %v1268_v58 = vpack.c.bf16 %v541_v54, %v538_v48  ;;  %v434_v63 = vadd.f32 %v1426_v55, %v1691_v38 }
  0xdc   :  { %v425_v59 = vpop.f32.mrf.mxu0  ;;  %v553_v60 = vpop.f32.mrf.mxu1  ;;  %v562_v0 = vadd.f32 %v1458_v56, %v1691_v38 }
  0xdd   :  { %1189 = vst [vmem:[%s1856_s3] sm:$0xff] %v1188_v57   ;;  %1360 = vst [vmem:[%s1856_s3 + $0x80] sm:$0xff] %v1268_v58   ;;  %v426_v3 = vadd.f32 %v1691_v38, %v425_v59  ;;  %v554_v4 = vadd.f32 %v1691_v38, %v553_v60 }
  0xde   :  { %v1427_v61 = vpop.f32.mrf.mxu0  ;;  %v1459_v62 = vpop.f32.mrf.mxu1 }
  0xdf   :  { %v437_v1 = vadd.f32 %v1427_v61, %v1691_v38  ;;  %v565_v2 = vadd.f32 %v1459_v62, %v1691_v38 }
  0xe0   :  { %v428_v5 = vpop.f32.mrf.mxu0  ;;  %v556_v6 = vpop.f32.mrf.mxu1 }
  0xe1   :  { %v1203_v7 = vpack.c.bf16 %v437_v1, %v434_v63  ;;  %v1283_v8 = vpack.c.bf16 %v565_v2, %v562_v0  ;;  %v429_v9 = vadd.f32 %v1691_v38, %v428_v5  ;;  %v557_v10 = vadd.f32 %v1691_v38, %v556_v6 }
  0xe2   :  { %v1430_v11 = vpop.f32.mrf.mxu0  ;;  %v1462_v12 = vpop.f32.mrf.mxu1 }
  0xe3   :  { %1347 = vst [vmem:[%s1856_s3 + $0x18] sm:$0xff] %v1203_v7   ;;  %1363 = vst [vmem:[%s1856_s3 + $0x98] sm:$0xff] %v1283_v8   ;;  %v1198_v13 = vpack.c.bf16 %v429_v9, %v426_v3  ;;  %v1278_v14 = vpack.c.bf16 %v557_v10, %v554_v4  ;;  %v450_v19 = vadd.f32 %v1430_v11, %v1691_v38 }
  0xe4   :  { %v441_v15 = vpop.f32.mrf.mxu0  ;;  %v569_v16 = vpop.f32.mrf.mxu1  ;;  %v578_v20 = vadd.f32 %v1462_v12, %v1691_v38 }
  0xe5   :  { %1346 = vst [vmem:[%s1856_s3 + $0x10] sm:$0xff] %v1198_v13   ;;  %1362 = vst [vmem:[%s1856_s3 + $0x90] sm:$0xff] %v1278_v14   ;;  %v442_v23 = vadd.f32 %v1691_v38, %v441_v15  ;;  %v570_v24 = vadd.f32 %v1691_v38, %v569_v16 }
  0xe6   :  { %v1431_v17 = vpop.f32.mrf.mxu0  ;;  %v1463_v18 = vpop.f32.mrf.mxu1 }
  0xe7   :  { %v453_v21 = vadd.f32 %v1431_v17, %v1691_v38  ;;  %v581_v22 = vadd.f32 %v1463_v18, %v1691_v38 }
  0xe8   :  { %v444_v25 = vpop.f32.mrf.mxu0  ;;  %v572_v26 = vpop.f32.mrf.mxu1 }
  0xe9   :  { %v1213_v27 = vpack.c.bf16 %v453_v21, %v450_v19  ;;  %v1293_v28 = vpack.c.bf16 %v581_v22, %v578_v20  ;;  %v445_v29 = vadd.f32 %v1691_v38, %v444_v25  ;;  %v573_v30 = vadd.f32 %v1691_v38, %v572_v26 }
  0xea   :  { %v1434_v31 = vpop.f32.mrf.mxu0  ;;  %v1466_v32 = vpop.f32.mrf.mxu1 }
  0xeb   :  { %1349 = vst [vmem:[%s1856_s3 + $0x28] sm:$0xff] %v1213_v27   ;;  %1365 = vst [vmem:[%s1856_s3 + $0xa8] sm:$0xff] %v1293_v28   ;;  %v1208_v33 = vpack.c.bf16 %v445_v29, %v442_v23  ;;  %v1288_v34 = vpack.c.bf16 %v573_v30, %v570_v24  ;;  %v466_v40 = vadd.f32 %v1434_v31, %v1691_v38 }
  0xec   :  { %v457_v35 = vpop.f32.mrf.mxu0  ;;  %v585_v36 = vpop.f32.mrf.mxu1  ;;  %v594_v41 = vadd.f32 %v1466_v32, %v1691_v38 }
  0xed   :  { %1348 = vst [vmem:[%s1856_s3 + $0x20] sm:$0xff] %v1208_v33   ;;  %1364 = vst [vmem:[%s1856_s3 + $0xa0] sm:$0xff] %v1288_v34   ;;  %v458_v44 = vadd.f32 %v1691_v38, %v457_v35  ;;  %v586_v45 = vadd.f32 %v1691_v38, %v585_v36 }
  0xee   :  { %v1435_v37 = vpop.f32.mrf.mxu0  ;;  %v1467_v39 = vpop.f32.mrf.mxu1 }
  0xef   :  { %v469_v42 = vadd.f32 %v1435_v37, %v1691_v38  ;;  %v597_v43 = vadd.f32 %v1467_v39, %v1691_v38 }
  0xf0   :  { %v460_v46 = vpop.f32.mrf.mxu0  ;;  %v588_v47 = vpop.f32.mrf.mxu1 }
  0xf1   :  { %v1223_v48 = vpack.c.bf16 %v469_v42, %v466_v40  ;;  %v1303_v49 = vpack.c.bf16 %v597_v43, %v594_v41  ;;  %v461_v50 = vadd.f32 %v1691_v38, %v460_v46  ;;  %v589_v51 = vadd.f32 %v1691_v38, %v588_v47 }
  0xf2   :  { %v1438_v52 = vpop.f32.mrf.mxu0  ;;  %v1470_v53 = vpop.f32.mrf.mxu1 }
  0xf3   :  { %1351 = vst [vmem:[%s1856_s3 + $0x38] sm:$0xff] %v1223_v48   ;;  %1367 = vst [vmem:[%s1856_s3 + $0xb8] sm:$0xff] %v1303_v49   ;;  %v1218_v54 = vpack.c.bf16 %v461_v50, %v458_v44  ;;  %v1298_v55 = vpack.c.bf16 %v589_v51, %v586_v45  ;;  %v482_v60 = vadd.f32 %v1438_v52, %v1691_v38 }
  0xf4   :  { %v473_v56 = vpop.f32.mrf.mxu0  ;;  %v601_v57 = vpop.f32.mrf.mxu1  ;;  %v610_v61 = vadd.f32 %v1470_v53, %v1691_v38 }
  0xf5   :  { %1350 = vst [vmem:[%s1856_s3 + $0x30] sm:$0xff] %v1218_v54   ;;  %1366 = vst [vmem:[%s1856_s3 + $0xb0] sm:$0xff] %v1298_v55   ;;  %v474_v0 = vadd.f32 %v1691_v38, %v473_v56  ;;  %v602_v1 = vadd.f32 %v1691_v38, %v601_v57 }
  0xf6   :  { %v1439_v58 = vpop.f32.mrf.mxu0  ;;  %v1471_v59 = vpop.f32.mrf.mxu1 }
  0xf7   :  { %v485_v62 = vadd.f32 %v1439_v58, %v1691_v38  ;;  %v613_v63 = vadd.f32 %v1471_v59, %v1691_v38 }
  0xf8   :  { %v476_v2 = vpop.f32.mrf.mxu0  ;;  %v604_v3 = vpop.f32.mrf.mxu1 }
  0xf9   :  { %v1233_v4 = vpack.c.bf16 %v485_v62, %v482_v60  ;;  %v1313_v5 = vpack.c.bf16 %v613_v63, %v610_v61  ;;  %v477_v6 = vadd.f32 %v1691_v38, %v476_v2  ;;  %v605_v7 = vadd.f32 %v1691_v38, %v604_v3 }
  0xfa   :  { %v1442_v8 = vpop.f32.mrf.mxu0  ;;  %v1474_v9 = vpop.f32.mrf.mxu1 }
  0xfb   :  { %1353 = vst [vmem:[%s1856_s3 + $0x48] sm:$0xff] %v1233_v4   ;;  %1369 = vst [vmem:[%s1856_s3 + $0xc8] sm:$0xff] %v1313_v5   ;;  %v1228_v10 = vpack.c.bf16 %v477_v6, %v474_v0  ;;  %v1308_v11 = vpack.c.bf16 %v605_v7, %v602_v1  ;;  %v498_v16 = vadd.f32 %v1442_v8, %v1691_v38 }
  0xfc   :  { %v489_v12 = vpop.f32.mrf.mxu0  ;;  %v617_v13 = vpop.f32.mrf.mxu1  ;;  %v626_v17 = vadd.f32 %v1474_v9, %v1691_v38 }
  0xfd   :  { %1352 = vst [vmem:[%s1856_s3 + $0x40] sm:$0xff] %v1228_v10   ;;  %1368 = vst [vmem:[%s1856_s3 + $0xc0] sm:$0xff] %v1308_v11   ;;  %v490_v20 = vadd.f32 %v1691_v38, %v489_v12  ;;  %v618_v21 = vadd.f32 %v1691_v38, %v617_v13 }
  0xfe   :  { %v1443_v14 = vpop.f32.mrf.mxu0  ;;  %v1475_v15 = vpop.f32.mrf.mxu1 }
  0xff   :  { %v501_v18 = vadd.f32 %v1443_v14, %v1691_v38  ;;  %v629_v19 = vadd.f32 %v1475_v15, %v1691_v38 }
 0x100   :  { %v492_v22 = vpop.f32.mrf.mxu0  ;;  %v620_v23 = vpop.f32.mrf.mxu1 }
 0x101   :  { %v1243_v24 = vpack.c.bf16 %v501_v18, %v498_v16  ;;  %v1323_v25 = vpack.c.bf16 %v629_v19, %v626_v17  ;;  %v493_v26 = vadd.f32 %v1691_v38, %v492_v22  ;;  %v621_v27 = vadd.f32 %v1691_v38, %v620_v23 }
 0x102   :  { %v1446_v28 = vpop.f32.mrf.mxu0  ;;  %v1478_v29 = vpop.f32.mrf.mxu1 }
 0x103   :  { %1355 = vst [vmem:[%s1856_s3 + $0x58] sm:$0xff] %v1243_v24   ;;  %1371 = vst [vmem:[%s1856_s3 + $0xd8] sm:$0xff] %v1323_v25   ;;  %v1238_v30 = vpack.c.bf16 %v493_v26, %v490_v20  ;;  %v1318_v31 = vpack.c.bf16 %v621_v27, %v618_v21  ;;  %v514_v36 = vadd.f32 %v1446_v28, %v1691_v38 }
 0x104   :  { %v505_v32 = vpop.f32.mrf.mxu0  ;;  %v633_v33 = vpop.f32.mrf.mxu1  ;;  %v642_v37 = vadd.f32 %v1478_v29, %v1691_v38 }
 0x105   :  { %1354 = vst [vmem:[%s1856_s3 + $0x50] sm:$0xff] %v1238_v30   ;;  %1370 = vst [vmem:[%s1856_s3 + $0xd0] sm:$0xff] %v1318_v31   ;;  %v506_v41 = vadd.f32 %v1691_v38, %v505_v32  ;;  %v634_v42 = vadd.f32 %v1691_v38, %v633_v33 }
 0x106   :  { %v1447_v34 = vpop.f32.mrf.mxu0  ;;  %v1479_v35 = vpop.f32.mrf.mxu1 }
 0x107   :  { %v517_v39 = vadd.f32 %v1447_v34, %v1691_v38  ;;  %v645_v40 = vadd.f32 %v1479_v35, %v1691_v38 }
 0x108   :  { %v508_v43 = vpop.f32.mrf.mxu0  ;;  %v636_v44 = vpop.f32.mrf.mxu1 }
 0x109   :  { %v1253_v45 = vpack.c.bf16 %v517_v39, %v514_v36  ;;  %v1333_v46 = vpack.c.bf16 %v645_v40, %v642_v37  ;;  %v509_v47 = vadd.f32 %v1691_v38, %v508_v43  ;;  %v637_v48 = vadd.f32 %v1691_v38, %v636_v44 }
 0x10a   :  { %v1450_v49 = vpop.f32.mrf.mxu0  ;;  %v1482_v50 = vpop.f32.mrf.mxu1 }
 0x10b   :  { %1357 = vst [vmem:[%s1856_s3 + $0x68] sm:$0xff] %v1253_v45   ;;  %1373 = vst [vmem:[%s1856_s3 + $0xe8] sm:$0xff] %v1333_v46   ;;  %v1248_v51 = vpack.c.bf16 %v509_v47, %v506_v41  ;;  %v1328_v52 = vpack.c.bf16 %v637_v48, %v634_v42  ;;  %v530_v57 = vadd.f32 %v1450_v49, %v1691_v38 }
 0x10c   :  { %v521_v53 = vpop.f32.mrf.mxu0  ;;  %v649_v54 = vpop.f32.mrf.mxu1  ;;  %v658_v58 = vadd.f32 %v1482_v50, %v1691_v38 }
 0x10d   :  { %1356 = vst [vmem:[%s1856_s3 + $0x60] sm:$0xff] %v1248_v51   ;;  %1372 = vst [vmem:[%s1856_s3 + $0xe0] sm:$0xff] %v1328_v52   ;;  %v522_v61 = vadd.f32 %v1691_v38, %v521_v53  ;;  %v650_v62 = vadd.f32 %v1691_v38, %v649_v54 }
 0x10e   :  { %v1451_v55 = vpop.f32.mrf.mxu0  ;;  %v1483_v56 = vpop.f32.mrf.mxu1 }
 0x10f   :  { %v533_v59 = vadd.f32 %v1451_v55, %v1691_v38  ;;  %v661_v60 = vadd.f32 %v1483_v56, %v1691_v38 }
 0x110   :  { %v524_v63 = vpop.f32.mrf.mxu0  ;;  %v652_v0 = vpop.f32.mrf.mxu1 }
 0x111   :  { %v1263_v1 = vpack.c.bf16 %v533_v59, %v530_v57  ;;  %v1343_v2 = vpack.c.bf16 %v661_v60, %v658_v58  ;;  %v525_v3 = vadd.f32 %v1691_v38, %v524_v63  ;;  %v653_v4 = vadd.f32 %v1691_v38, %v652_v0 }
 0x113   :  { %1359 = vst [vmem:[%s1856_s3 + $0x78] sm:$0xff] %v1263_v1   ;;  %1375 = vst [vmem:[%s1856_s3 + $0xf8] sm:$0xff] %v1343_v2   ;;  %v1258_v5 = vpack.c.bf16 %v525_v3, %v522_v61  ;;  %v1338_v6 = vpack.c.bf16 %v653_v4, %v650_v62 }
 0x115   :  { %1358 = vst [vmem:[%s1856_s3 + $0x70] sm:$0xff] %v1258_v5   ;;  %1374 = vst [vmem:[%s1856_s3 + $0xf0] sm:$0xff] %v1338_v6  }

// kernel: cca_forward.3
= control target key start
LH: loop header
LB: loop body
LE: loop exit
PB: predicated region body
PF: predicated region fallthrough
CT: control target
= control target key end

     0   :  { %s7138_s17 = smov 0   ;;  %s7140_s18 = smov 0   ;;  %s9403_s0 = inlined_call_operand.<no memory space> [shape: f32[1], index: 0, kind: input, shape index: {}]   ;;  %s9404_s1 = inlined_call_operand.vmem [shape: bf16[2,16,16,128], index: 1, kind: input, shape index: {}]   ;;  %s9405_s2 = inlined_call_operand.vmem [shape: bf16[2,16,16,128], index: 2, kind: input, shape index: {}]   ;;  %s9406_s3 = inlined_call_operand.vmem [shape: f32[2,16,16,64], index: 3, kind: input, shape index: {}, may-alias: {3,4}]   ;;  %s9407_s4 = inlined_call_operand.vmem [shape: f32[2,16,16,64], index: 4, kind: output, shape index: {}, may-alias: {3,4}]  }
   0x1   :  { %9 = sst [smem:[#allocation2]] %s9403_s0  ;;  %s7142_s19 = smov 0  }
   0x2 LB: > { %s27_s0 = sadd.s32 1, %s7097_s18  ;;  %p6237_p0 = scmp.ge.s32.totalorder %s7101_s19, 1  ;;  %s7101_s19 = sphi %s7142_s19, %s15_s19   ;;  %s7097_s18 = sphi %s7140_s18, %s9572_s18   ;;  %s7093_s17 = sphi %s7138_s17, %s9571_s17  }
   0x3   : > { %p29_p1 = scmp.ge.s32.totalorder %s27_s0, 2  ;;  %p213_p2 = scmp.lt.s32.totalorder %s7101_s19, 3 }
   0x5   : > { %s9574_s0 = smov (%p29_p1, %s27_s0), 0  ;;  %p214_p3 = pnand %p6237_p0, %p213_p2 }
   0x7   : > { %217 = sbr.rel (%p214_p3) target bundleno = 1353 (0x549), region = 36 }
   0xc   : > { %p265_p4 = scmp.lt.s32.totalorder %s7093_s17, 1  ;;  %v9408_v0 = vmov 0.0   ;;  %vm9410_vm0 = vmmov 0   ;;  %s7105_s24 = smov 120   ;;  %vm408_vm1 = vcmask 64512  }
   0xd   : > { %6476 = vmatprep.subr.bf16.mxu0 %v9408_v0  ;;  %6482 = vmatprep.subr.bf16.mxu1 %v9408_v0  ;;  %s7106_s28 = smov 112   ;;  %s7109_s29 = smov 16  }
   0xe   : > { %s9576_s17 = smov (!%p265_p4, %s7093_s17), 1  ;;  %6478 = vmatprep.mubr.msk.bf16.mxu0 %vm9410_vm0, %v9408_v0  ;;  %6484 = vmatprep.mubr.msk.bf16.mxu1 %vm9410_vm0, %v9408_v0  ;;  %s304_s30 = sld [smem:[#allocation2]] }
   0xf   : > { %s6344_s20 = sshll.u32 %s9576_s17, 7  ;;  %s6346_s5 = sshll.u32 %s9576_s17, 8 }
  0x10   : > { %s7168_s23 = scalar_lea.vmem %s9404_s1, %s6344_s20  ;;  %s7214_s27 = scalar_lea.vmem %s9405_s2, %s6344_s20 }
  0x11   : > { %v7171_v1 = vld [vmem:[%s7168_s23] sm:$0xff]   ;;  %v7174_v2 = vld [vmem:[%s7168_s23 + $0x8] sm:$0xff]   ;;  %v7179_v3 = vld [vmem:[%s7168_s23 + $0x10] sm:$0xff]   ;;  %s9007_s8 = scalar_lea.vmem %s9406_s3, %s6346_s5  ;;  %s9126_s11 = scalar_lea.vmem %s9407_s4, %s6346_s5 }
  0x12   : > { %406 = vrot.lane.b32.xlu0 %v7171_v1, %s7105_s24  ;;  %515 = vrot.lane.b32.xlu1 %v7179_v3, %s7105_s24  ;;  %v7184_v4 = vld [vmem:[%s7168_s23 + $0x18] sm:$0xff]   ;;  %v7189_v5 = vld [vmem:[%s7168_s23 + $0x20] sm:$0xff]  }
  0x13   : > { %v7194_v6 = vld [vmem:[%s7168_s23 + $0x28] sm:$0xff]   ;;  %v7199_v7 = vld [vmem:[%s7168_s23 + $0x30] sm:$0xff]   ;;  %v7204_v8 = vld [vmem:[%s7168_s23 + $0x38] sm:$0xff]  }
  0x14   : > { %v7209_v9 = vld [vmem:[%s7168_s23 + $0x40] sm:$0xff]   ;;  %v7219_v10 = vld [vmem:[%s7168_s23 + $0x48] sm:$0xff]   ;;  %v7224_v11 = vld [vmem:[%s7168_s23 + $0x50] sm:$0xff]  }
  0x15   : > { %v7229_v12 = vld [vmem:[%s7168_s23 + $0x58] sm:$0xff]   ;;  %v7234_v13 = vld [vmem:[%s7168_s23 + $0x60] sm:$0xff]   ;;  %v7239_v14 = vld [vmem:[%s7168_s23 + $0x68] sm:$0xff]  }
  0x16   : > { %461 = vrot.lane.b32.xlu0 %v7174_v2, %s7105_s24  ;;  %569 = vrot.lane.b32.xlu1 %v7184_v4, %s7105_s24  ;;  %v7244_v15 = vld [vmem:[%s7168_s23 + $0x70] sm:$0xff]   ;;  %v7249_v16 = vld [vmem:[%s7168_s23 + $0x78] sm:$0xff]  }
  0x17   : > { %v7254_v17 = vld [vmem:[%s7214_s27] sm:$0xff]   ;;  %v7259_v18 = vld [vmem:[%s7214_s27 + $0x8] sm:$0xff]   ;;  %v7264_v19 = vld [vmem:[%s7214_s27 + $0x10] sm:$0xff]  }
  0x18   : > { %v7269_v20 = vld [vmem:[%s7214_s27 + $0x18] sm:$0xff]   ;;  %v7274_v21 = vld [vmem:[%s7214_s27 + $0x20] sm:$0xff]   ;;  %v7279_v22 = vld [vmem:[%s7214_s27 + $0x28] sm:$0xff]  }
  0x19   : > { %v7284_v23 = vld [vmem:[%s7214_s27 + $0x30] sm:$0xff]   ;;  %v7289_v24 = vld [vmem:[%s7214_s27 + $0x38] sm:$0xff]   ;;  %v7294_v25 = vld [vmem:[%s7214_s27 + $0x40] sm:$0xff]  }
  0x1a   : > { %623 = vrot.lane.b32.xlu0 %v7189_v5, %s7105_s24  ;;  %677 = vrot.lane.b32.xlu1 %v7194_v6, %s7105_s24  ;;  %v7299_v26 = vld [vmem:[%s7214_s27 + $0x48] sm:$0xff]   ;;  %v7304_v27 = vld [vmem:[%s7214_s27 + $0x50] sm:$0xff]  }
  0x1b   : > { %v7309_v28 = vld [vmem:[%s7214_s27 + $0x58] sm:$0xff]   ;;  %v7314_v29 = vld [vmem:[%s7214_s27 + $0x60] sm:$0xff]   ;;  %v7319_v30 = vld [vmem:[%s7214_s27 + $0x68] sm:$0xff]  }
  0x1c   : > { %v7324_v31 = vld [vmem:[%s7214_s27 + $0x70] sm:$0xff]   ;;  %v7329_v32 = vld [vmem:[%s7214_s27 + $0x78] sm:$0xff]  }
  0x1e   : > { %731 = vrot.lane.b32.xlu0 %v7199_v7, %s7105_s24  ;;  %785 = vrot.lane.b32.xlu1 %v7204_v8, %s7105_s24 }
  0x22   : > { %839 = vrot.lane.b32.xlu0 %v7209_v9, %s7105_s24  ;;  %893 = vrot.lane.b32.xlu1 %v7219_v10, %s7105_s24 }
  0x26   : > { %947 = vrot.lane.b32.xlu0 %v7224_v11, %s7105_s24  ;;  %1001 = vrot.lane.b32.xlu1 %v7229_v12, %s7105_s24 }
  0x2a   : > { %1055 = vrot.lane.b32.xlu0 %v7234_v13, %s7105_s24  ;;  %1109 = vrot.lane.b32.xlu1 %v7239_v14, %s7105_s24 }
  0x2e   : > { %1163 = vrot.lane.b32.xlu0 %v7244_v15, %s7105_s24  ;;  %1217 = vrot.lane.b32.xlu1 %v7249_v16, %s7105_s24 }
  0x32   : > { %1271 = vrot.lane.b32.xlu0 %v7254_v17, %s7105_s24  ;;  %1325 = vrot.lane.b32.xlu1 %v7259_v18, %s7105_s24 }
  0x36   : > { %1379 = vrot.lane.b32.xlu0 %v7264_v19, %s7105_s24  ;;  %1433 = vrot.lane.b32.xlu1 %v7269_v20, %s7105_s24 }
  0x3a   : > { %1487 = vrot.lane.b32.xlu0 %v7274_v21, %s7105_s24  ;;  %1541 = vrot.lane.b32.xlu1 %v7279_v22, %s7105_s24 }
  0x3e   : > { %1595 = vrot.lane.b32.xlu0 %v7284_v23, %s7105_s24  ;;  %1649 = vrot.lane.b32.xlu1 %v7289_v24, %s7105_s24 }
  0x42   : > { %1703 = vrot.lane.b32.xlu0 %v7294_v25, %s7105_s24  ;;  %1757 = vrot.lane.b32.xlu1 %v7299_v26, %s7105_s24 }
  0x46   : > { %1811 = vrot.lane.b32.xlu0 %v7304_v27, %s7105_s24  ;;  %1865 = vrot.lane.b32.xlu1 %v7309_v28, %s7105_s24 }
  0x4a   : > { %1919 = vrot.lane.b32.xlu0 %v7314_v29, %s7105_s24  ;;  %1973 = vrot.lane.b32.xlu1 %v7319_v30, %s7105_s24 }
  0x4e   : > { %2027 = vrot.lane.b32.xlu0 %v7324_v31, %s7105_s24  ;;  %2081 = vrot.lane.b32.xlu1 %v7329_v32, %s7105_s24 }
  0x52   : > { %4005 = vrot.lane.b32.xlu1 %v7259_v18, %s7106_s28  ;;  %3958 = vrot.lane.b32.xlu0 %v7254_v17, %s7106_s28 }
  0x56   : > { %4099 = vrot.lane.b32.xlu1 %v7269_v20, %s7106_s28  ;;  %4052 = vrot.lane.b32.xlu0 %v7264_v19, %s7106_s28 }
  0x84   : > { %v407_v33 = vpop.permute.xlu0 %406  ;;  %v516_v35 = vpop.permute.xlu1 %515 }
  0x85   : > { %v413_v34 = vsel %vm408_vm1, %v407_v33, 0  ;;  %v521_v38 = vsel %vm408_vm1, %v516_v35, 0 }
  0x86   : > { %6477 = vmatpush3.bf16.xpose.msra.mxu0 %v413_v34 }
  0x87   : > { %6488 = vmatprep.subr.bf16.mxu0 %v9408_v0 }
  0x88   : > { %v462_v36 = vpop.permute.xlu0 %461  ;;  %v570_v39 = vpop.permute.xlu1 %569 }
  0x89   : > { %v467_v37 = vsel %vm408_vm1, %v462_v36, 0  ;;  %v575_v40 = vsel %vm408_vm1, %v570_v39, 0 }
  0x8a   : > { %6483 = vmatpush3.bf16.xpose.msra.mxu1 %v467_v37 }
  0x8b   : > { %6494 = vmatprep.subr.bf16.mxu1 %v9408_v0 }
  0x8c   : > { %v624_v41 = vpop.permute.xlu0 %623  ;;  %v678_v43 = vpop.permute.xlu1 %677 }
  0x8d   : > { %6479 = vmatmul.mubr.msk.bf16.vlgmr.msra.gmra.mxu0 %vm408_vm1, %v7171_v1  ;;  %v629_v42 = vsel %vm408_vm1, %v624_v41, 0  ;;  %v683_v44 = vsel %vm408_vm1, %v678_v43, 0 }
  0x8e   : > { %6489 = vmatpush3.bf16.xpose.msra.mxu0 %v521_v38  ;;  %6490 = vmatprep.mubr.msk.bf16.mxu0 %vm9410_vm0, %v9408_v0 }
  0x8f   : > { %6500 = vmatprep.subr.bf16.mxu0 %v9408_v0 }
  0x90   : > { %v732_v45 = vpop.permute.xlu0 %731  ;;  %v786_v47 = vpop.permute.xlu1 %785 }
  0x91   : > { %6485 = vmatmul.mubr.msk.bf16.vlgmr.msra.gmra.mxu1 %vm408_vm1, %v7174_v2  ;;  %v737_v46 = vsel %vm408_vm1, %v732_v45, 0  ;;  %v791_v48 = vsel %vm408_vm1, %v786_v47, 0 }
  0x92   : > { %6495 = vmatpush3.bf16.xpose.msra.mxu1 %v575_v40  ;;  %6496 = vmatprep.mubr.msk.bf16.mxu1 %vm9410_vm0, %v9408_v0 }
  0x93   : > { %6506 = vmatprep.subr.bf16.mxu1 %v9408_v0 }
  0x94   : > { %v840_v49 = vpop.permute.xlu0 %839  ;;  %v894_v51 = vpop.permute.xlu1 %893 }
  0x95   : > { %6491 = vmatmul.mubr.msk.bf16.vlgmr.msra.gmra.mxu0 %vm408_vm1, %v7179_v3  ;;  %v845_v50 = vsel %vm408_vm1, %v840_v49, 0  ;;  %v899_v52 = vsel %vm408_vm1, %v894_v51, 0 }
  0x96   : > { %6501 = vmatpush3.bf16.xpose.msra.mxu0 %v629_v42  ;;  %6502 = vmatprep.mubr.msk.bf16.mxu0 %vm9410_vm0, %v9408_v0 }
  0x97   : > { %6512 = vmatprep.subr.bf16.mxu0 %v9408_v0 }
  0x98   : > { %v948_v53 = vpop.permute.xlu0 %947  ;;  %v1002_v55 = vpop.permute.xlu1 %1001 }
  0x99   : > { %6497 = vmatmul.mubr.msk.bf16.vlgmr.msra.gmra.mxu1 %vm408_vm1, %v7184_v4  ;;  %v953_v54 = vsel %vm408_vm1, %v948_v53, 0  ;;  %v1007_v56 = vsel %vm408_vm1, %v1002_v55, 0 }
  0x9a   : > { %6507 = vmatpush3.bf16.xpose.msra.mxu1 %v683_v44  ;;  %6508 = vmatprep.mubr.msk.bf16.mxu1 %vm9410_vm0, %v9408_v0 }
  0x9b   : > { %6518 = vmatprep.subr.bf16.mxu1 %v9408_v0 }
  0x9c   : > { %v1056_v57 = vpop.permute.xlu0 %1055  ;;  %v1110_v59 = vpop.permute.xlu1 %1109 }
  0x9d   : > { %6503 = vmatmul.mubr.msk.bf16.vlgmr.msra.gmra.mxu0 %vm408_vm1, %v7189_v5  ;;  %v1061_v58 = vsel %vm408_vm1, %v1056_v57, 0  ;;  %v1115_v60 = vsel %vm408_vm1, %v1110_v59, 0 }
  0x9e   : > { %6513 = vmatpush3.bf16.xpose.msra.mxu0 %v737_v46  ;;  %6514 = vmatprep.mubr.msk.bf16.mxu0 %vm9410_vm0, %v9408_v0 }
  0x9f   : > { %6524 = vmatprep.subr.bf16.mxu0 %v9408_v0 }
  0xa0   : > { %v1164_v61 = vpop.permute.xlu0 %1163  ;;  %v1218_v63 = vpop.permute.xlu1 %1217 }
  0xa1   : > { %6509 = vmatmul.mubr.msk.bf16.vlgmr.msra.gmra.mxu1 %vm408_vm1, %v7194_v6  ;;  %v1169_v62 = vsel %vm408_vm1, %v1164_v61, 0  ;;  %v1223_v1 = vsel %vm408_vm1, %v1218_v63, 0 }
  0xa2   : > { %6519 = vmatpush3.bf16.xpose.msra.mxu1 %v791_v48  ;;  %6520 = vmatprep.mubr.msk.bf16.mxu1 %vm9410_vm0, %v9408_v0 }
  0xa3   : > { %6530 = vmatprep.subr.bf16.mxu1 %v9408_v0 }
  0xa4   : > { %v1272_v2 = vpop.permute.xlu0 %1271  ;;  %v1326_v4 = vpop.permute.xlu1 %1325 }
  0xa5   : > { %6515 = vmatmul.mubr.msk.bf16.vlgmr.msra.gmra.mxu0 %vm408_vm1, %v7199_v7  ;;  %v1277_v3 = vsel %vm408_vm1, %v1272_v2, 0  ;;  %v1331_v5 = vsel %vm408_vm1, %v1326_v4, 0 }
  0xa6   : > { %6525 = vmatpush3.bf16.xpose.msra.mxu0 %v845_v50  ;;  %6526 = vmatprep.mubr.msk.bf16.mxu0 %vm9410_vm0, %v9408_v0 }
  0xa7   : > { %6536 = vmatprep.subr.bf16.mxu0 %v9408_v0 }
  0xa8   : > { %v1380_v6 = vpop.permute.xlu0 %1379 }
  0xa9   : > { %6521 = vmatmul.mubr.msk.bf16.vlgmr.msra.gmra.mxu1 %vm408_vm1, %v7204_v8  ;;  %v1385_v7 = vsel %vm408_vm1, %v1380_v6, 0  ;;  %v1434_v8 = vpop.permute.xlu1 %1433 }
  0xaa   : > { %6531 = vmatpush3.bf16.xpose.msra.mxu1 %v899_v52  ;;  %6532 = vmatprep.mubr.msk.bf16.mxu1 %vm9410_vm0, %v9408_v0 }
  0xab   : > { %6542 = vmatprep.subr.bf16.mxu1 %v9408_v0 }
  0xad   : > { %6527 = vmatmul.mubr.msk.bf16.vlgmr.msra.gmra.mxu0 %vm408_vm1, %v7209_v9  ;;  %v1439_v9 = vsel %vm408_vm1, %v1434_v8, 0 }
  0xae   : > { %6537 = vmatpush3.bf16.xpose.msra.mxu0 %v953_v54  ;;  %6538 = vmatprep.mubr.msk.bf16.mxu0 %vm9410_vm0, %v9408_v0 }
  0xaf   : > { %6548 = vmatprep.subr.bf16.mxu0 %v9408_v0 }
  0xb1   : > { %6533 = vmatmul.mubr.msk.bf16.vlgmr.msra.gmra.mxu1 %vm408_vm1, %v7219_v10  ;;  %v1488_v10 = vpop.permute.xlu0 %1487 }
  0xb2   : > { %6543 = vmatpush3.bf16.xpose.msra.mxu1 %v1007_v56  ;;  %6544 = vmatprep.mubr.msk.bf16.mxu1 %vm9410_vm0, %v9408_v0 }
  0xb3   : > { %6554 = vmatprep.subr.bf16.mxu1 %v9408_v0 }
  0xb5   : > { %6539 = vmatmul.mubr.msk.bf16.vlgmr.msra.gmra.mxu0 %vm408_vm1, %v7224_v11  ;;  %v1493_v11 = vsel %vm408_vm1, %v1488_v10, 0 }
  0xb6   : > { %6549 = vmatpush3.bf16.xpose.msra.mxu0 %v1061_v58  ;;  %6550 = vmatprep.mubr.msk.bf16.mxu0 %vm9410_vm0, %v9408_v0 }
  0xb7   : > { %6560 = vmatprep.subr.bf16.mxu0 %v9408_v0 }
  0xb9   : > { %6545 = vmatmul.mubr.msk.bf16.vlgmr.msra.gmra.mxu1 %vm408_vm1, %v7229_v12  ;;  %v1542_v12 = vpop.permute.xlu1 %1541 }
  0xba   : > { %6555 = vmatpush3.bf16.xpose.msra.mxu1 %v1115_v60  ;;  %6556 = vmatprep.mubr.msk.bf16.mxu1 %vm9410_vm0, %v9408_v0 }
  0xbb   : > { %6566 = vmatprep.subr.bf16.mxu1 %v9408_v0 }
  0xbd   : > { %6551 = vmatmul.mubr.msk.bf16.vlgmr.msra.gmra.mxu0 %vm408_vm1, %v7234_v13  ;;  %v1547_v13 = vsel %vm408_vm1, %v1542_v12, 0 }
  0xbe   : > { %6561 = vmatpush3.bf16.xpose.msra.mxu0 %v1169_v62  ;;  %6562 = vmatprep.mubr.msk.bf16.mxu0 %vm9410_vm0, %v9408_v0 }
  0xbf   : > { %6572 = vmatprep.subr.bf16.mxu0 %v9408_v0 }
  0xc1   : > { %6557 = vmatmul.mubr.msk.bf16.vlgmr.msra.gmra.mxu1 %vm408_vm1, %v7239_v14  ;;  %v1596_v14 = vpop.permute.xlu0 %1595 }
  0xc2   : > { %6567 = vmatpush3.bf16.xpose.msra.mxu1 %v1223_v1  ;;  %6568 = vmatprep.mubr.msk.bf16.mxu1 %vm9410_vm0, %v9408_v0 }
  0xc3   : > { %6578 = vmatprep.subr.bf16.mxu1 %v9408_v0 }
  0xc5   : > { %6563 = vmatmul.mubr.msk.bf16.vlgmr.msra.gmra.mxu0 %vm408_vm1, %v7244_v15  ;;  %v1601_v15 = vsel %vm408_vm1, %v1596_v14, 0  ;;  %v1704_v34 = vpop.permute.xlu0 %1703 }
  0xc6   : > { %6573 = vmatpush3.bf16.xpose.msra.mxu0 %v1277_v3  ;;  %6574 = vmatprep.mubr.msk.bf16.mxu0 %vm9410_vm0, %v9408_v0  ;;  %v1709_v35 = vsel %vm408_vm1, %v1704_v34, 0 }
  0xc7   : > { %6584 = vmatprep.subr.bf16.mxu0 %v9408_v0 }
  0xc9   : > { %6569 = vmatmul.mubr.msk.bf16.vlgmr.msra.gmra.mxu1 %vm408_vm1, %v7249_v16  ;;  %v1650_v16 = vpop.permute.xlu1 %1649 }
  0xca   : > { %6579 = vmatpush3.bf16.xpose.msra.mxu1 %v1331_v5  ;;  %6580 = vmatprep.mubr.msk.bf16.mxu1 %vm9410_vm0, %v9408_v0  ;;  %v1655_v33 = vsel %vm408_vm1, %v1650_v16, 0 }
  0xcb   : > { %6590 = vmatprep.subr.bf16.mxu1 %v9408_v0 }
  0xcd   : > { %6575 = vmatmul.mubr.msk.bf16.vlgmr.msra.gmra.mxu0 %vm408_vm1, %v7254_v17 }
  0xce   : > { %6585 = vmatpush3.bf16.xpose.msra.mxu0 %v1385_v7  ;;  %6586 = vmatprep.mubr.msk.bf16.mxu0 %vm9410_vm0, %v9408_v0 }
  0xcf   : > { %6596 = vmatprep.subr.bf16.mxu0 %v9408_v0 }
  0xd1   : > { %6581 = vmatmul.mubr.msk.bf16.vlgmr.msra.gmra.mxu1 %vm408_vm1, %v7259_v18 }
  0xd2   : > { %6591 = vmatpush3.bf16.xpose.msra.mxu1 %v1439_v9  ;;  %6592 = vmatprep.mubr.msk.bf16.mxu1 %vm9410_vm0, %v9408_v0 }
  0xd3   : > { %6602 = vmatprep.subr.bf16.mxu1 %v9408_v0 }
  0xd5   : > { %6587 = vmatmul.mubr.msk.bf16.vlgmr.msra.gmra.mxu0 %vm408_vm1, %v7264_v19 }
  0xd6   : > { %6597 = vmatpush3.bf16.xpose.msra.mxu0 %v1493_v11  ;;  %6598 = vmatprep.mubr.msk.bf16.mxu0 %vm9410_vm0, %v9408_v0 }
  0xd7   : > { %6608 = vmatprep.subr.bf16.mxu0 %v9408_v0 }
  0xd9   : > { %6593 = vmatmul.mubr.msk.bf16.vlgmr.msra.gmra.mxu1 %vm408_vm1, %v7269_v20 }
  0xda   : > { %6603 = vmatpush3.bf16.xpose.msra.mxu1 %v1547_v13  ;;  %6604 = vmatprep.mubr.msk.bf16.mxu1 %vm9410_vm0, %v9408_v0 }
  0xdb   : > { %6614 = vmatprep.subr.bf16.mxu1 %v9408_v0 }
  0xdd   : > { %6599 = vmatmul.mubr.msk.bf16.vlgmr.msra.gmra.mxu0 %vm408_vm1, %v7274_v21  ;;  %v1758_v21 = vpop.permute.xlu1 %1757 }
  0xde   : > { %6609 = vmatpush3.bf16.xpose.msra.mxu0 %v1601_v15  ;;  %6610 = vmatprep.mubr.msk.bf16.mxu0 %vm9410_vm0, %v9408_v0  ;;  %v1763_v36 = vsel %vm408_vm1, %v1758_v21, 0 }
  0xdf   : > { %6620 = vmatprep.subr.bf16.mxu0 %v9408_v0 }
  0xe1   : > { %6605 = vmatmul.mubr.msk.bf16.vlgmr.msra.gmra.mxu1 %vm408_vm1, %v7279_v22  ;;  %v1812_v22 = vpop.permute.xlu0 %1811 }
  0xe2   : > { %6615 = vmatpush3.bf16.xpose.msra.mxu1 %v1655_v33  ;;  %6616 = vmatprep.mubr.msk.bf16.mxu1 %vm9410_vm0, %v9408_v0  ;;  %v1817_v37 = vsel %vm408_vm1, %v1812_v22, 0 }
  0xe3   : > { %6626 = vmatprep.subr.bf16.mxu1 %v9408_v0 }
  0xe5   : > { %6611 = vmatmul.mubr.msk.bf16.vlgmr.msra.gmra.mxu0 %vm408_vm1, %v7284_v23  ;;  %v1866_v23 = vpop.permute.xlu1 %1865 }
  0xe6   : > { %6621 = vmatpush3.bf16.xpose.msra.mxu0 %v1709_v35  ;;  %6622 = vmatprep.mubr.msk.bf16.mxu0 %vm9410_vm0, %v9408_v0  ;;  %v1871_v38 = vsel %vm408_vm1, %v1866_v23, 0 }
  0xe7   : > { %6632 = vmatprep.subr.bf16.mxu0 %v9408_v0 }
  0xe9   : > { %6617 = vmatmul.mubr.msk.bf16.vlgmr.msra.gmra.mxu1 %vm408_vm1, %v7289_v24  ;;  %v1920_v24 = vpop.permute.xlu0 %1919 }
  0xea   : > { %6627 = vmatpush3.bf16.xpose.msra.mxu1 %v1763_v36  ;;  %6628 = vmatprep.mubr.msk.bf16.mxu1 %vm9410_vm0, %v9408_v0  ;;  %v1925_v39 = vsel %vm408_vm1, %v1920_v24, 0 }
  0xeb   : > { %6638 = vmatprep.subr.bf16.mxu1 %v9408_v0 }
  0xed   : > { %6623 = vmatmul.mubr.msk.bf16.vlgmr.msra.gmra.mxu0 %vm408_vm1, %v7294_v25  ;;  %v1974_v25 = vpop.permute.xlu1 %1973 }
  0xee   : > { %6633 = vmatpush3.bf16.xpose.msra.mxu0 %v1817_v37  ;;  %6634 = vmatprep.mubr.msk.bf16.mxu0 %vm9410_vm0, %v9408_v0  ;;  %v1979_v40 = vsel %vm408_vm1, %v1974_v25, 0 }
  0xef   : > { %6644 = vmatprep.subr.bf16.mxu0 %v9408_v0 }
  0xf1   : > { %6629 = vmatmul.mubr.msk.bf16.vlgmr.msra.gmra.mxu1 %vm408_vm1, %v7299_v26  ;;  %v2028_v26 = vpop.permute.xlu0 %2027 }
  0xf2   : > { %6639 = vmatpush3.bf16.xpose.msra.mxu1 %v1871_v38  ;;  %6640 = vmatprep.mubr.msk.bf16.mxu1 %vm9410_vm0, %v9408_v0  ;;  %v2033_v41 = vsel %vm408_vm1, %v2028_v26, 0 }
  0xf3   : > { %6650 = vmatprep.subr.bf16.mxu1 %v9408_v0 }
  0xf5   : > { %6635 = vmatmul.mubr.msk.bf16.vlgmr.msra.gmra.mxu0 %vm408_vm1, %v7304_v27  ;;  %v2082_v27 = vpop.permute.xlu1 %2081 }
  0xf6   : > { %6645 = vmatpush3.bf16.xpose.msra.mxu0 %v1925_v39  ;;  %6646 = vmatprep.mubr.msk.bf16.mxu0 %vm9410_vm0, %v9408_v0  ;;  %v2087_v42 = vsel %vm408_vm1, %v2082_v27, 0 }
  0xf7   : > { %6656 = vmatprep.subr.bf16.mxu0 %v9408_v0 }
  0xf9   : > { %6641 = vmatmul.mubr.msk.bf16.vlgmr.msra.gmra.mxu1 %vm408_vm1, %v7309_v28 }
  0xfa   : > { %6651 = vmatpush3.bf16.xpose.msra.mxu1 %v1979_v40  ;;  %6652 = vmatprep.mubr.msk.bf16.mxu1 %vm9410_vm0, %v9408_v0 }
  0xfb   : > { %6662 = vmatprep.subr.bf16.mxu1 %v9408_v0 }
  0xfd   : > { %6647 = vmatmul.mubr.msk.bf16.vlgmr.msra.gmra.mxu0 %vm408_vm1, %v7314_v29 }
  0xfe   : > { %6657 = vmatpush3.bf16.xpose.msra.mxu0 %v2033_v41  ;;  %6658 = vmatprep.mubr.msk.bf16.mxu0 %vm9410_vm0, %v9408_v0 }
  0xff   : > { %6668 = vmatprep.subr.bf16.mxu0 %v9408_v0 }
 0x101   : > { %6653 = vmatmul.mubr.msk.bf16.vlgmr.msra.gmra.mxu1 %vm408_vm1, %v7319_v30 }
 0x102   : > { %6663 = vmatpush3.bf16.xpose.msra.mxu1 %v2087_v42  ;;  %6664 = vmatprep.mubr.msk.bf16.mxu1 %vm9410_vm0, %v9408_v0 }
 0x103   : > { %6674 = vmatprep.subr.bf16.mxu1 %v9408_v0 }
 0x105   : > { %6659 = vmatmul.mubr.msk.bf16.vlgmr.msra.gmra.mxu0 %vm408_vm1, %v7324_v31 }
 0x106   : > { %6670 = vmatprep.mubr.msk.bf16.mxu0 %vm9410_vm0, %v9408_v0 }
 0x109   : > { %6665 = vmatmul.mubr.msk.bf16.vlgmr.msra.gmra.mxu1 %vm408_vm1, %v7329_v32 }
 0x10a   : > { %6676 = vmatprep.mubr.msk.bf16.mxu1 %vm9410_vm0, %v9408_v0 }
 0x14d   : > { %v7535_v28 = vpop.f32.mrf.mxu0 }
 0x14f   : > { %v6480_v29 = vpop.f32.mrf.mxu0 }
 0x151   : > { %v7537_v30 = vpop.f32.mrf.mxu0  ;;  %v7539_v31 = vpop.f32.mrf.mxu1 }
 0x153   : > { %v6481_v32 = vpop.f32.mrf.mxu0  ;;  %v6486_v43 = vpop.f32.mrf.mxu1 }
 0x155   : > { %v7541_v44 = vpop.f32.mrf.mxu1  ;;  %v7543_v18 = vpop.f32.mrf.mxu0 }
 0x157   : > { %v6487_v17 = vpop.f32.mrf.mxu1  ;;  %v6492_v45 = vpop.f32.mrf.mxu0 }
 0x159   : > { %v7545_v46 = vpop.f32.mrf.mxu0  ;;  %v7547_v20 = vpop.f32.mrf.mxu1 }
 0x15b   : > { %v6493_v19 = vpop.f32.mrf.mxu0  ;;  %v6498_v47 = vpop.f32.mrf.mxu1 }
 0x15d   : > { %v7549_v48 = vpop.f32.mrf.mxu1  ;;  %v7551_v49 = vpop.f32.mrf.mxu0 }
 0x15f   : > { %v6499_v50 = vpop.f32.mrf.mxu1  ;;  %v6504_v51 = vpop.f32.mrf.mxu0 }
 0x161   : > { %v7553_v52 = vpop.f32.mrf.mxu0  ;;  %v7555_v53 = vpop.f32.mrf.mxu1 }
 0x163   : > { %v6505_v54 = vpop.f32.mrf.mxu0  ;;  %v6510_v55 = vpop.f32.mrf.mxu1 }
 0x165   : > { %v7557_v56 = vpop.f32.mrf.mxu1  ;;  %v7559_v57 = vpop.f32.mrf.mxu0 }
 0x167   : > { %v6511_v58 = vpop.f32.mrf.mxu1  ;;  %v6516_v59 = vpop.f32.mrf.mxu0 }
 0x169   : > { %v7561_v60 = vpop.f32.mrf.mxu0  ;;  %v7563_v61 = vpop.f32.mrf.mxu1 }
 0x16b   : > { %v6517_v62 = vpop.f32.mrf.mxu0  ;;  %v6522_v63 = vpop.f32.mrf.mxu1 }
 0x16d   : > { %v7565_v1 = vpop.f32.mrf.mxu1  ;;  %v7567_v2 = vpop.f32.mrf.mxu0 }
 0x16f   : > { %v6523_v3 = vpop.f32.mrf.mxu1  ;;  %v6528_v4 = vpop.f32.mrf.mxu0 }
 0x171   : > { %v7569_v5 = vpop.f32.mrf.mxu0  ;;  %v7571_v6 = vpop.f32.mrf.mxu1 }
 0x173   : > { %v6529_v7 = vpop.f32.mrf.mxu0  ;;  %v6534_v8 = vpop.f32.mrf.mxu1 }
 0x174   : > { %v7107_v7 = vmov 1983009808  }
 0x175   : > { %v7573_v9 = vpop.f32.mrf.mxu1  ;;  %v7575_v10 = vpop.f32.mrf.mxu0  ;;  %v2133_v8 = vunpack.c.l.s4 %v7107_v7 }
 0x176   : > { %9449 = vst [vmem:[#allocation3_spill] sm:$0xff] %v7573_v9 }
 0x177   : > { %v6535_v11 = vpop.f32.mrf.mxu1  ;;  %v6540_v12 = vpop.f32.mrf.mxu0 }
 0x178   : > { %v2135_v11 = vlaneseq }
 0x179   : > { %v7577_v13 = vpop.f32.mrf.mxu0  ;;  %v7579_v14 = vpop.f32.mrf.mxu1 }
 0x17a   : > { %9450 = vst [vmem:[#allocation4_spill] sm:$0xff] %v7577_v13 }
 0x17b   : > { %v6541_v15 = vpop.f32.mrf.mxu0  ;;  %v6546_v16 = vpop.f32.mrf.mxu1 }
 0x17c   : > { %v4006_v16 = vpop.permute.xlu1 %4005 }
 0x17d   : > { %v7581_v33 = vpop.f32.mrf.mxu1  ;;  %v7583_v34 = vpop.f32.mrf.mxu0  ;;  %6675 = vmatpush3.bf16.msra.mxu1 %v4006_v16 }
 0x17e   : > { %9451 = vst [vmem:[#allocation5_spill] sm:$0xff] %v7581_v33  ;;  %6686 = vmatprep.subr.bf16.mxu1 %v9408_v0 }
 0x17f   : > { %v6547_v35 = vpop.f32.mrf.mxu1  ;;  %v6552_v21 = vpop.f32.mrf.mxu0 }
 0x180   : > { %v3959_v35 = vpop.permute.xlu0 %3958 }
 0x181   : > { %v7585_v36 = vpop.f32.mrf.mxu0  ;;  %v7587_v22 = vpop.f32.mrf.mxu1  ;;  %6669 = vmatpush3.bf16.msra.mxu0 %v3959_v35 }
 0x182   : > { %9452 = vst [vmem:[#allocation6_spill] sm:$0xff] %v7585_v36  ;;  %6680 = vmatprep.subr.bf16.mxu0 %v9408_v0 }
 0x183   : > { %v6553_v37 = vpop.f32.mrf.mxu0  ;;  %v6558_v23 = vpop.f32.mrf.mxu1 }
 0x184   : > { %v2134_v23 = vunpack.c.0.s8 %v2133_v8 }
 0x185   : > { %v7589_v38 = vpop.f32.mrf.mxu1  ;;  %v7591_v24 = vpop.f32.mrf.mxu0 }
 0x186   : > { %9453 = vst [vmem:[#allocation7_spill] sm:$0xff] %v7589_v38 }
 0x187   : > { %v6559_v39 = vpop.f32.mrf.mxu1  ;;  %v6564_v25 = vpop.f32.mrf.mxu0 }
 0x188   : > { %v2136_v39 = vshrl.u32 %v2135_v11, 7 }
 0x189   : > { %v7593_v40 = vpop.f32.mrf.mxu0  ;;  %v7595_v26 = vpop.f32.mrf.mxu1 }
 0x18a   : > { %9454 = vst [vmem:[#allocation8_spill] sm:$0xff] %v7593_v40 }
 0x18b   : > { %v6565_v41 = vpop.f32.mrf.mxu0  ;;  %v6570_v27 = vpop.f32.mrf.mxu1 }
 0x18c   : > { %v7108_v27 = vmov 1934713408  }
 0x18d   : > { %v7597_v42 = vpop.f32.mrf.mxu1  ;;  %v7599_v29 = vpop.f32.mrf.mxu0 }
 0x18e   : > { %9455 = vst [vmem:[#allocation9_spill] sm:$0xff] %v7597_v42 }
 0x18f   : > { %v6571_v32 = vpop.f32.mrf.mxu1  ;;  %v6576_v43 = vpop.f32.mrf.mxu0 }
 0x190   : > { %v2197_v32 = vunpack.c.l.s4 %v7108_v27 }
 0x191   : > { %v7601_v17 = vpop.f32.mrf.mxu0  ;;  %v1367_v45 = vpop.f32.mrf.mxu1 }
 0x192   : > { %v2198_v7 = vunpack.c.0.s8 %v2197_v32 }
 0x193   : > { %v6577_v19 = vpop.f32.mrf.mxu0  ;;  %v6582_v47 = vpop.f32.mrf.mxu1 }
 0x194   : > { %v7623_v38 = vsub.s32 %v2198_v7, %v2136_v39 }
 0x195   : > { %v7603_v50 = vpop.f32.mrf.mxu1  ;;  %v1421_v51 = vpop.f32.mrf.mxu0 }
 0x196   : > { %v2131_v42 = vcombine.high %v7599_v29, %v1421_v51 }
 0x197   : > { %v6583_v54 = vpop.f32.mrf.mxu1  ;;  %v6588_v55 = vpop.f32.mrf.mxu0 }
 0x198   : > { %v2130_v54 = vcombine.low %v7599_v29, %v1421_v51  ;;  %v7616_v55 = vsub.s32 %v2134_v23, %v2136_v39 }
 0x199   : > { %v7605_v58 = vpop.f32.mrf.mxu0  ;;  %v1475_v59 = vpop.f32.mrf.mxu1 }
 0x19a   : > { %v2146_v43 = vcombine.low %v1367_v45, %v1475_v59 }
 0x19b   : > { %v6589_v62 = vpop.f32.mrf.mxu0  ;;  %v6594_v63 = vpop.f32.mrf.mxu1 }
 0x19c   : > { %v2154_v8 = vrot.slane %v2146_v43, %v7616_v55 }
 0x19d   : > { %v7607_v3 = vpop.f32.mrf.mxu1  ;;  %v1529_v4 = vpop.f32.mrf.mxu0 }
 0x19f   : > { %v6595_v12 = vpop.f32.mrf.mxu1  ;;  %v6600_v15 = vpop.f32.mrf.mxu0 }
 0x1a0   : > { %v2147_v15 = vcombine.high %v1367_v45, %v1475_v59 }
 0x1a1   : > { %v7609_v21 = vpop.f32.mrf.mxu0  ;;  %v1583_v37 = vpop.f32.mrf.mxu1 }
 0x1a2   : > { %v7629_v59 = vrot.slane %v2147_v15, %v7616_v55 }
 0x1a3   : > { %v6601_v25 = vpop.f32.mrf.mxu0  ;;  %v6606_v41 = vpop.f32.mrf.mxu1 }
 0x1a4   : > { %v2138_v41 = vrot.slane %v2130_v54, %v7616_v55  ;;  %v2145_v54 = vrot.slane %v2131_v42, %v7616_v55 }
 0x1a5   : > { %v7613_v19 = vpop.f32.mrf.mxu1  ;;  %v1637_v47 = vpop.f32.mrf.mxu0 }
 0x1a6   : > { %v2162_v12 = vcombine.low %v1529_v4, %v1637_v47  ;;  %v2163_v16 = vcombine.high %v1529_v4, %v1637_v47  ;;  %v2195_v29 = vcombine.high %v2138_v41, %v2154_v8 }
 0x1a7   : > { %v6607_v62 = vpop.f32.mrf.mxu1  ;;  %v6612_v63 = vpop.f32.mrf.mxu0 }
 0x1a8   : > { %v2194_v62 = vcombine.low %v2138_v41, %v2154_v8  ;;  %v2170_v32 = vrot.slane %v2162_v12, %v7616_v55  ;;  %v2177_v4 = vrot.slane %v2163_v16, %v7616_v55 }
 0x1a9   : > { %v7619_v35 = vpop.f32.mrf.mxu0  ;;  %v1691_v25 = vpop.f32.mrf.mxu1 }
 0x1aa   : > { %v2178_v27 = vcombine.low %v1583_v37, %v1691_v25  ;;  %v2179_v0 = vcombine.high %v1583_v37, %v1691_v25  ;;  %v2202_v15 = vrot.slane %v2194_v62, %v7623_v38  ;;  %v2434_v8 = vcombine.low %v7609_v21, %v7619_v35 }
 0x1ab   : > { %v6613_v40 = vpop.f32.mrf.mxu0  ;;  %v6618_v23 = vpop.f32.mrf.mxu1 }
 0x1ac   : > { %v2186_v43 = vrot.slane %v2178_v27, %v7616_v55  ;;  %v2193_v45 = vrot.slane %v2179_v0, %v7616_v55  ;;  %v7636_v40 = vand.u32 127, %v2135_v11  ;;  %v2210_v11 = vcombine.low %v2145_v54, %v7629_v59 }
 0x1ad   : > { %v7632_v47 = vpop.f32.mrf.mxu1  ;;  %v7634_v37 = vpop.f32.mrf.mxu0  ;;  %v2418_v27 = vcombine.low %v7603_v50, %v7607_v3  ;;  %v2442_v9 = vrot.slane %v2434_v8, %v7616_v55 }
 0x1ae   : > { %v2226_v51 = vcombine.low %v2170_v32, %v2186_v43  ;;  %v2227_v39 = vcombine.high %v2170_v32, %v2186_v43  ;;  %v2242_v63 = vcombine.low %v2177_v4, %v2193_v45  ;;  %v2450_v0 = vcombine.low %v7613_v19, %v7632_v47 }
 0x1af   : > { %v6619_v7 = vpop.f32.mrf.mxu1  ;;  %v6624_v12 = vpop.f32.mrf.mxu0  ;;  %vm2693_vm2 = vcmp.eq.s32.totalorder %v7636_v40, 1  ;;  %vm2692_vm3 = vcmp.eq.s32.totalorder %v7636_v40, 0  ;;  %v2209_v32 = vrot.slane %v2195_v29, %v7623_v38  ;;  %v2402_v43 = vcombine.low %v7601_v17, %v7605_v58 }
 0x1b0   : > { %v2234_v16 = vrot.slane %v2226_v51, %v7623_v38  ;;  %v2241_v25 = vrot.slane %v2227_v39, %v7623_v38  ;;  %v2243_v51 = vcombine.high %v2177_v4, %v2193_v45  ;;  %v7659_v39 = vrot.slane %v2450_v0, %v7616_v55 }
 0x1b1   : > { %v7647_v41 = vpop.f32.mrf.mxu0  ;;  %v7649_v42 = vpop.f32.mrf.mxu1  ;;  %v2250_v36 = vrot.slane %v2242_v63, %v7623_v38  ;;  %v2211_v29 = vcombine.high %v2145_v54, %v7629_v59  ;;  %vm2695_vm4 = vcmp.eq.s32.totalorder %v7636_v40, 3  ;;  %vm2694_vm5 = vcmp.eq.s32.totalorder %v7636_v40, 2 }
 0x1b2   : > { %v2259_v23 = vcombine.high %v2202_v15, %v2234_v16  ;;  %v2258_v62 = vcombine.low %v2202_v15, %v2234_v16  ;;  %v2261_v15 = vcombine.high %v2209_v32, %v2241_v25  ;;  %v2260_v16 = vcombine.low %v2209_v32, %v2241_v25 }
 0x1b3   : > { %v6625_v7 = vpop.f32.mrf.mxu0  ;;  %v6630_v12 = vpop.f32.mrf.mxu1  ;;  %v2426_v63 = vrot.slane %v2418_v27, %v7616_v55  ;;  %v2218_v0 = vrot.slane %v2210_v11, %v7623_v38  ;;  %vm2697_vm6 = vcmp.eq.s32.totalorder %v7636_v40, 5  ;;  %v2410_v59 = vrot.slane %v2402_v43, %v7616_v55 }
 0x1b4   : > { %v2710_v33 = vsel %vm2693_vm2, -1e+30, %v2259_v23  ;;  %v2708_v13 = vsel %vm2692_vm3, -1e+30, %v2258_v62  ;;  %v2451_v54 = vcombine.high %v7613_v19, %v7632_v47  ;;  %v2257_v8 = vrot.slane %v2243_v51, %v7623_v38 }
 0x1b5   : > { %v7668_v45 = vpop.f32.mrf.mxu1  ;;  %2776 = vrot.lane.b32.xlu1 %v2710_v33, %s7109_s29  ;;  %2772 = vrot.lane.b32.xlu0 %v2708_v13, %s7109_s29  ;;  %v7672_v4 = vpop.f32.mrf.mxu0  ;;  %v2498_v33 = vcombine.low %v2442_v9, %v7659_v39  ;;  %v2714_v23 = vsel %vm2695_vm4, -1e+30, %v2261_v15  ;;  %v2712_v27 = vsel %vm2694_vm5, -1e+30, %v2260_v16  ;;  %v2263_v11 = vcombine.high %v2218_v0, %v2250_v36 }
 0x1b6   : > { %v2262_v62 = vcombine.low %v2218_v0, %v2250_v36  ;;  %v2419_v32 = vcombine.high %v7603_v50, %v7607_v3  ;;  %v2435_v19 = vcombine.high %v7609_v21, %v7619_v35  ;;  %vm2696_vm7 = vcmp.eq.s32.totalorder %v7636_v40, 4 }
 0x1b7   : > { %v6631_v13 = vpop.f32.mrf.mxu1  ;;  %v6636_v25 = vpop.f32.mrf.mxu0  ;;  %v2225_v51 = vrot.slane %v2211_v29, %v7623_v38  ;;  %v2466_v7 = vcombine.low %v2410_v59, %v2426_v63  ;;  %vm2699_vm8 = vcmp.eq.s32.totalorder %v7636_v40, 7  ;;  %v2403_v36 = vcombine.high %v7601_v17, %v7605_v58 }
 0x1b8   : > { %v2465_v50 = vrot.slane %v2451_v54, %v7616_v55  ;;  %v2499_v3 = vcombine.high %v2442_v9, %v7659_v39  ;;  %v2718_v15 = vsel %vm2697_vm6, -1e+30, %v2263_v11  ;;  %v2716_v16 = vsel %vm2696_vm7, -1e+30, %v2262_v62 }
 0x1b9   : > { %v7692_v47 = vpop.f32.mrf.mxu1  ;;  %2784 = vrot.lane.b32.xlu1 %v2714_v23, %s7109_s29  ;;  %2780 = vrot.lane.b32.xlu0 %v2712_v27, %s7109_s29  ;;  %v7696_v43 = vpop.f32.mrf.mxu0  ;;  %v2265_v12 = vcombine.high %v2225_v51, %v2257_v8  ;;  %v2264_v29 = vcombine.low %v2225_v51, %v2257_v8  ;;  %v2506_v0 = vrot.slane %v2498_v33, %v7623_v38  ;;  %vm2698_vm9 = vcmp.eq.s32.totalorder %v7636_v40, 6 }
 0x1ba   : > { %v2433_v13 = vrot.slane %v2419_v32, %v7616_v55  ;;  %v2449_v17 = vrot.slane %v2435_v19, %v7616_v55  ;;  %v2467_v39 = vcombine.high %v2410_v59, %v2426_v63  ;;  %v2474_v54 = vrot.slane %v2466_v7, %v7623_v38 }
 0x1bb   : > { %v6637_v21 = vpop.f32.mrf.mxu0  ;;  %v6642_v35 = vpop.f32.mrf.mxu1  ;;  %v2417_v25 = vrot.slane %v2403_v36, %v7616_v55  ;;  %v2722_v27 = vsel %vm2699_vm8, -1e+30, %v2265_v12  ;;  %v2720_v11 = vsel %vm2698_vm9, -1e+30, %v2264_v29  ;;  %v2513_v19 = vrot.slane %v2499_v3, %v7623_v38 }
 0x1bc   : > { %v2514_v33 = vcombine.low %v2449_v17, %v2465_v50  ;;  %v2531_v62 = vcombine.high %v2474_v54, %v2506_v0  ;;  %v2530_v32 = vcombine.low %v2474_v54, %v2506_v0  ;;  %vm2701_vm10 = vcmp.eq.s32.totalorder %v7636_v40, 9 }
 0x1bd   : > { %v7712_v58 = vpop.f32.mrf.mxu1  ;;  %2792 = vrot.lane.b32.xlu1 %v2718_v15, %s7109_s29  ;;  %2788 = vrot.lane.b32.xlu0 %v2716_v16, %s7109_s29  ;;  %v7716_v9 = vpop.f32.mrf.mxu0  ;;  %v2482_v51 = vcombine.low %v2417_v25, %v2433_v13  ;;  %vm2700_vm11 = vcmp.eq.s32.totalorder %v7636_v40, 8  ;;  %v2481_v59 = vrot.slane %v2467_v39, %v7623_v38  ;;  %v2483_v7 = vcombine.high %v2417_v25, %v2433_v13 }
 0x1be   : > { %v2515_v36 = vcombine.high %v2449_v17, %v2465_v50  ;;  %v2282_v35 = vcombine.low %v7649_v42, %v7692_v47  ;;  %v2522_v15 = vrot.slane %v2514_v33, %v7623_v38  ;;  %v2726_v16 = vsel %vm2701_vm10, -1e+30, %v2531_v62 }
 0x1bf   : > { %v6643_v8 = vpop.f32.mrf.mxu1  ;;  %v6648_v23 = vpop.f32.mrf.mxu0  ;;  %v2724_v29 = vsel %vm2700_vm11, -1e+30, %v2530_v32  ;;  %v2533_v0 = vcombine.high %v2481_v59, %v2513_v19  ;;  %v2532_v54 = vcombine.low %v2481_v59, %v2513_v19  ;;  %v2266_v39 = vcombine.low %v7634_v37, %v7672_v4 }
 0x1c0   : > { %vm2703_vm12 = vcmp.eq.s32.totalorder %v7636_v40, 11  ;;  %vm2702_vm13 = vcmp.eq.s32.totalorder %v7636_v40, 10  ;;  %v2490_v17 = vrot.slane %v2482_v51, %v7623_v38  ;;  %vm2705_vm14 = vcmp.eq.s32.totalorder %v7636_v40, 13 }
 0x1c1   : > { %v2015_v21 = vpop.f32.mrf.mxu1  ;;  %2800 = vrot.lane.b32.xlu1 %v2722_v27, %s7109_s29  ;;  %2796 = vrot.lane.b32.xlu0 %v2720_v11, %s7109_s29  ;;  %v7728_v63 = vpop.f32.mrf.mxu0  ;;  %vm2704_vm15 = vcmp.eq.s32.totalorder %v7636_v40, 12  ;;  %v2290_v25 = vrot.slane %v2282_v35, %v7616_v55  ;;  %v2529_v11 = vrot.slane %v2515_v36, %v7623_v38  ;;  %v2730_v32 = vsel %vm2703_vm12, -1e+30, %v2533_v0 }
 0x1c2   : > { %v2535_v23 = vcombine.high %v2490_v17, %v2522_v15  ;;  %v2534_v27 = vcombine.low %v2490_v17, %v2522_v15  ;;  %v2728_v19 = vsel %vm2702_vm13, -1e+30, %v2532_v54  ;;  %v2497_v51 = vrot.slane %v2483_v7, %v7623_v38 }
 0x1c3   : > { %v6649_v3 = vpop.f32.mrf.mxu0  ;;  %v6654_v12 = vpop.f32.mrf.mxu1  ;;  %v2274_v59 = vrot.slane %v2266_v39, %v7616_v55  ;;  %v2283_v35 = vcombine.high %v7649_v42, %v7692_v47  ;;  %v2267_v15 = vcombine.high %v7634_v37, %v7672_v4  ;;  %vm2707_vm1 = vcmp.eq.s32.totalorder %v7636_v40, 15 }
 0x1c4   : > { %v2734_v54 = vsel %vm2705_vm14, -1e+30, %v2535_v23  ;;  %v2732_v42 = vsel %vm2704_vm15, -1e+30, %v2534_v27  ;;  %vm2706_vm0 = vcmp.eq.s32.totalorder %v7636_v40, 14 }
 0x1c5   : > { %v7742_v13 = vpop.f32.mrf.mxu1  ;;  %2808 = vrot.lane.b32.xlu1 %v2726_v16, %s7109_s29  ;;  %2804 = vrot.lane.b32.xlu0 %v2724_v29, %s7109_s29  ;;  %v2069_v50 = vpop.f32.mrf.mxu0  ;;  %v2330_v7 = vcombine.low %v2274_v59, %v2290_v25  ;;  %v2297_v37 = vrot.slane %v2283_v35, %v7616_v55 }
 0x1c6   : > { %v2298_v62 = vcombine.low %v7716_v9, %v2069_v50  ;;  %v2299_v3 = vcombine.high %v7716_v9, %v2069_v50  ;;  %v2537_v9 = vcombine.high %v2497_v51, %v2529_v11 }
 0x1c7   : > { %v6655_v33 = vpop.f32.mrf.mxu1  ;;  %v6660_v8 = vpop.f32.mrf.mxu0 }
 0x1c8   : > { %v2306_v39 = vrot.slane %v2298_v62, %v7616_v55  ;;  %v2536_v33 = vcombine.low %v2497_v51, %v2529_v11  ;;  %v2313_v4 = vrot.slane %v2299_v3, %v7616_v55  ;;  %v2331_v8 = vcombine.high %v2274_v59, %v2290_v25 }
 0x1c9   : > { %v2123_v12 = vpop.f32.mrf.mxu1  ;;  %2816 = vrot.lane.b32.xlu1 %v2730_v32, %s7109_s29  ;;  %2812 = vrot.lane.b32.xlu0 %v2728_v19, %s7109_s29  ;;  %v7765_v36 = vpop.f32.mrf.mxu0  ;;  %v2281_v62 = vrot.slane %v2267_v15, %v7616_v55  ;;  %v2338_v51 = vrot.slane %v2330_v7, %v7623_v38  ;;  %v2738_v35 = vsel %vm2707_vm1, -1e+30, %v2537_v9 }
 0x1ca   : > { %v2314_v16 = vcombine.low %v2015_v21, %v2123_v12  ;;  %v2315_v29 = vcombine.high %v2015_v21, %v2123_v12  ;;  %v2736_v3 = vsel %vm2706_vm0, -1e+30, %v2536_v33  ;;  %v2570_v15 = vcombine.low %v7728_v63, %v7765_v36 }
 0x1cb   : > { %v6666_v0 = vpop.f32.mrf.mxu1  ;;  %v6661_v47 = vpop.f32.mrf.mxu0  ;;  %v2346_v59 = vcombine.low %v2281_v62, %v2297_v37 }
 0x1cc   : > { %v2322_v50 = vrot.slane %v2314_v16, %v7616_v55  ;;  %v2329_v17 = vrot.slane %v2315_v29, %v7616_v55  ;;  %v2554_v16 = vcombine.low %v7668_v45, %v7712_v58  ;;  %v2345_v0 = vrot.slane %v2331_v8, %v7623_v38 }
 0x1cd   : > { %v2126_v21 = vpop.f32.mrf.mxu1  ;;  %2824 = vrot.lane.b32.xlu1 %v2734_v54, %s7109_s29  ;;  %2820 = vrot.lane.b32.xlu0 %v2732_v42, %s7109_s29  ;;  %v2538_v54 = vcombine.low %v7647_v41, %v7696_v43 }
 0x1ce   : > { %v2362_v23 = vcombine.low %v2306_v39, %v2322_v50  ;;  %v2363_v27 = vcombine.high %v2306_v39, %v2322_v50  ;;  %v2378_v32 = vcombine.low %v2313_v4, %v2329_v17  ;;  %v2586_v11 = vcombine.low %v7742_v13, %v2126_v21 }
 0x1cf   : > { %v6667_v19 = vpop.f32.mrf.mxu1  ;;  %v2379_v42 = vcombine.high %v2313_v4, %v2329_v17  ;;  %v2562_v17 = vrot.slane %v2554_v16, %v7616_v55  ;;  %v2354_v4 = vrot.slane %v2346_v59, %v7623_v38  ;;  %v2546_v8 = vrot.slane %v2538_v54, %v7616_v55 }
 0x1d0   : > { %v2370_v12 = vrot.slane %v2362_v23, %v7623_v38  ;;  %v2377_v25 = vrot.slane %v2363_v27, %v7623_v38  ;;  %v2594_v47 = vrot.slane %v2586_v11, %v7616_v55  ;;  %v2386_v9 = vrot.slane %v2378_v32, %v7623_v38 }
 0x1d1   : > { %2832 = vrot.lane.b32.xlu1 %v2738_v35, %s7109_s29  ;;  %2828 = vrot.lane.b32.xlu0 %v2736_v3, %s7109_s29  ;;  %v2347_v27 = vcombine.high %v2281_v62, %v2297_v37  ;;  %v2578_v19 = vrot.slane %v2570_v15, %v7616_v55  ;;  %v2587_v32 = vcombine.high %v7742_v13, %v2126_v21 }
 0x1d2   : > { %v2395_v29 = vcombine.high %v2338_v51, %v2370_v12  ;;  %v2394_v7 = vcombine.low %v2338_v51, %v2370_v12  ;;  %v2397_v33 = vcombine.high %v2345_v0, %v2377_v25  ;;  %v2396_v23 = vcombine.low %v2345_v0, %v2377_v25 }
 0x1d3   : > { %v2634_v11 = vcombine.low %v2578_v19, %v2594_v47  ;;  %v2393_v51 = vrot.slane %v2379_v42, %v7623_v38  ;;  %v2399_v35 = vcombine.high %v2354_v4, %v2386_v9  ;;  %v2398_v3 = vcombine.low %v2354_v4, %v2386_v9 }
 0x1d4   : > { %v2711_v39 = vsel %vm2693_vm2, -1e+30, %v2395_v29  ;;  %v2709_v50 = vsel %vm2692_vm3, -1e+30, %v2394_v7  ;;  %v2715_v37 = vsel %vm2695_vm4, -1e+30, %v2397_v33  ;;  %v2571_v12 = vcombine.high %v7728_v63, %v7765_v36 }
 0x1d5   : > { %2778 = vrot.lane.b32.xlu1 %v2711_v39, %s7109_s29  ;;  %2774 = vrot.lane.b32.xlu0 %v2709_v50, %s7109_s29  ;;  %v2713_v62 = vsel %vm2694_vm5, -1e+30, %v2396_v23  ;;  %v2361_v13 = vrot.slane %v2347_v27, %v7623_v38  ;;  %v2555_v21 = vcombine.high %v7668_v45, %v7712_v58  ;;  %v2602_v25 = vcombine.low %v2546_v8, %v2562_v17 }
 0x1d6   : > { %v2539_v59 = vcombine.high %v7647_v41, %v7696_v43  ;;  %v2601_v15 = vrot.slane %v2587_v32, %v7616_v55  ;;  %v2635_v16 = vcombine.high %v2578_v19, %v2594_v47  ;;  %v2719_v63 = vsel %vm2697_vm6, -1e+30, %v2399_v35 }
 0x1d7   : > { %v2401_v29 = vcombine.high %v2361_v13, %v2393_v51  ;;  %v2717_v36 = vsel %vm2696_vm7, -1e+30, %v2398_v3  ;;  %v2400_v7 = vcombine.low %v2361_v13, %v2393_v51  ;;  %v2642_v0 = vrot.slane %v2634_v11, %v7623_v38 }
 0x1d8   : > { %v2585_v54 = vrot.slane %v2571_v12, %v7616_v55  ;;  %v2569_v41 = vrot.slane %v2555_v21, %v7616_v55  ;;  %v2603_v45 = vcombine.high %v2546_v8, %v2562_v17  ;;  %v2610_v43 = vrot.slane %v2602_v25, %v7623_v38 }
 0x1d9   : > { %2786 = vrot.lane.b32.xlu1 %v2715_v37, %s7109_s29  ;;  %2782 = vrot.lane.b32.xlu0 %v2713_v62, %s7109_s29  ;;  %v2553_v58 = vrot.slane %v2539_v59, %v7616_v55  ;;  %v2649_v47 = vrot.slane %v2635_v16, %v7623_v38  ;;  %v2723_v9 = vsel %vm2699_vm8, -1e+30, %v2401_v29  ;;  %v2721_v39 = vsel %vm2698_vm9, -1e+30, %v2400_v7  ;;  %v7877_v7 = vpop.permute.xlu0 %4052 }
 0x1da   : > { %v2650_v42 = vcombine.low %v2585_v54, %v2601_v15  ;;  %v2667_v50 = vcombine.high %v2610_v43, %v2642_v0  ;;  %v2666_v33 = vcombine.low %v2610_v43, %v2642_v0  ;;  %v2617_v27 = vrot.slane %v2603_v45, %v7623_v38 }
 0x1db   : > { %v2618_v23 = vcombine.low %v2553_v58, %v2569_v41  ;;  %v2651_v19 = vcombine.high %v2585_v54, %v2601_v15  ;;  %v2619_v51 = vcombine.high %v2553_v58, %v2569_v41  ;;  %vm2868_vm2 = vcmask 130048  }
 0x1dc   : > { %v2658_v17 = vrot.slane %v2650_v42, %v7623_v38  ;;  %v2727_v4 = vsel %vm2701_vm10, -1e+30, %v2667_v50  ;;  %v2725_v8 = vsel %vm2700_vm11, -1e+30, %v2666_v33  ;;  %v2669_v32 = vcombine.high %v2617_v27, %v2649_v47 }
 0x1dd   : > { %2794 = vrot.lane.b32.xlu1 %v2719_v63, %s7109_s29  ;;  %2790 = vrot.lane.b32.xlu0 %v2717_v36, %s7109_s29  ;;  %v2668_v11 = vcombine.low %v2617_v27, %v2649_v47  ;;  %v2626_v37 = vrot.slane %v2618_v23, %v7623_v38  ;;  %v2665_v62 = vrot.slane %v2651_v19, %v7623_v38  ;;  %v7875_v36 = vpop.permute.xlu1 %4099  ;;  %vm2901_vm3 = vcmask 261120  }
 0x1de   : > { %v2731_v35 = vsel %vm2703_vm12, -1e+30, %v2669_v32  ;;  %v2633_v21 = vrot.slane %v2619_v51, %v7623_v38  ;;  %vm6071_vm4 = vcmask 523264  }
 0x1df   : > { %v2729_v3 = vsel %vm2702_vm13, -1e+30, %v2668_v11  ;;  %v2671_v12 = vcombine.high %v2626_v37, %v2658_v17  ;;  %v2670_v13 = vcombine.low %v2626_v37, %v2658_v17 }
 0x1e0   : > { %v2673_v15 = vcombine.high %v2633_v21, %v2665_v62  ;;  %v2672_v16 = vcombine.low %v2633_v21, %v2665_v62 }
 0x1e1   : > { %2802 = vrot.lane.b32.xlu1 %v2723_v9, %s7109_s29  ;;  %2798 = vrot.lane.b32.xlu0 %v2721_v39, %s7109_s29  ;;  %v2735_v25 = vsel %vm2705_vm14, -1e+30, %v2671_v12  ;;  %v2733_v59 = vsel %vm2704_vm15, -1e+30, %v2670_v13 }
 0x1e2   : > { %v2739_v29 = vsel %vm2707_vm1, -1e+30, %v2673_v15  ;;  %v2737_v63 = vsel %vm2706_vm0, -1e+30, %v2672_v16  ;;  %vm9485_vm0 = vmmov 0  }
 0x1e5   : > { %2810 = vrot.lane.b32.xlu1 %v2727_v4, %s7109_s29  ;;  %2806 = vrot.lane.b32.xlu0 %v2725_v8, %s7109_s29 }
 0x1e9   : > { %2818 = vrot.lane.b32.xlu1 %v2731_v35, %s7109_s29  ;;  %2814 = vrot.lane.b32.xlu0 %v2729_v3, %s7109_s29 }
 0x1ed   : > { %2826 = vrot.lane.b32.xlu1 %v2735_v25, %s7109_s29  ;;  %2822 = vrot.lane.b32.xlu0 %v2733_v59, %s7109_s29 }
 0x1f1   : > { %2834 = vrot.lane.b32.xlu1 %v2739_v29, %s7109_s29  ;;  %2830 = vrot.lane.b32.xlu0 %v2737_v63, %s7109_s29 }
 0x227   : > { %v2777_v0 = vpop.permute.xlu1 %2776  ;;  %v2773_v54 = vpop.permute.xlu0 %2772 }
 0x228   : > { %v7881_v41 = vsel %vm2868_vm2, %v7539_v31, %v2777_v0  ;;  %v7885_v40 = vsel %vm2868_vm2, %v7535_v28, %v2773_v54 }
 0x229   : > { %v2908_v45 = vsel %vm2901_vm3, %v7881_v41, -inf  ;;  %v2902_v43 = vsel %vm2901_vm3, %v7885_v40, -inf }
 0x22a   : > { %2909 = vmax.xlane.f32.xlu1 %v2908_v45  ;;  %2903 = vmax.xlane.f32.xlu0 %v2902_v43 }
 0x22b   : > { %v2785_v58 = vpop.permute.xlu1 %2784  ;;  %v2781_v42 = vpop.permute.xlu0 %2780 }
 0x22c   : > { %v7893_v47 = vsel %vm2868_vm2, %v7543_v18, %v2781_v42  ;;  %v7899_v28 = vsel %vm2868_vm2, %v7547_v20, %v2785_v58 }
 0x22d   : > { %v2914_v31 = vsel %vm2901_vm3, %v7893_v47, -inf  ;;  %v2920_v33 = vsel %vm2901_vm3, %v7899_v28, -inf }
 0x22e   : > { %2915 = vmax.xlane.f32.xlu0 %v2914_v31 }
 0x22f   : > { %v2793_v9 = vpop.permute.xlu1 %2792  ;;  %v2789_v39 = vpop.permute.xlu0 %2788 }
 0x230   : > { %v7903_v50 = vsel %vm2868_vm2, %v7551_v49, %v2789_v39  ;;  %v7911_v23 = vsel %vm2868_vm2, %v7555_v53, %v2793_v9 }
 0x231   : > { %v2926_v18 = vsel %vm2901_vm3, %v7903_v50, -inf  ;;  %v2932_v49 = vsel %vm2901_vm3, %v7911_v23, -inf }
 0x232   : > { %2921 = vmax.xlane.f32.xlu0 %v2920_v33  ;;  %2927 = vmax.xlane.f32.xlu1 %v2926_v18 }
 0x233   : > { %v2801_v20 = vpop.permute.xlu1 %2800  ;;  %v2797_v27 = vpop.permute.xlu0 %2796 }
 0x234   : > { %v7915_v19 = vsel %vm2868_vm2, %v7559_v57, %v2797_v27  ;;  %v7923_v4 = vsel %vm2868_vm2, %v7563_v61, %v2801_v20 }
 0x235   : > { %v2938_v17 = vsel %vm2901_vm3, %v7915_v19, -inf  ;;  %v2944_v57 = vsel %vm2901_vm3, %v7923_v4, -inf }
 0x236   : > { %2933 = vmax.xlane.f32.xlu0 %v2932_v49  ;;  %2939 = vmax.xlane.f32.xlu1 %v2938_v17 }
 0x237   : > { %v2809_v53 = vpop.permute.xlu1 %2808  ;;  %v2805_v8 = vpop.permute.xlu0 %2804 }
 0x238   : > { %v7927_v32 = vsel %vm2868_vm2, %v7567_v2, %v2805_v8  ;;  %v7935_v51 = vsel %vm2868_vm2, %v7571_v6, %v2809_v53 }
 0x239   : > { %v2950_v11 = vsel %vm2901_vm3, %v7927_v32, -inf  ;;  %v2956_v2 = vsel %vm2901_vm3, %v7935_v51, -inf }
 0x23a   : > { %2945 = vmax.xlane.f32.xlu0 %v2944_v57  ;;  %2951 = vmax.xlane.f32.xlu1 %v2950_v11  ;;  %v9456_v11 = vld [vmem:[#allocation3_spill] sm:$0xff] }
 0x23b   : > { %v2817_v61 = vpop.permute.xlu1 %2816  ;;  %v2813_v37 = vpop.permute.xlu0 %2812 }
 0x23c   : > { %v7939_v62 = vsel %vm2868_vm2, %v7575_v10, %v2813_v37  ;;  %v7947_v3 = vsel %vm2868_vm2, %v7579_v14, %v2817_v61 }
 0x23d   : > { %v2962_v35 = vsel %vm2901_vm3, %v7939_v62, -inf  ;;  %v2968_v10 = vsel %vm2901_vm3, %v7947_v3, -inf }
 0x23e   : > { %2957 = vmax.xlane.f32.xlu0 %v2956_v2  ;;  %2963 = vmax.xlane.f32.xlu1 %v2962_v35  ;;  %v9457_v2 = vld [vmem:[#allocation4_spill] sm:$0xff] }
 0x23f   : > { %v2825_v6 = vpop.permute.xlu1 %2824  ;;  %v2821_v12 = vpop.permute.xlu0 %2820 }
 0x240   : > { %v7951_v13 = vsel %vm2868_vm2, %v7583_v34, %v2821_v12  ;;  %v7959_v25 = vsel %vm2868_vm2, %v7587_v22, %v2825_v6  ;;  %v9458_v12 = vld [vmem:[#allocation5_spill] sm:$0xff] }
 0x241   : > { %v2974_v21 = vsel %vm2901_vm3, %v7951_v13, -inf  ;;  %v2980_v34 = vsel %vm2901_vm3, %v7959_v25, -inf }
 0x242   : > { %2969 = vmax.xlane.f32.xlu0 %v2968_v10  ;;  %2975 = vmax.xlane.f32.xlu1 %v2974_v21 }
 0x243   : > { %v2833_v14 = vpop.permute.xlu1 %2832  ;;  %v2829_v59 = vpop.permute.xlu0 %2828 }
 0x244   : > { %v7963_v15 = vsel %vm2868_vm2, %v7591_v24, %v2829_v59  ;;  %v7971_v29 = vsel %vm2868_vm2, %v7595_v26, %v2833_v14  ;;  %v9459_v59 = vld [vmem:[#allocation6_spill] sm:$0xff] }
 0x245   : > { %v2986_v16 = vsel %vm2901_vm3, %v7963_v15, -inf  ;;  %v2992_v24 = vsel %vm2901_vm3, %v7971_v29, -inf }
 0x246   : > { %2981 = vmax.xlane.f32.xlu0 %v2980_v34  ;;  %2987 = vmax.xlane.f32.xlu1 %v2986_v16 }
 0x247   : > { %v2779_v22 = vpop.permute.xlu1 %2778  ;;  %v2775_v63 = vpop.permute.xlu0 %2774 }
 0x248   : > { %v7975_v0 = vsel %vm2868_vm2, %v7537_v30, %v2775_v63  ;;  %v7983_v45 = vsel %vm2868_vm2, %v7541_v44, %v2779_v22  ;;  %v9460_v63 = vld [vmem:[#allocation7_spill] sm:$0xff] }
 0x249   : > { %v2905_v54 = vsel %vm2901_vm3, %v7975_v0, -inf  ;;  %v2911_v30 = vsel %vm2901_vm3, %v7983_v45, -inf }
 0x24a   : > { %2993 = vmax.xlane.f32.xlu0 %v2992_v24  ;;  %2906 = vmax.xlane.f32.xlu1 %v2905_v54 }
 0x24b   : > { %v2787_v26 = vpop.permute.xlu1 %2786  ;;  %v2783_v43 = vpop.permute.xlu0 %2782 }
 0x24c   : > { %v7987_v58 = vsel %vm2868_vm2, %v7545_v46, %v2783_v43  ;;  %v7995_v31 = vsel %vm2868_vm2, %v7549_v48, %v2787_v26  ;;  %v9461_v43 = vld [vmem:[#allocation8_spill] sm:$0xff] }
 0x24d   : > { %v2917_v42 = vsel %vm2901_vm3, %v7987_v58, -inf  ;;  %v2923_v46 = vsel %vm2901_vm3, %v7995_v31, -inf }
 0x24e   : > { %2912 = vmax.xlane.f32.xlu0 %v2911_v30  ;;  %2918 = vmax.xlane.f32.xlu1 %v2917_v42 }
 0x24f   : > { %v2795_v44 = vpop.permute.xlu1 %2794  ;;  %v2791_v9 = vpop.permute.xlu0 %2790 }
 0x250   : > { %v7999_v39 = vsel %vm2868_vm2, %v7553_v52, %v2791_v9  ;;  %v8007_v18 = vsel %vm2868_vm2, %v7557_v56, %v2795_v44  ;;  %v9462_v9 = vld [vmem:[#allocation9_spill] sm:$0xff] }
 0x251   : > { %v2929_v33 = vsel %vm2901_vm3, %v7999_v39, -inf  ;;  %v2935_v52 = vsel %vm2901_vm3, %v8007_v18, -inf }
 0x252   : > { %2924 = vmax.xlane.f32.xlu0 %v2923_v46  ;;  %2930 = vmax.xlane.f32.xlu1 %v2929_v33 }
 0x253   : > { %v2803_v48 = vpop.permute.xlu1 %2802  ;;  %v2799_v20 = vpop.permute.xlu0 %2798 }
 0x254   : > { %v8011_v27 = vsel %vm2868_vm2, %v7561_v60, %v2799_v20  ;;  %v8019_v17 = vsel %vm2868_vm2, %v7565_v1, %v2803_v48  ;;  %v7051_v48 = vld [vmem:[%s7214_s27 + $0x28] sm:$0xff]   ;;  %v7052_v20 = vld [vmem:[%s7214_s27 + $0x20] sm:$0xff]  }
 0x255   : > { %v2941_v49 = vsel %vm2901_vm3, %v8011_v27, -inf  ;;  %v2947_v60 = vsel %vm2901_vm3, %v8019_v17, -inf }
 0x256   : > { %2936 = vmax.xlane.f32.xlu0 %v2935_v52  ;;  %2942 = vmax.xlane.f32.xlu1 %v2941_v49 }
 0x257   : > { %v2811_v56 = vpop.permute.xlu1 %2810  ;;  %v2807_v53 = vpop.permute.xlu0 %2806 }
 0x258   : > { %v8023_v8 = vsel %vm2868_vm2, %v7569_v5, %v2807_v53  ;;  %v8031_v61 = vsel %vm2868_vm2, %v9456_v11, %v2811_v56 }
 0x259   : > { %v2953_v57 = vsel %vm2901_vm3, %v8023_v8, -inf  ;;  %v2959_v5 = vsel %vm2901_vm3, %v8031_v61, -inf }
 0x25a   : > { %2948 = vmax.xlane.f32.xlu0 %v2947_v60  ;;  %2954 = vmax.xlane.f32.xlu1 %v2953_v57 }
 0x25b   : > { %v2819_v1 = vpop.permute.xlu1 %2818  ;;  %v2815_v37 = vpop.permute.xlu0 %2814 }
 0x25c   : > { %v8035_v35 = vsel %vm2868_vm2, %v9457_v2, %v2815_v37  ;;  %v8043_v10 = vsel %vm2868_vm2, %v9458_v12, %v2819_v1 }
 0x25d   : > { %v2965_v6 = vsel %vm2901_vm3, %v8035_v35, -inf  ;;  %v2971_v16 = vsel %vm2901_vm3, %v8043_v10, -inf }
 0x25e   : > { %2960 = vmax.xlane.f32.xlu0 %v2959_v5  ;;  %2966 = vmax.xlane.f32.xlu1 %v2965_v6 }
 0x25f   : > { %v2827_v21 = vpop.permute.xlu1 %2826  ;;  %v2823_v14 = vpop.permute.xlu0 %2822 }
 0x260   : > { %v8047_v34 = vsel %vm2868_vm2, %v9459_v59, %v2823_v14  ;;  %v8055_v24 = vsel %vm2868_vm2, %v9460_v63, %v2827_v21 }
 0x261   : > { %v2977_v22 = vsel %vm2901_vm3, %v8047_v34, -inf  ;;  %v2983_v42 = vsel %vm2901_vm3, %v8055_v24, -inf }
 0x262   : > { %2972 = vmax.xlane.f32.xlu0 %v2971_v16  ;;  %2978 = vmax.xlane.f32.xlu1 %v2977_v22 }
 0x263   : > { %v2835_v54 = vpop.permute.xlu1 %2834  ;;  %v2831_v26 = vpop.permute.xlu0 %2830 }
 0x264   : > { %v8059_v30 = vsel %vm2868_vm2, %v9461_v43, %v2831_v26  ;;  %v8067_v46 = vsel %vm2868_vm2, %v9462_v9, %v2835_v54 }
 0x265   : > { %v2989_v44 = vsel %vm2901_vm3, %v8059_v30, -inf  ;;  %v2995_v33 = vsel %vm2901_vm3, %v8067_v46, -inf }
 0x266   : > { %2984 = vmax.xlane.f32.xlu0 %v2983_v42  ;;  %2990 = vmax.xlane.f32.xlu1 %v2989_v44 }
 0x26a   : > { %2996 = vmax.xlane.f32.xlu0 %v2995_v33 }
 0x277   : > { %4193 = vrot.lane.b32.xlu1 %v7051_v48, %s7106_s28 }
 0x280   : > { %4146 = vrot.lane.b32.xlu0 %v7052_v20, %s7106_s28 }
 0x2b3   : > { %v2910_v52 = vpop.xlane.xlu1 %2909  ;;  %v2904_v49 = vpop.xlane.xlu0 %2903 }
 0x2b4   : > { %v3000_v56 = vsub.f32 %v7881_v41, %v2910_v52  ;;  %v2998_v53 = vsub.f32 %v7885_v40, %v2904_v49 }
 0x2b6   : > { %v3034_v60 = vmul.f32 1.442695, %v3000_v56  ;;  %v3030_v57 = vmul.f32 1.442695, %v2998_v53 }
 0x2b7   : > { %v2916_v11 = vpop.xlane.xlu0 %2915 }
 0x2b8   : > { %6923 = vpow2.f32 %v3034_v60  ;;  %v3002_v1 = vsub.f32 %v7893_v47, %v2916_v11 }
 0x2b9   : > { %6925 = vpow2.f32 %v3030_v57 }
 0x2ba   : > { %v3038_v37 = vmul.f32 1.442695, %v3002_v1 }
 0x2bb   : > { %v2928_v2 = vpop.xlane.xlu1 %2927  ;;  %v2922_v5 = vpop.xlane.xlu0 %2921 }
 0x2bc   : > { %6927 = vpow2.f32 %v3038_v37  ;;  %v3006_v6 = vsub.f32 %v7903_v50, %v2928_v2  ;;  %v3004_v12 = vsub.f32 %v7899_v28, %v2922_v5 }
 0x2be   : > { %v3046_v21 = vmul.f32 1.442695, %v3006_v6  ;;  %v3042_v14 = vmul.f32 1.442695, %v3004_v12 }
 0x2bf   : > { %v2940_v41 = vpop.xlane.xlu1 %2939  ;;  %v2934_v59 = vpop.xlane.xlu0 %2933 }
 0x2c0   : > { %6929 = vpow2.f32 %v3046_v21  ;;  %v3010_v40 = vsub.f32 %v7915_v19, %v2940_v41  ;;  %v3008_v16 = vsub.f32 %v7911_v23, %v2934_v59 }
 0x2c1   : > { %6931 = vpow2.f32 %v3042_v14 }
 0x2c2   : > { %v3054_v47 = vmul.f32 1.442695, %v3010_v40  ;;  %v3050_v22 = vmul.f32 1.442695, %v3008_v16 }
 0x2c3   : > { %v2952_v63 = vpop.xlane.xlu1 %2951  ;;  %v2946_v54 = vpop.xlane.xlu0 %2945 }
 0x2c4   : > { %6933 = vpow2.f32 %v3054_v47  ;;  %v3014_v26 = vsub.f32 %v7927_v32, %v2952_v63  ;;  %v3012_v50 = vsub.f32 %v7923_v4, %v2946_v54 }
 0x2c5   : > { %v8084_v28 = vpop.eup %6923  ;;  %6935 = vpow2.f32 %v3050_v22 }
 0x2c6   : > { %v8086_v43 = vpop.eup %6925  ;;  %v3062_v42 = vmul.f32 1.442695, %v3014_v26  ;;  %v3058_v44 = vmul.f32 1.442695, %v3012_v50  ;;  %v3100_v23 = vsel %vm2901_vm3, %v8084_v28, 0.0 }
 0x2c7   : > { %3101 = vadd.xlane.f32.xlu0 %v3100_v23  ;;  %v2964_v19 = vpop.xlane.xlu1 %2963  ;;  %v3094_v9 = vsel %vm2901_vm3, %v8086_v43, 0.0  ;;  %v2958_v33 = vpop.xlane.xlu0 %2957 }
 0x2c8   : > { %6937 = vpow2.f32 %v3062_v42  ;;  %v3018_v32 = vsub.f32 %v7939_v62, %v2964_v19  ;;  %3095 = vadd.xlane.f32.xlu1 %v3094_v9  ;;  %v3016_v4 = vsub.f32 %v7935_v51, %v2958_v33 }
 0x2c9   : > { %v8094_v48 = vpop.eup %6927  ;;  %6939 = vpow2.f32 %v3058_v44 }
 0x2ca   : > { %v3070_v20 = vmul.f32 1.442695, %v3018_v32  ;;  %v3066_v52 = vmul.f32 1.442695, %v3016_v4  ;;  %v3106_v49 = vsel %vm2901_vm3, %v8094_v48, 0.0 }
 0x2cb   : > { %v2976_v56 = vpop.xlane.xlu1 %2975  ;;  %v2970_v53 = vpop.xlane.xlu0 %2969 }
 0x2cc   : > { %6941 = vpow2.f32 %v3070_v20  ;;  %v3022_v60 = vsub.f32 %v7951_v13, %v2976_v56  ;;  %3107 = vadd.xlane.f32.xlu1 %v3106_v49  ;;  %v3020_v57 = vsub.f32 %v7947_v3, %v2970_v53 }
 0x2cd   : > { %v8100_v62 = vpop.eup %6929  ;;  %6943 = vpow2.f32 %v3066_v52 }
 0x2ce   : > { %v8102_v51 = vpop.eup %6931  ;;  %v3078_v11 = vmul.f32 1.442695, %v3022_v60  ;;  %v3074_v1 = vmul.f32 1.442695, %v3020_v57  ;;  %v3118_v37 = vsel %vm2901_vm3, %v8100_v62, 0.0 }
 0x2cf   : > { %v2988_v2 = vpop.xlane.xlu1 %2987  ;;  %v3112_v5 = vsel %vm2901_vm3, %v8102_v51, 0.0  ;;  %v2982_v6 = vpop.xlane.xlu0 %2981 }
 0x2d0   : > { %6945 = vpow2.f32 %v3078_v11  ;;  %v3026_v13 = vsub.f32 %v7963_v15, %v2988_v2  ;;  %3119 = vadd.xlane.f32.xlu1 %v3118_v37  ;;  %3113 = vadd.xlane.f32.xlu0 %v3112_v5  ;;  %v3024_v3 = vsub.f32 %v7959_v25, %v2982_v6 }
 0x2d1   : > { %v8110_v12 = vpop.eup %6933  ;;  %6947 = vpow2.f32 %v3074_v1 }
 0x2d2   : > { %v8112_v21 = vpop.eup %6935  ;;  %v3086_v14 = vmul.f32 1.442695, %v3026_v13  ;;  %v3082_v41 = vmul.f32 1.442695, %v3024_v3  ;;  %v3130_v59 = vsel %vm2901_vm3, %v8110_v12, 0.0 }
 0x2d3   : > { %v2907_v40 = vpop.xlane.xlu1 %2906  ;;  %v3124_v16 = vsel %vm2901_vm3, %v8112_v21, 0.0  ;;  %v2994_v47 = vpop.xlane.xlu0 %2993 }
 0x2d4   : > { %6949 = vpow2.f32 %v3086_v14  ;;  %v2999_v15 = vsub.f32 %v7975_v0, %v2907_v40  ;;  %3131 = vadd.xlane.f32.xlu1 %v3130_v59  ;;  %3125 = vadd.xlane.f32.xlu0 %v3124_v16  ;;  %v3028_v25 = vsub.f32 %v7971_v29, %v2994_v47 }
 0x2d5   : > { %v8120_v22 = vpop.eup %6937  ;;  %6951 = vpow2.f32 %v3082_v41 }
 0x2d6   : > { %v8122_v63 = vpop.eup %6939  ;;  %v3032_v54 = vmul.f32 1.442695, %v2999_v15  ;;  %v3090_v26 = vmul.f32 1.442695, %v3028_v25  ;;  %v3142_v50 = vsel %vm2901_vm3, %v8120_v22, 0.0 }
 0x2d7   : > { %v2919_v42 = vpop.xlane.xlu1 %2918  ;;  %v3136_v44 = vsel %vm2901_vm3, %v8122_v63, 0.0  ;;  %v2913_v23 = vpop.xlane.xlu0 %2912 }
 0x2d8   : > { %6953 = vpow2.f32 %v3032_v54  ;;  %v3003_v0 = vsub.f32 %v7987_v58, %v2919_v42  ;;  %3143 = vadd.xlane.f32.xlu1 %v3142_v50  ;;  %3137 = vadd.xlane.f32.xlu0 %v3136_v44  ;;  %v3001_v29 = vsub.f32 %v7983_v45, %v2913_v23 }
 0x2d9   : > { %v8130_v19 = vpop.eup %6941  ;;  %6955 = vpow2.f32 %v3090_v26 }
 0x2da   : > { %v8132_v9 = vpop.eup %6943  ;;  %v3040_v33 = vmul.f32 1.442695, %v3003_v0  ;;  %v3036_v32 = vmul.f32 1.442695, %v3001_v29  ;;  %v3154_v4 = vsel %vm2901_vm3, %v8130_v19, 0.0 }
 0x2db   : > { %v2931_v20 = vpop.xlane.xlu1 %2930  ;;  %v3148_v52 = vsel %vm2901_vm3, %v8132_v9, 0.0  ;;  %v2925_v49 = vpop.xlane.xlu0 %2924 }
 0x2dc   : > { %6957 = vpow2.f32 %v3040_v33  ;;  %v3007_v58 = vsub.f32 %v7999_v39, %v2931_v20  ;;  %3155 = vadd.xlane.f32.xlu1 %v3154_v4  ;;  %3149 = vadd.xlane.f32.xlu0 %v3148_v52  ;;  %v3005_v45 = vsub.f32 %v7995_v31, %v2925_v49 }
 0x2dd   : > { %v8140_v56 = vpop.eup %6945  ;;  %6959 = vpow2.f32 %v3036_v32 }
 0x2de   : > { %v8142_v53 = vpop.eup %6947  ;;  %v3048_v60 = vmul.f32 1.442695, %v3007_v58  ;;  %v3044_v57 = vmul.f32 1.442695, %v3005_v45  ;;  %v3166_v11 = vsel %vm2901_vm3, %v8140_v56, 0.0 }
 0x2df   : > { %v2943_v1 = vpop.xlane.xlu1 %2942  ;;  %v3160_v37 = vsel %vm2901_vm3, %v8142_v53, 0.0  ;;  %v2937_v2 = vpop.xlane.xlu0 %2936 }
 0x2e0   : > { %6961 = vpow2.f32 %v3048_v60  ;;  %v3011_v39 = vsub.f32 %v8011_v27, %v2943_v1  ;;  %3167 = vadd.xlane.f32.xlu1 %v3166_v11  ;;  %3161 = vadd.xlane.f32.xlu0 %v3160_v37  ;;  %v3009_v31 = vsub.f32 %v8007_v18, %v2937_v2 }
 0x2e1   : > { %v8150_v5 = vpop.eup %6949  ;;  %6963 = vpow2.f32 %v3044_v57 }
 0x2e2   : > { %v8152_v6 = vpop.eup %6951  ;;  %v3056_v13 = vmul.f32 1.442695, %v3011_v39  ;;  %v3052_v3 = vmul.f32 1.442695, %v3009_v31  ;;  %v3178_v14 = vsel %vm2901_vm3, %v8150_v5, 0.0 }
 0x2e3   : > { %v2955_v41 = vpop.xlane.xlu1 %2954  ;;  %v3172_v59 = vsel %vm2901_vm3, %v8152_v6, 0.0  ;;  %v2949_v40 = vpop.xlane.xlu0 %2948 }
 0x2e4   : > { %6965 = vpow2.f32 %v3056_v13  ;;  %v3015_v27 = vsub.f32 %v8023_v8, %v2955_v41  ;;  %3179 = vadd.xlane.f32.xlu1 %v3178_v14  ;;  %3173 = vadd.xlane.f32.xlu0 %v3172_v59  ;;  %v3013_v18 = vsub.f32 %v8019_v17, %v2949_v40 }
 0x2e5   : > { %v8160_v16 = vpop.eup %6953  ;;  %6967 = vpow2.f32 %v3052_v3 }
 0x2e6   : > { %v8162_v47 = vpop.eup %6955  ;;  %v3064_v15 = vmul.f32 1.442695, %v3015_v27  ;;  %v3060_v25 = vmul.f32 1.442695, %v3013_v18  ;;  %v3097_v54 = vsel %vm2901_vm3, %v8160_v16, 0.0 }
 0x2e7   : > { %v2967_v26 = vpop.xlane.xlu1 %2966  ;;  %v3184_v50 = vsel %vm2901_vm3, %v8162_v47, 0.0  ;;  %v2961_v42 = vpop.xlane.xlu0 %2960 }
 0x2e8   : > { %6969 = vpow2.f32 %v3064_v15  ;;  %v3019_v8 = vsub.f32 %v8035_v35, %v2967_v26  ;;  %3098 = vadd.xlane.f32.xlu1 %v3097_v54  ;;  %3185 = vadd.xlane.f32.xlu0 %v3184_v50  ;;  %v3017_v17 = vsub.f32 %v8031_v61, %v2961_v42 }
 0x2e9   : > { %v8170_v44 = vpop.eup %6957  ;;  %6971 = vpow2.f32 %v3060_v25 }
 0x2ea   : > { %v8172_v23 = vpop.eup %6959  ;;  %v3072_v0 = vmul.f32 1.442695, %v3019_v8  ;;  %v3068_v29 = vmul.f32 1.442695, %v3017_v17  ;;  %v3109_v33 = vsel %vm2901_vm3, %v8170_v44, 0.0 }
 0x2eb   : > { %v2979_v32 = vpop.xlane.xlu1 %2978  ;;  %v3103_v4 = vsel %vm2901_vm3, %v8172_v23, 0.0  ;;  %v2973_v20 = vpop.xlane.xlu0 %2972 }
 0x2ec   : > { %6973 = vpow2.f32 %v3072_v0  ;;  %v3023_v35 = vsub.f32 %v8047_v34, %v2979_v32  ;;  %3110 = vadd.xlane.f32.xlu1 %v3109_v33  ;;  %3104 = vadd.xlane.f32.xlu0 %v3103_v4  ;;  %v3021_v61 = vsub.f32 %v8043_v10, %v2973_v20 }
 0x2ed   : > { %v8180_v52 = vpop.eup %6961  ;;  %6975 = vpow2.f32 %v3068_v29 }
 0x2ee   : > { %v8182_v49 = vpop.eup %6963  ;;  %v3080_v58 = vmul.f32 1.442695, %v3023_v35  ;;  %v3076_v45 = vmul.f32 1.442695, %v3021_v61  ;;  %v3121_v60 = vsel %vm2901_vm3, %v8180_v52, 0.0 }
 0x2ef   : > { %v2991_v57 = vpop.xlane.xlu1 %2990  ;;  %v3115_v11 = vsel %vm2901_vm3, %v8182_v49, 0.0  ;;  %v2985_v1 = vpop.xlane.xlu0 %2984 }
 0x2f0   : > { %6977 = vpow2.f32 %v3080_v58  ;;  %v3027_v34 = vsub.f32 %v8059_v30, %v2991_v57  ;;  %3122 = vadd.xlane.f32.xlu1 %v3121_v60  ;;  %3116 = vadd.xlane.f32.xlu0 %v3115_v11  ;;  %v3025_v10 = vsub.f32 %v8055_v24, %v2985_v1 }
 0x2f1   : > { %v8190_v37 = vpop.eup %6965  ;;  %6979 = vpow2.f32 %v3076_v45 }
 0x2f2   : > { %v8192_v2 = vpop.eup %6967  ;;  %v3088_v39 = vmul.f32 1.442695, %v3027_v34  ;;  %v3084_v31 = vmul.f32 1.442695, %v3025_v10  ;;  %v3133_v13 = vsel %vm2901_vm3, %v8190_v37, 0.0 }
 0x2f3   : > { %v3127_v3 = vsel %vm2901_vm3, %v8192_v2, 0.0  ;;  %v2997_v14 = vpop.xlane.xlu0 %2996  ;;  %v8237_v20 = vpop.permute.xlu1 %4193 }
 0x2f4   : > { %6981 = vpow2.f32 %v3088_v39  ;;  %3134 = vadd.xlane.f32.xlu1 %v3133_v13  ;;  %3128 = vadd.xlane.f32.xlu0 %v3127_v3  ;;  %v3029_v30 = vsub.f32 %v8067_v46, %v2997_v14 }
 0x2f5   : > { %v8199_v24 = vpop.eup %6969  ;;  %6983 = vpow2.f32 %v3084_v31 }
 0x2f6   : > { %v8201_v41 = vpop.eup %6971  ;;  %v3092_v59 = vmul.f32 1.442695, %v3029_v30  ;;  %v3145_v40 = vsel %vm2901_vm3, %v8199_v24, 0.0 }
 0x2f7   : > { %v3139_v27 = vsel %vm2901_vm3, %v8201_v41, 0.0  ;;  %v8235_v4 = vpop.permute.xlu0 %4146 }
 0x2f8   : > { %6985 = vpow2.f32 %v3092_v59  ;;  %3146 = vadd.xlane.f32.xlu1 %v3145_v40  ;;  %3140 = vadd.xlane.f32.xlu0 %v3139_v27 }
 0x2f9   : > { %v8207_v18 = vpop.eup %6973 }
 0x2fa   : > { %v8209_v15 = vpop.eup %6975  ;;  %v3157_v46 = vsel %vm2901_vm3, %v8207_v18, 0.0 }
 0x2fb   : > { %v3151_v25 = vsel %vm2901_vm3, %v8209_v15, 0.0 }
 0x2fc   : > { %3158 = vadd.xlane.f32.xlu1 %v3157_v46  ;;  %3152 = vadd.xlane.f32.xlu0 %v3151_v25 }
 0x2fd   : > { %v8215_v54 = vpop.eup %6977 }
 0x2fe   : > { %v8217_v26 = vpop.eup %6979  ;;  %v3169_v50 = vsel %vm2901_vm3, %v8215_v54, 0.0 }
 0x2ff   : > { %v3163_v42 = vsel %vm2901_vm3, %v8217_v26, 0.0 }
 0x300   : > { %3170 = vadd.xlane.f32.xlu1 %v3169_v50  ;;  %3164 = vadd.xlane.f32.xlu0 %v3163_v42 }
 0x301   : > { %v8223_v8 = vpop.eup %6981 }
 0x302   : > { %v8225_v17 = vpop.eup %6983  ;;  %v3181_v0 = vsel %vm2901_vm3, %v8223_v8, 0.0 }
 0x303   : > { %v3175_v29 = vsel %vm2901_vm3, %v8225_v17, 0.0 }
 0x304   : > { %3182 = vadd.xlane.f32.xlu1 %v3181_v0  ;;  %3176 = vadd.xlane.f32.xlu0 %v3175_v29 }
 0x305   : > { %v8231_v33 = vpop.eup %6985 }
 0x306   : > { %v3187_v32 = vsel %vm2901_vm3, %v8231_v33, 0.0 }
 0x308   : > { %3188 = vadd.xlane.f32.xlu0 %v3187_v32 }
 0x350   : > { %v3102_v35 = vpop.xlane.xlu0 %3101 }
 0x351   : > { %v3096_v61 = vpop.xlane.xlu1 %3095  ;;  %6987 = vrcp.f32 %v3102_v35 }
 0x352   : > { %6989 = vrcp.f32 %v3096_v61 }
 0x355   : > { %v3108_v58 = vpop.xlane.xlu1 %3107 }
 0x356   : > { %6991 = vrcp.f32 %v3108_v58 }
 0x359   : > { %v3120_v45 = vpop.xlane.xlu1 %3119  ;;  %v3114_v60 = vpop.xlane.xlu0 %3113 }
 0x35a   : > { %6993 = vrcp.f32 %v3120_v45 }
 0x35b   : > { %6995 = vrcp.f32 %v3114_v60 }
 0x35d   : > { %v3132_v57 = vpop.xlane.xlu1 %3131  ;;  %v3126_v11 = vpop.xlane.xlu0 %3125 }
 0x35e   : > { %v6988_v1 = vpop.eup %6987  ;;  %6997 = vrcp.f32 %v3132_v57 }
 0x35f   : > { %v6990_v34 = vpop.eup %6989  ;;  %6999 = vrcp.f32 %v3126_v11  ;;  %v8240_v10 = vmul.f32 %v6988_v1, %v8084_v28 }
 0x360   : > { %v8243_v39 = vmul.f32 %v6990_v34, %v8086_v43 }
 0x361   : > { %v3144_v31 = vpop.xlane.xlu1 %3143  ;;  %v3138_v13 = vpop.xlane.xlu0 %3137  ;;  %3306 = vrot.lane.b32.xlu0 %v8240_v10, %s7106_s28 }
 0x362   : > { %7001 = vrcp.f32 %v3144_v31  ;;  %3302 = vrot.lane.b32.xlu1 %v8243_v39, %s7106_s28 }
 0x363   : > { %v6992_v3 = vpop.eup %6991  ;;  %7003 = vrcp.f32 %v3138_v13 }
 0x364   : > { %v8250_v14 = vmul.f32 %v6992_v3, %v8094_v48 }
 0x365   : > { %v3156_v30 = vpop.xlane.xlu1 %3155  ;;  %v3150_v28 = vpop.xlane.xlu0 %3149 }
 0x366   : > { %7005 = vrcp.f32 %v3156_v30  ;;  %3310 = vrot.lane.b32.xlu1 %v8250_v14, %s7106_s28 }
 0x367   : > { %v6994_v43 = vpop.eup %6993  ;;  %7007 = vrcp.f32 %v3150_v28 }
 0x368   : > { %v6996_v59 = vpop.eup %6995  ;;  %v8255_v40 = vmul.f32 %v6994_v43, %v8100_v62 }
 0x369   : > { %v3168_v27 = vpop.xlane.xlu1 %3167  ;;  %v3162_v46 = vpop.xlane.xlu0 %3161  ;;  %v8258_v25 = vmul.f32 %v6996_v59, %v8102_v51 }
 0x36a   : > { %7009 = vrcp.f32 %v3168_v27  ;;  %3318 = vrot.lane.b32.xlu0 %v8255_v40, %s7106_s28 }
 0x36b   : > { %v6998_v48 = vpop.eup %6997  ;;  %7011 = vrcp.f32 %v3162_v46  ;;  %3314 = vrot.lane.b32.xlu1 %v8258_v25, %s7106_s28 }
 0x36c   : > { %v7000_v50 = vpop.eup %6999  ;;  %v8265_v42 = vmul.f32 %v6998_v48, %v8110_v12 }
 0x36d   : > { %v3180_v62 = vpop.xlane.xlu1 %3179  ;;  %v3174_v0 = vpop.xlane.xlu0 %3173  ;;  %v8268_v29 = vmul.f32 %v7000_v50, %v8112_v21 }
 0x36e   : > { %9463 = vst [vmem:[#allocation3_spill] sm:$0xff] %v8265_v42  ;;  %7013 = vrcp.f32 %v3180_v62  ;;  %3326 = vrot.lane.b32.xlu0 %v8265_v42, %s7106_s28 }
 0x36f   : > { %9464 = vst [vmem:[#allocation4_spill] sm:$0xff] %v8268_v29  ;;  %v7002_v51 = vpop.eup %7001  ;;  %7015 = vrcp.f32 %v3174_v0  ;;  %3322 = vrot.lane.b32.xlu1 %v8268_v29, %s7106_s28 }
 0x370   : > { %v7004_v32 = vpop.eup %7003  ;;  %v8275_v35 = vmul.f32 %v7002_v51, %v8120_v22 }
 0x371   : > { %v3099_v12 = vpop.xlane.xlu1 %3098  ;;  %v3186_v61 = vpop.xlane.xlu0 %3185  ;;  %v8278_v58 = vmul.f32 %v7004_v32, %v8122_v63 }
 0x372   : > { %9465 = vst [vmem:[#allocation5_spill] sm:$0xff] %v8275_v35  ;;  %7017 = vrcp.f32 %v3099_v12  ;;  %3334 = vrot.lane.b32.xlu0 %v8275_v35, %s7106_s28 }
 0x373   : > { %9466 = vst [vmem:[#allocation6_spill] sm:$0xff] %v8278_v58  ;;  %v7006_v21 = vpop.eup %7005  ;;  %7019 = vrcp.f32 %v3186_v61  ;;  %3330 = vrot.lane.b32.xlu1 %v8278_v58, %s7106_s28 }
 0x374   : > { %v7008_v45 = vpop.eup %7007  ;;  %v8285_v60 = vmul.f32 %v7006_v21, %v8130_v19 }
 0x375   : > { %v3111_v22 = vpop.xlane.xlu1 %3110  ;;  %v3105_v57 = vpop.xlane.xlu0 %3104  ;;  %v8288_v11 = vmul.f32 %v7008_v45, %v8132_v9 }
 0x376   : > { %9467 = vst [vmem:[#allocation7_spill] sm:$0xff] %v8285_v60  ;;  %7021 = vrcp.f32 %v3111_v22  ;;  %3342 = vrot.lane.b32.xlu0 %v8285_v60, %s7106_s28 }
 0x377   : > { %9468 = vst [vmem:[#allocation8_spill] sm:$0xff] %v8288_v11  ;;  %v7010_v63 = vpop.eup %7009  ;;  %7023 = vrcp.f32 %v3105_v57  ;;  %3338 = vrot.lane.b32.xlu1 %v8288_v11, %s7106_s28 }
 0x378   : > { %v7012_v1 = vpop.eup %7011  ;;  %v8295_v34 = vmul.f32 %v7010_v63, %v8140_v56 }
 0x379   : > { %v3123_v19 = vpop.xlane.xlu1 %3122  ;;  %v3117_v31 = vpop.xlane.xlu0 %3116  ;;  %v8298_v13 = vmul.f32 %v7012_v1, %v8142_v53 }
 0x37a   : > { %9469 = vst [vmem:[#allocation9_spill] sm:$0xff] %v8295_v34  ;;  %7025 = vrcp.f32 %v3123_v19  ;;  %3350 = vrot.lane.b32.xlu0 %v8295_v34, %s7106_s28 }
 0x37b   : > { %9470 = vst [vmem:[#allocation10_spill] sm:$0xff] %v8298_v13  ;;  %v7014_v9 = vpop.eup %7013  ;;  %7027 = vrcp.f32 %v3117_v31  ;;  %3346 = vrot.lane.b32.xlu1 %v8298_v13, %s7106_s28 }
 0x37c   : > { %v7016_v3 = vpop.eup %7015  ;;  %v8305_v30 = vmul.f32 %v7014_v9, %v8150_v5 }
 0x37d   : > { %v3135_v56 = vpop.xlane.xlu1 %3134  ;;  %v3129_v28 = vpop.xlane.xlu0 %3128  ;;  %v8308_v43 = vmul.f32 %v7016_v3, %v8152_v6 }
 0x37e   : > { %9471 = vst [vmem:[#allocation11_spill] sm:$0xff] %v8305_v30  ;;  %7029 = vrcp.f32 %v3135_v56  ;;  %3358 = vrot.lane.b32.xlu0 %v8305_v30, %s7106_s28 }
 0x37f   : > { %9472 = vst [vmem:[#allocation12_spill] sm:$0xff] %v8308_v43  ;;  %v7018_v53 = vpop.eup %7017  ;;  %7031 = vrcp.f32 %v3129_v28  ;;  %3354 = vrot.lane.b32.xlu1 %v8308_v43, %s7106_s28 }
 0x380   : > { %v7020_v59 = vpop.eup %7019  ;;  %v8315_v27 = vmul.f32 %v7018_v53, %v8160_v16 }
 0x381   : > { %v3147_v5 = vpop.xlane.xlu1 %3146  ;;  %v3141_v46 = vpop.xlane.xlu0 %3140  ;;  %v8318_v48 = vmul.f32 %v7020_v59, %v8162_v47 }
 0x382   : > { %7033 = vrcp.f32 %v3147_v5  ;;  %3304 = vrot.lane.b32.xlu0 %v8315_v27, %s7106_s28 }
 0x383   : > { %9473 = vst [vmem:[#allocation13_spill] sm:$0xff] %v8318_v48  ;;  %v7022_v50 = vpop.eup %7021  ;;  %7035 = vrcp.f32 %v3141_v46  ;;  %3362 = vrot.lane.b32.xlu1 %v8318_v48, %s7106_s28 }
 0x384   : > { %v7024_v62 = vpop.eup %7023  ;;  %v8327_v16 = vmul.f32 %v7022_v50, %v8170_v44 }
 0x385   : > { %v3159_v0 = vpop.xlane.xlu1 %3158  ;;  %v3153_v51 = vpop.xlane.xlu0 %3152  ;;  %v8330_v47 = vmul.f32 %v7024_v62, %v8172_v23 }
 0x386   : > { %7037 = vrcp.f32 %v3159_v0  ;;  %3312 = vrot.lane.b32.xlu0 %v8327_v16, %s7106_s28 }
 0x387   : > { %v7026_v12 = vpop.eup %7025  ;;  %7039 = vrcp.f32 %v3153_v51  ;;  %3308 = vrot.lane.b32.xlu1 %v8330_v47, %s7106_s28 }
 0x388   : > { %v7028_v61 = vpop.eup %7027  ;;  %v8341_v21 = vmul.f32 %v7026_v12, %v8180_v52 }
 0x389   : > { %v3171_v23 = vpop.xlane.xlu1 %3170  ;;  %v3165_v45 = vpop.xlane.xlu0 %3164  ;;  %v8344_v22 = vmul.f32 %v7028_v61, %v8182_v49 }
 0x38a   : > { %7041 = vrcp.f32 %v3171_v23  ;;  %3320 = vrot.lane.b32.xlu0 %v8341_v21, %s7106_s28 }
 0x38b   : > { %v7030_v63 = vpop.eup %7029  ;;  %7043 = vrcp.f32 %v3165_v45  ;;  %3316 = vrot.lane.b32.xlu1 %v8344_v22, %s7106_s28 }
 0x38c   : > { %v7032_v1 = vpop.eup %7031  ;;  %v8355_v19 = vmul.f32 %v7030_v63, %v8190_v37 }
 0x38d   : > { %v3183_v49 = vpop.xlane.xlu1 %3182  ;;  %v3177_v31 = vpop.xlane.xlu0 %3176  ;;  %v8358_v9 = vmul.f32 %v7032_v1, %v8192_v2 }
 0x38e   : > { %9474 = vst [vmem:[#allocation14_spill] sm:$0xff] %v8355_v19  ;;  %7045 = vrcp.f32 %v3183_v49  ;;  %3328 = vrot.lane.b32.xlu0 %v8355_v19, %s7106_s28 }
 0x38f   : > { %v7034_v56 = vpop.eup %7033  ;;  %7047 = vrcp.f32 %v3177_v31  ;;  %3324 = vrot.lane.b32.xlu1 %v8358_v9, %s7106_s28 }
 0x390   : > { %v7036_v28 = vpop.eup %7035  ;;  %v8369_v53 = vmul.f32 %v7034_v56, %v8199_v24 }
 0x391   : > { %v3189_v2 = vpop.xlane.xlu0 %3188  ;;  %v8372_v59 = vmul.f32 %v7036_v28, %v8201_v41  ;;  %v7053_v28 = vld [vmem:[%s7214_s27 + $0x30] sm:$0xff]  }
 0x392   : > { %9475 = vst [vmem:[#allocation15_spill] sm:$0xff] %v8369_v53  ;;  %7049 = vrcp.f32 %v3189_v2  ;;  %3336 = vrot.lane.b32.xlu0 %v8369_v53, %s7106_s28  ;;  %v7054_v2 = vld [vmem:[%s7214_s27 + $0x40] sm:$0xff]  }
 0x393   : > { %9476 = vst [vmem:[#allocation16_spill] sm:$0xff] %v8372_v59  ;;  %v7038_v46 = vpop.eup %7037  ;;  %3332 = vrot.lane.b32.xlu1 %v8372_v59, %s7106_s28 }
 0x394   : > { %v7040_v24 = vpop.eup %7039  ;;  %v8383_v62 = vmul.f32 %v7038_v46, %v8207_v18  ;;  %v7055_v46 = vld [vmem:[%s7214_s27 + $0x38] sm:$0xff]  }
 0x395   : > { %v8386_v41 = vmul.f32 %v7040_v24, %v8209_v15  ;;  %v7057_v24 = vld [vmem:[%s7214_s27 + $0x48] sm:$0xff]  }
 0x396   : > { %9477 = vst [vmem:[#allocation17_spill] sm:$0xff] %v8383_v62  ;;  %3344 = vrot.lane.b32.xlu0 %v8383_v62, %s7106_s28 }
 0x397   : > { %9478 = vst [vmem:[#allocation18_spill] sm:$0xff] %v8386_v41  ;;  %v7042_v51 = vpop.eup %7041  ;;  %3340 = vrot.lane.b32.xlu1 %v8386_v41, %s7106_s28 }
 0x398   : > { %v7044_v61 = vpop.eup %7043  ;;  %v8397_v18 = vmul.f32 %v7042_v51, %v8215_v54  ;;  %v7058_v51 = vld [vmem:[%s7214_s27 + $0x60] sm:$0xff]  }
 0x399   : > { %v8400_v15 = vmul.f32 %v7044_v61, %v8217_v26  ;;  %v7059_v61 = vld [vmem:[%s7214_s27 + $0x58] sm:$0xff]  }
 0x39a   : > { %9479 = vst [vmem:[#allocation19_spill] sm:$0xff] %v8397_v18  ;;  %3352 = vrot.lane.b32.xlu0 %v8397_v18, %s7106_s28 }
 0x39b   : > { %9480 = vst [vmem:[#allocation20_spill] sm:$0xff] %v8400_v15  ;;  %v7046_v45 = vpop.eup %7045  ;;  %3348 = vrot.lane.b32.xlu1 %v8400_v15, %s7106_s28 }
 0x39c   : > { %v7048_v54 = vpop.eup %7047  ;;  %v8411_v26 = vmul.f32 %v7046_v45, %v8223_v8  ;;  %v7060_v45 = vld [vmem:[%s7214_s27 + $0x70] sm:$0xff]  }
 0x39d   : > { %v8414_v1 = vmul.f32 %v7048_v54, %v8225_v17  ;;  %v7061_v54 = vld [vmem:[%s7214_s27 + $0x68] sm:$0xff]  }
 0x39e   : > { %9481 = vst [vmem:[#allocation21_spill] sm:$0xff] %v8411_v26  ;;  %3360 = vrot.lane.b32.xlu0 %v8411_v26, %s7106_s28 }
 0x39f   : > { %9482 = vst [vmem:[#allocation22_spill] sm:$0xff] %v8414_v1  ;;  %v7050_v31 = vpop.eup %7049  ;;  %3356 = vrot.lane.b32.xlu1 %v8414_v1, %s7106_s28 }
 0x3a0   : > { %v8425_v56 = vmul.f32 %v7050_v31, %v8231_v33  ;;  %v7056_v33 = vld [vmem:[%s7214_s27 + $0x50] sm:$0xff]   ;;  %v7062_v31 = vld [vmem:[%s7168_s23] sm:$0xff]  }
 0x3a2   : > { %9483 = vst [vmem:[#allocation23_spill] sm:$0xff] %v8425_v56  ;;  %4240 = vrot.lane.b32.xlu0 %v7053_v28, %s7106_s28  ;;  %v7063_v28 = vld [vmem:[%s7214_s27 + $0x78] sm:$0xff]  }
 0x3a3   : > { %3364 = vrot.lane.b32.xlu1 %v8425_v56, %s7106_s28 }
 0x3a6   : > { %4334 = vrot.lane.b32.xlu0 %v7054_v2, %s7106_s28  ;;  %v7064_v2 = vld [vmem:[%s7168_s23 + $0x10] sm:$0xff]  }
 0x3a7   : > { %4287 = vrot.lane.b32.xlu1 %v7055_v46, %s7106_s28  ;;  %v7065_v46 = vld [vmem:[%s7168_s23 + $0x8] sm:$0xff]  }
 0x3aa   : > { %4428 = vrot.lane.b32.xlu0 %v7056_v33, %s7106_s28  ;;  %v7066_v33 = vld [vmem:[%s7168_s23 + $0x20] sm:$0xff]  }
 0x3ab   : > { %4381 = vrot.lane.b32.xlu1 %v7057_v24, %s7106_s28  ;;  %v7067_v24 = vld [vmem:[%s7168_s23 + $0x18] sm:$0xff]  }
 0x3ae   : > { %4522 = vrot.lane.b32.xlu0 %v7058_v51, %s7106_s28  ;;  %v7068_v51 = vld [vmem:[%s7168_s23 + $0x30] sm:$0xff]  }
 0x3af   : > { %4475 = vrot.lane.b32.xlu1 %v7059_v61, %s7106_s28  ;;  %v7069_v61 = vld [vmem:[%s7168_s23 + $0x28] sm:$0xff]  }
 0x3b2   : > { %4616 = vrot.lane.b32.xlu0 %v7060_v45, %s7106_s28  ;;  %v7070_v45 = vld [vmem:[%s7168_s23 + $0x40] sm:$0xff]  }
 0x3b3   : > { %4569 = vrot.lane.b32.xlu1 %v7061_v54, %s7106_s28  ;;  %v7071_v54 = vld [vmem:[%s7168_s23 + $0x38] sm:$0xff]  }
 0x3b6   : > { %5254 = vrot.lane.b32.xlu0 %v7062_v31, %s7106_s28  ;;  %v7072_v31 = vld [vmem:[%s7168_s23 + $0x50] sm:$0xff]  }
 0x3b7   : > { %4663 = vrot.lane.b32.xlu1 %v7063_v28, %s7106_s28  ;;  %v7073_v28 = vld [vmem:[%s7168_s23 + $0x48] sm:$0xff]  }
 0x3ba   : > { %5348 = vrot.lane.b32.xlu0 %v7064_v2, %s7106_s28  ;;  %v7074_v2 = vld [vmem:[%s7168_s23 + $0x60] sm:$0xff]  }
 0x3bb   : > { %5301 = vrot.lane.b32.xlu1 %v7065_v46, %s7106_s28  ;;  %v7075_v46 = vld [vmem:[%s7168_s23 + $0x58] sm:$0xff]  }
 0x3be   : > { %5442 = vrot.lane.b32.xlu0 %v7066_v33, %s7106_s28  ;;  %v7076_v33 = vld [vmem:[%s7168_s23 + $0x70] sm:$0xff]  }
 0x3bf   : > { %5395 = vrot.lane.b32.xlu1 %v7067_v24, %s7106_s28  ;;  %v7077_v24 = vld [vmem:[%s7168_s23 + $0x68] sm:$0xff]  }
 0x3c2   : > { %5536 = vrot.lane.b32.xlu0 %v7068_v51, %s7106_s28 }
 0x3c3   : > { %5489 = vrot.lane.b32.xlu1 %v7069_v61, %s7106_s28  ;;  %v7078_v61 = vld [vmem:[%s7168_s23 + $0x78] sm:$0xff]  }
 0x3c6   : > { %5630 = vrot.lane.b32.xlu0 %v7070_v45, %s7106_s28 }
 0x3c7   : > { %5583 = vrot.lane.b32.xlu1 %v7071_v54, %s7106_s28 }
 0x3ca   : > { %5724 = vrot.lane.b32.xlu0 %v7072_v31, %s7106_s28 }
 0x3cb   : > { %5677 = vrot.lane.b32.xlu1 %v7073_v28, %s7106_s28 }
 0x3ce   : > { %5818 = vrot.lane.b32.xlu0 %v7074_v2, %s7106_s28 }
 0x3cf   : > { %5771 = vrot.lane.b32.xlu1 %v7075_v46, %s7106_s28 }
 0x3d2   : > { %5912 = vrot.lane.b32.xlu0 %v7076_v33, %s7106_s28 }
 0x3d3   : > { %5865 = vrot.lane.b32.xlu1 %v7077_v24, %s7106_s28  ;;  %v8485_v45 = vpop.permute.xlu0 %3306 }
 0x3d4   : > { %v8481_v51 = vpop.permute.xlu1 %3302 }
 0x3d7   : > { %5959 = vrot.lane.b32.xlu1 %v7078_v61, %s7106_s28 }
 0x3d8   : > { %v8487_v54 = vpop.permute.xlu1 %3310 }
 0x3d9   : > { %v3398_v3 = vcombine.low %v8481_v51, %v8487_v54 }
 0x3db   : > { %v3406_v30 = vrot.slane %v3398_v3, %v7616_v55 }
 0x3dc   : > { %v8489_v31 = vpop.permute.xlu0 %3318 }
 0x3dd   : > { %v8491_v28 = vpop.permute.xlu1 %3314 }
 0x3de   : > { %v3414_v63 = vcombine.low %v8485_v45, %v8491_v28 }
 0x3e0   : > { %v8493_v2 = vpop.permute.xlu0 %3326  ;;  %v3422_v52 = vrot.slane %v3414_v63, %v7616_v55 }
 0x3e1   : > { %v3323_v46 = vpop.permute.xlu1 %3322  ;;  %v3430_v0 = vcombine.low %v8489_v31, %v8493_v2 }
 0x3e3   : > { %v3438_v32 = vrot.slane %v3430_v0, %v7616_v55 }
 0x3e4   : > { %v8495_v33 = vpop.permute.xlu0 %3334 }
 0x3e5   : > { %v3331_v17 = vpop.permute.xlu1 %3330 }
 0x3e6   : > { %v3446_v61 = vcombine.low %v3323_v46, %v3331_v17  ;;  %v3447_v3 = vcombine.high %v3323_v46, %v3331_v17  ;;  %v3415_v17 = vcombine.high %v8485_v45, %v8491_v28  ;;  %v3463_v46 = vcombine.high %v3406_v30, %v3422_v52 }
 0x3e8   : > { %v8497_v24 = vpop.permute.xlu0 %3342  ;;  %v3454_v37 = vrot.slane %v3446_v61, %v7616_v55  ;;  %v3462_v61 = vcombine.low %v3406_v30, %v3422_v52  ;;  %v3399_v30 = vcombine.high %v8481_v51, %v8487_v54  ;;  %v8546_v52 = vrot.slane %v3447_v3, %v7616_v55 }
 0x3e9   : > { %v3339_v49 = vpop.permute.xlu1 %3338  ;;  %v3534_v57 = vcombine.low %v8495_v33, %v8497_v24  ;;  %v9484_v51 = vmov 0.0  }
 0x3ea   : > { %v3494_v26 = vcombine.low %v3438_v32, %v3454_v37  ;;  %v3470_v60 = vrot.slane %v3462_v61, %v7623_v38  ;;  %v3413_v45 = vrot.slane %v3399_v30, %v7616_v55 }
 0x3eb   : > { %v3542_v43 = vrot.slane %v3534_v57, %v7616_v55 }
 0x3ec   : > { %v3351_v8 = vpop.permute.xlu0 %3350 }
 0x3ed   : > { %v3347_v23 = vpop.permute.xlu1 %3346 }
 0x3ee   : > { %v3550_v5 = vcombine.low %v3339_v49, %v3347_v23  ;;  %v3551_v59 = vcombine.high %v3339_v49, %v3347_v23 }
 0x3f0   : > { %v3359_v12 = vpop.permute.xlu0 %3358  ;;  %v3558_v6 = vrot.slane %v3550_v5, %v7616_v55  ;;  %v3502_v5 = vrot.slane %v3494_v26, %v7623_v38 }
 0x3f1   : > { %v3355_v50 = vpop.permute.xlu1 %3354  ;;  %v3566_v48 = vcombine.low %v3351_v8, %v3359_v12  ;;  %v3567_v26 = vcombine.high %v3351_v8, %v3359_v12  ;;  %v8550_v12 = vrot.slane %v3551_v59, %v7616_v55  ;;  %v3477_v59 = vrot.slane %v3463_v46, %v7623_v38 }
 0x3f2   : > { %v3598_v18 = vcombine.low %v3542_v43, %v3558_v6  ;;  %v3527_v58 = vcombine.high %v3470_v60, %v3502_v5  ;;  %v3599_v42 = vcombine.high %v3542_v43, %v3558_v6 }
 0x3f3   : > { %v3574_v63 = vrot.slane %v3566_v48, %v7616_v55  ;;  %v3495_v48 = vcombine.high %v3438_v32, %v3454_v37  ;;  %v3581_v23 = vrot.slane %v3567_v26, %v7616_v55 }
 0x3f4   : > { %v8510_v44 = vpop.permute.xlu0 %3304  ;;  %v3606_v57 = vrot.slane %v3598_v18, %v7623_v38  ;;  %v3535_v18 = vcombine.high %v8495_v33, %v8497_v24 }
 0x3f5   : > { %v3363_v56 = vpop.permute.xlu1 %3362  ;;  %v3509_v37 = vrot.slane %v3495_v48, %v7623_v38 }
 0x3f6   : > { %v3582_v1 = vcombine.low %v3355_v50, %v3363_v56  ;;  %v3583_v11 = vcombine.high %v3355_v50, %v3363_v56  ;;  %v3431_v50 = vcombine.high %v8489_v31, %v8493_v2 }
 0x3f7   : > { %v3528_v54 = vcombine.low %v3477_v59, %v3509_v37  ;;  %v3529_v28 = vcombine.high %v3477_v59, %v3509_v37 }
 0x3f8   : > { %v8515_v34 = vpop.permute.xlu0 %3312  ;;  %v3590_v0 = vrot.slane %v3582_v1, %v7616_v55  ;;  %v3526_v1 = vcombine.low %v3470_v60, %v3502_v5  ;;  %v8538_v32 = vrot.slane %v3583_v11, %v7616_v55  ;;  %v3613_v11 = vrot.slane %v3599_v42, %v7623_v38 }
 0x3f9   : > { %v8519_v13 = vpop.permute.xlu1 %3308 }
 0x3fa   : > { %v3630_v15 = vcombine.low %v3574_v63, %v3590_v0  ;;  %v3631_v41 = vcombine.high %v3574_v63, %v3590_v0  ;;  %v3646_v42 = vcombine.low %v3581_v23, %v8538_v32  ;;  %v3647_v48 = vcombine.high %v3581_v23, %v8538_v32 }
 0x3fb   : > { %v3670_v23 = vcombine.low %v8510_v44, %v8515_v34 }
 0x3fc   : > { %v8523_v62 = vpop.permute.xlu0 %3320  ;;  %v3638_v35 = vrot.slane %v3630_v15, %v7623_v38  ;;  %v3645_v60 = vrot.slane %v3631_v41, %v7623_v38  ;;  %v3549_v41 = vrot.slane %v3535_v18, %v7616_v55  ;;  %v3654_v33 = vrot.slane %v3646_v42, %v7623_v38 }
 0x3fd   : > { %v8527_v53 = vpop.permute.xlu1 %3316  ;;  %v3661_v30 = vrot.slane %v3647_v48, %v7623_v38 }
 0x3fe   : > { %v3662_v19 = vcombine.low %v3606_v57, %v3638_v35  ;;  %v3663_v29 = vcombine.high %v3606_v57, %v3638_v35  ;;  %v3664_v49 = vcombine.low %v3613_v11, %v3645_v60  ;;  %v3665_v56 = vcombine.high %v3613_v11, %v3645_v60 }
 0x3ff   : > { %v3614_v31 = vcombine.low %v3549_v41, %v8550_v12  ;;  %v3615_v32 = vcombine.high %v3549_v41, %v8550_v12 }
 0x400   : > { %v8535_v15 = vpop.permute.xlu0 %3328  ;;  %v3942_v43 = vpack.c.bf16 %v3662_v19, %v3526_v1  ;;  %v3943_v6 = vpack.c.bf16 %v3663_v29, %v3527_v58  ;;  %v8556_v29 = vrot.slane %v3415_v17, %v7616_v55  ;;  %v3445_v58 = vrot.slane %v3431_v50, %v7616_v55 }
 0x401   : > { %v8541_v35 = vpop.permute.xlu1 %3324  ;;  %v3944_v24 = vpack.c.bf16 %v3664_v49, %v3528_v54  ;;  %v3945_v63 = vpack.c.bf16 %v3665_v56, %v3529_v28  ;;  %v3622_v5 = vrot.slane %v3614_v31, %v7623_v38  ;;  %v3629_v59 = vrot.slane %v3615_v32, %v7623_v38 }
 0x402   : > { %6671 = vmatmul.mubr.msk.bf16.vlgmr.msra.gmra.mxu0 %vm2868_vm2, %v3942_v43  ;;  %6677 = vmatmul.mubr.msk.bf16.vlgmr.msra.gmra.mxu1 %vm2868_vm2, %v3943_v6  ;;  %v3478_v2 = vcombine.low %v3413_v45, %v8556_v29  ;;  %v3479_v50 = vcombine.high %v3413_v45, %v8556_v29  ;;  %v3511_v18 = vcombine.high %v3445_v58, %v8546_v52 }
 0x403   : > { %6681 = vmatpush3.bf16.msra.mxu0 %v7877_v7  ;;  %6687 = vmatpush3.bf16.msra.mxu1 %v7875_v36  ;;  %v3510_v7 = vcombine.low %v3445_v58, %v8546_v52  ;;  %v3666_v1 = vcombine.low %v3622_v5, %v3654_v33  ;;  %v3667_v17 = vcombine.high %v3622_v5, %v3654_v33 }
 0x404   : > { %v8561_v19 = vpop.permute.xlu0 %3336  ;;  %6682 = vmatprep.mubr.msk.bf16.mxu0 %vm9485_vm0, %v9484_v51  ;;  %6688 = vmatprep.mubr.msk.bf16.mxu1 %vm9485_vm0, %v9484_v51  ;;  %v3486_v57 = vrot.slane %v3478_v2, %v7623_v38  ;;  %v3702_v43 = vcombine.low %v8523_v62, %v8535_v15  ;;  %v3525_v58 = vrot.slane %v3511_v18, %v7623_v38 }
 0x405   : > { %v8567_v8 = vpop.permute.xlu1 %3332  ;;  %6692 = vmatprep.subr.bf16.mxu0 %v9484_v51  ;;  %6698 = vmatprep.subr.bf16.mxu1 %v9484_v51  ;;  %v3518_v0 = vrot.slane %v3510_v7, %v7623_v38  ;;  %v3493_v42 = vrot.slane %v3479_v50, %v7623_v38  ;;  %v3668_v7 = vcombine.low %v3629_v59, %v3661_v30 }
 0x406   : > { %v3718_v46 = vcombine.low %v8541_v35, %v8567_v8  ;;  %v8633_v56 = vrot.slane %v3702_v43, %v7616_v55  ;;  %v8642_v2 = vrot.slane %v3670_v23, %v7616_v55 }
 0x407   : > { %v3530_v60 = vcombine.low %v3486_v57, %v3518_v0 }
 0x408   : > { %v8578_v36 = vpop.permute.xlu0 %3344  ;;  %v8621_v29 = vrot.slane %v3718_v46, %v7616_v55 }
 0x409   : > { %v8582_v61 = vpop.permute.xlu1 %3340  ;;  %v3946_v52 = vpack.c.bf16 %v3666_v1, %v3530_v60  ;;  %v3806_v41 = vcombine.low %v8561_v19, %v8578_v36 }
 0x40a   : > { %6683 = vmatmul.mubr.msk.bf16.vlgmr.msra.gmra.mxu0 %vm2868_vm2, %v3944_v24  ;;  %6689 = vmatmul.mubr.msk.bf16.vlgmr.msra.gmra.mxu1 %vm2868_vm2, %v3945_v63  ;;  %v3766_v33 = vcombine.low %v8633_v56, %v8621_v29  ;;  %v3532_v24 = vcombine.low %v3493_v42, %v3525_v58  ;;  %v3669_v63 = vcombine.high %v3629_v59, %v3661_v30 }
 0x40b   : > { %6693 = vmatpush3.bf16.msra.mxu0 %v8235_v4  ;;  %6699 = vmatpush3.bf16.msra.mxu1 %v8237_v20  ;;  %v3531_v4 = vcombine.high %v3486_v57, %v3518_v0  ;;  %v3686_v20 = vcombine.low %v8519_v13, %v8527_v53  ;;  %v3814_v0 = vrot.slane %v3806_v41, %v7616_v55 }
 0x40c   : > { %v8588_v3 = vpop.permute.xlu0 %3352  ;;  %6694 = vmatprep.mubr.msk.bf16.mxu0 %vm9485_vm0, %v9484_v51  ;;  %6700 = vmatprep.mubr.msk.bf16.mxu1 %vm9485_vm0, %v9484_v51  ;;  %v3533_v57 = vcombine.high %v3493_v42, %v3525_v58  ;;  %v3948_v1 = vpack.c.bf16 %v3668_v7, %v3532_v24  ;;  %v3774_v32 = vrot.slane %v3766_v33, %v7623_v38 }
 0x40d   : > { %v8594_v26 = vpop.permute.xlu1 %3348  ;;  %6704 = vmatprep.subr.bf16.mxu0 %v9484_v51  ;;  %6710 = vmatprep.subr.bf16.mxu1 %v9484_v51  ;;  %v3947_v11 = vpack.c.bf16 %v3667_v17, %v3531_v4  ;;  %v8630_v49 = vrot.slane %v3686_v20, %v7616_v55  ;;  %v3719_v30 = vcombine.high %v8541_v35, %v8567_v8 }
 0x40e   : > { %v3822_v37 = vcombine.low %v8582_v61, %v8594_v26  ;;  %v3949_v4 = vpack.c.bf16 %v3669_v63, %v3533_v57  ;;  %v3767_v59 = vcombine.high %v8633_v56, %v8621_v29  ;;  %v3823_v35 = vcombine.high %v8582_v61, %v8594_v26 }
 0x40f   : > { %v3734_v48 = vcombine.low %v8642_v2, %v8630_v49  ;;  %v3687_v7 = vcombine.high %v8519_v13, %v8527_v53  ;;  %v3735_v29 = vcombine.high %v8642_v2, %v8630_v49  ;;  %v3703_v61 = vcombine.high %v8523_v62, %v8535_v15 }
 0x410   : > { %v8609_v6 = vpop.permute.xlu0 %3360  ;;  %v3830_v54 = vrot.slane %v3822_v37, %v7616_v55  ;;  %v3807_v26 = vcombine.high %v8561_v19, %v8578_v36  ;;  %v3671_v13 = vcombine.high %v8510_v44, %v8515_v34  ;;  %v3733_v53 = vrot.slane %v3719_v30, %v7616_v55 }
 0x411   : > { %v8616_v12 = vpop.permute.xlu1 %3356  ;;  %v3838_v31 = vcombine.low %v8588_v3, %v8609_v6  ;;  %v3742_v43 = vrot.slane %v3734_v48, %v7623_v38  ;;  %v3781_v62 = vrot.slane %v3767_v59, %v7623_v38  ;;  %v3837_v15 = vrot.slane %v3823_v35, %v7616_v55 }
 0x412   : > { %6695 = vmatmul.mubr.msk.bf16.vlgmr.msra.gmra.mxu0 %vm2868_vm2, %v3946_v52  ;;  %6701 = vmatmul.mubr.msk.bf16.vlgmr.msra.gmra.mxu1 %vm2868_vm2, %v3947_v11  ;;  %v3870_v17 = vcombine.low %v3814_v0, %v3830_v54  ;;  %v3871_v8 = vcombine.high %v3814_v0, %v3830_v54  ;;  %v3701_v2 = vrot.slane %v3687_v7, %v7616_v55 }
 0x413   : > { %6706 = vmatprep.mubr.msk.bf16.mxu0 %vm9485_vm0, %v9484_v51  ;;  %6712 = vmatprep.mubr.msk.bf16.mxu1 %vm9485_vm0, %v9484_v51  ;;  %v3846_v46 = vrot.slane %v3838_v31, %v7616_v55  ;;  %v3798_v41 = vcombine.low %v3742_v43, %v3774_v32  ;;  %v3799_v56 = vcombine.high %v3742_v43, %v3774_v32 }
 0x414   : > { %v4241_v45 = vpop.permute.xlu0 %4240  ;;  %v3878_v52 = vrot.slane %v3870_v17, %v7623_v38  ;;  %v3885_v19 = vrot.slane %v3871_v8, %v7623_v38  ;;  %v3749_v33 = vrot.slane %v3735_v29, %v7623_v38  ;;  %v3717_v34 = vrot.slane %v3703_v61, %v7616_v55 }
 0x415   : > { %v3365_v28 = vpop.permute.xlu1 %3364  ;;  %6705 = vmatpush3.bf16.msra.mxu0 %v4241_v45  ;;  %v3821_v44 = vrot.slane %v3807_v26, %v7616_v55  ;;  %v3685_v0 = vrot.slane %v3671_v13, %v7616_v55 }
 0x416   : > { %v3854_v5 = vcombine.low %v8616_v12, %v3365_v28  ;;  %6716 = vmatprep.subr.bf16.mxu0 %v9484_v51  ;;  %v3855_v37 = vcombine.high %v8616_v12, %v3365_v28  ;;  %v3839_v12 = vcombine.high %v8588_v3, %v8609_v6  ;;  %v3800_v57 = vcombine.low %v3749_v33, %v3781_v62 }
 0x417   : > { %v3886_v48 = vcombine.low %v3821_v44, %v3837_v15  ;;  %v3750_v17 = vcombine.low %v3685_v0, %v3701_v2 }
 0x418   : > { %v3862_v50 = vrot.slane %v3854_v5, %v7616_v55  ;;  %v4335_v60 = vpop.permute.xlu0 %4334  ;;  %v3869_v3 = vrot.slane %v3855_v37, %v7616_v55  ;;  %v3853_v36 = vrot.slane %v3839_v12, %v7616_v55  ;;  %v3782_v5 = vcombine.low %v3717_v34, %v3733_v53 }
 0x419   : > { %v4288_v18 = vpop.permute.xlu1 %4287  ;;  %v3758_v30 = vrot.slane %v3750_v17, %v7623_v38  ;;  %v9503_v17 = vld [vmem:[#allocation8_spill] sm:$0xff] }
 0x41a   : > { %6711 = vmatpush3.bf16.msra.mxu1 %v4288_v18  ;;  %v3902_v20 = vcombine.low %v3846_v46, %v3862_v50  ;;  %6707 = vmatmul.mubr.msk.bf16.vlgmr.msra.gmra.mxu0 %vm2868_vm2, %v3948_v1  ;;  %v3903_v11 = vcombine.high %v3846_v46, %v3862_v50  ;;  %v3918_v24 = vcombine.low %v3853_v36, %v3869_v3 }
 0x41b   : > { %6717 = vmatpush3.bf16.msra.mxu0 %v4335_v60  ;;  %6718 = vmatprep.mubr.msk.bf16.mxu0 %vm9485_vm0, %v9484_v51  ;;  %v3801_v46 = vcombine.high %v3749_v33, %v3781_v62  ;;  %v3790_v32 = vrot.slane %v3782_v5, %v7623_v38  ;;  %v9500_v5 = vld [vmem:[#allocation5_spill] sm:$0xff] }
 0x41c   : > { %v3910_v23 = vrot.slane %v3902_v20, %v7623_v38  ;;  %6722 = vmatprep.subr.bf16.mxu1 %v9484_v51  ;;  %6728 = vmatprep.subr.bf16.mxu0 %v9484_v51  ;;  %v3917_v6 = vrot.slane %v3903_v11, %v7623_v38  ;;  %v4429_v31 = vpop.permute.xlu0 %4428  ;;  %v3926_v50 = vrot.slane %v3918_v24, %v7623_v38 }
 0x41d   : > { %6713 = vmatmul.mubr.msk.bf16.vlgmr.msra.gmra.mxu1 %vm2868_vm2, %v3949_v4  ;;  %v4382_v58 = vpop.permute.xlu1 %4381  ;;  %v3894_v4 = vrot.slane %v3886_v48, %v7623_v38  ;;  %v3783_v11 = vcombine.high %v3717_v34, %v3733_v53  ;;  %v3803_v35 = vcombine.high %v3758_v30, %v3790_v32 }
 0x41e   : > { %6724 = vmatprep.mubr.msk.bf16.mxu1 %vm9485_vm0, %v9484_v51  ;;  %v3934_v42 = vcombine.low %v3878_v52, %v3910_v23  ;;  %v3935_v45 = vcombine.high %v3878_v52, %v3910_v23  ;;  %6723 = vmatpush3.bf16.msra.mxu1 %v4382_v58  ;;  %v3936_v63 = vcombine.low %v3885_v19, %v3917_v6 }
 0x41f   : > { %6734 = vmatprep.subr.bf16.mxu1 %v9484_v51  ;;  %v3937_v1 = vcombine.high %v3885_v19, %v3917_v6  ;;  %v3919_v52 = vcombine.high %v3853_v36, %v3869_v3  ;;  %v3938_v37 = vcombine.low %v3894_v4, %v3926_v50  ;;  %v3802_v23 = vcombine.low %v3758_v30, %v3790_v32 }
 0x420   : > { %v3950_v54 = vpack.c.bf16 %v3934_v42, %v3798_v41  ;;  %v3951_v49 = vpack.c.bf16 %v3935_v45, %v3799_v56  ;;  %v3952_v18 = vpack.c.bf16 %v3936_v63, %v3800_v57  ;;  %v4523_v60 = vpop.permute.xlu0 %4522  ;;  %v3887_v58 = vcombine.high %v3821_v44, %v3837_v15  ;;  %v9497_v44 = vld [vmem:[#allocation6_spill] sm:$0xff] }
 0x421   : > { %v4476_v28 = vpop.permute.xlu1 %4475  ;;  %v3953_v20 = vpack.c.bf16 %v3937_v1, %v3801_v46  ;;  %v3939_v59 = vcombine.high %v3894_v4, %v3926_v50  ;;  %v3751_v41 = vcombine.high %v3685_v0, %v3701_v2  ;;  %v3933_v8 = vrot.slane %v3919_v52, %v7623_v38  ;;  %v9494_v2 = vld [vmem:[#allocation3_spill] sm:$0xff]  ;;  %v9502_v1 = vld [vmem:[#allocation18_spill] sm:$0xff] }
 0x422   : > { %6719 = vmatmul.mubr.msk.bf16.vlgmr.msra.gmra.mxu0 %vm2868_vm2, %v3950_v54  ;;  %v3954_v12 = vpack.c.bf16 %v3938_v37, %v3802_v23  ;;  %v3797_v45 = vrot.slane %v3783_v11, %v7623_v38  ;;  %v3901_v7 = vrot.slane %v3887_v58, %v7623_v38  ;;  %v9486_v19 = vpack.c.bf16 %v8315_v27, %v8243_v39  ;;  %v9499_v0 = vld [vmem:[#allocation15_spill] sm:$0xff]  ;;  %v9512_v11 = vld [vmem:[#allocation9_spill] sm:$0xff] }
 0x423   : > { %6729 = vmatpush3.bf16.msra.mxu0 %v4429_v31  ;;  %6730 = vmatprep.mubr.msk.bf16.mxu0 %vm9485_vm0, %v9484_v51  ;;  %v3955_v29 = vpack.c.bf16 %v3939_v59, %v3803_v35  ;;  %v3765_v26 = vrot.slane %v3751_v41, %v7623_v38  ;;  %v9488_v27 = vpack.c.bf16 %v8327_v16, %v8250_v14  ;;  %v9511_v37 = vld [vmem:[#allocation19_spill] sm:$0xff]  ;;  %v9514_v59 = vld [vmem:[#allocation22_spill] sm:$0xff]  ;;  %v9515_v41 = vld [vmem:[#allocation12_spill] sm:$0xff] }
 0x424   : > { %6740 = vmatprep.subr.bf16.mxu0 %v9484_v51  ;;  %v4617_v42 = vpop.permute.xlu0 %4616  ;;  %v3940_v56 = vcombine.low %v3901_v7, %v3933_v8  ;;  %v3941_v6 = vcombine.high %v3901_v7, %v3933_v8  ;;  %v9490_v16 = vpack.c.bf16 %v8341_v21, %v8255_v40  ;;  %v9493_v21 = vld [vmem:[#allocation14_spill] sm:$0xff]  ;;  %v9501_v57 = vpack.c.bf16 %v9499_v0, %v9500_v5  ;;  %v9517_v8 = vld [vmem:[#allocation21_spill] sm:$0xff] }
 0x425   : > { %6725 = vmatmul.mubr.msk.bf16.vlgmr.msra.gmra.mxu1 %vm2868_vm2, %v3951_v49  ;;  %v4570_v43 = vpop.permute.xlu1 %4569  ;;  %v3804_v3 = vcombine.low %v3765_v26, %v3797_v45  ;;  %v3805_v54 = vcombine.high %v3765_v26, %v3797_v45  ;;  %v9487_v49 = vpack.c.bf16 %v8330_v47, %v8240_v10  ;;  %v9489_v10 = vpack.c.bf16 %v8344_v22, %v8258_v25  ;;  %v9491_v25 = vld [vmem:[#allocation4_spill] sm:$0xff]  ;;  %v9520_v45 = vld [vmem:[#allocation23_spill] sm:$0xff]  ;;  %v9521_v7 = vld [vmem:[#allocation13_spill] sm:$0xff] }
 0x426   : > { %6735 = vmatpush3.bf16.msra.mxu1 %v4476_v28  ;;  %6736 = vmatprep.mubr.msk.bf16.mxu1 %vm9485_vm0, %v9484_v51  ;;  %v9492_v22 = vpack.c.bf16 %v8358_v9, %v9491_v25  ;;  %v9495_v33 = vpack.c.bf16 %v9493_v21, %v9494_v2  ;;  %v9496_v9 = vld [vmem:[#allocation16_spill] sm:$0xff]  ;;  %v9504_v46 = vpack.c.bf16 %v9502_v1, %v9503_v17 }
 0x427   : > { %6746 = vmatprep.subr.bf16.mxu1 %v9484_v51  ;;  %v3956_v31 = vpack.c.bf16 %v3940_v56, %v3804_v3  ;;  %v3957_v53 = vpack.c.bf16 %v3941_v6, %v3805_v54  ;;  %v9498_v24 = vpack.c.bf16 %v9496_v9, %v9497_v44  ;;  %v9513_v23 = vpack.c.bf16 %v9511_v37, %v9512_v11 }
 0x428   : > { %v5255_v13 = vpop.permute.xlu0 %5254  ;;  %v9516_v35 = vpack.c.bf16 %v9514_v59, %v9515_v41 }
 0x429   : > { %v4664_v61 = vpop.permute.xlu1 %4663 }
 0x42a   : > { %6731 = vmatmul.mubr.msk.bf16.vlgmr.msra.gmra.mxu0 %vm2868_vm2, %v3952_v18  ;;  %v9505_v18 = vld [vmem:[#allocation17_spill] sm:$0xff] }
 0x42b   : > { %6741 = vmatpush3.bf16.msra.mxu0 %v4523_v60  ;;  %6742 = vmatprep.mubr.msk.bf16.mxu0 %vm9485_vm0, %v9484_v51  ;;  %v9506_v60 = vld [vmem:[#allocation7_spill] sm:$0xff] }
 0x42c   : > { %6752 = vmatprep.subr.bf16.mxu0 %v9484_v51  ;;  %v5349_v15 = vpop.permute.xlu0 %5348  ;;  %v9507_v32 = vpack.c.bf16 %v9505_v18, %v9506_v60 }
 0x42d   : > { %6737 = vmatmul.mubr.msk.bf16.vlgmr.msra.gmra.mxu1 %vm2868_vm2, %v3953_v20  ;;  %v5302_v62 = vpop.permute.xlu1 %5301  ;;  %v9508_v20 = vld [vmem:[#allocation20_spill] sm:$0xff] }
 0x42e   : > { %6747 = vmatpush3.bf16.msra.mxu1 %v4570_v43  ;;  %6748 = vmatprep.mubr.msk.bf16.mxu1 %vm9485_vm0, %v9484_v51  ;;  %v9509_v43 = vld [vmem:[#allocation10_spill] sm:$0xff] }
 0x42f   : > { %6758 = vmatprep.subr.bf16.mxu1 %v9484_v51  ;;  %v9510_v30 = vpack.c.bf16 %v9508_v20, %v9509_v43 }
 0x430   : > { %v5443_v39 = vpop.permute.xlu0 %5442 }
 0x431   : > { %v5396_v36 = vpop.permute.xlu1 %5395 }
 0x432   : > { %6743 = vmatmul.mubr.msk.bf16.vlgmr.msra.gmra.mxu0 %vm2868_vm2, %v3954_v12  ;;  %v9518_v12 = vld [vmem:[#allocation11_spill] sm:$0xff] }
 0x433   : > { %6753 = vmatpush3.bf16.msra.mxu0 %v4617_v42  ;;  %6754 = vmatprep.mubr.msk.bf16.mxu0 %vm9485_vm0, %v9484_v51  ;;  %v9519_v42 = vpack.c.bf16 %v9517_v8, %v9518_v12 }
 0x434   : > { %6764 = vmatprep.subr.bf16.mxu0 %v9484_v51  ;;  %v5537_v14 = vpop.permute.xlu0 %5536 }
 0x435   : > { %6749 = vmatmul.mubr.msk.bf16.vlgmr.msra.gmra.mxu1 %vm2868_vm2, %v3955_v29  ;;  %v5490_v28 = vpop.permute.xlu1 %5489  ;;  %v9522_v29 = vpack.c.bf16 %v9520_v45, %v9521_v7 }
 0x436   : > { %6759 = vmatpush3.bf16.msra.mxu1 %v4664_v61  ;;  %6760 = vmatprep.mubr.msk.bf16.mxu1 %vm9485_vm0, %v9484_v51 }
 0x437   : > { %6770 = vmatprep.subr.bf16.mxu1 %v9484_v51 }
 0x438   : > { %v5631_v40 = vpop.permute.xlu0 %5630 }
 0x439   : > { %v5584_v47 = vpop.permute.xlu1 %5583 }
 0x43a   : > { %6755 = vmatmul.mubr.msk.bf16.vlgmr.msra.gmra.mxu0 %vm2868_vm2, %v3956_v31 }
 0x43b   : > { %6765 = vmatpush3.bf16.msra.mxu0 %v5255_v13  ;;  %6766 = vmatprep.mubr.msk.bf16.mxu0 %vm9485_vm0, %v9484_v51 }
 0x43c   : > { %6776 = vmatprep.subr.bf16.mxu0 %v9484_v51  ;;  %v5725_v63 = vpop.permute.xlu0 %5724 }
 0x43d   : > { %6761 = vmatmul.mubr.msk.bf16.vlgmr.msra.gmra.mxu1 %vm2868_vm2, %v3957_v53  ;;  %v5678_v34 = vpop.permute.xlu1 %5677 }
 0x43e   : > { %6771 = vmatpush3.bf16.msra.mxu1 %v5302_v62  ;;  %6772 = vmatprep.mubr.msk.bf16.mxu1 %vm9485_vm0, %v9484_v51 }
 0x43f   : > { %6782 = vmatprep.subr.bf16.mxu1 %v9484_v51 }
 0x440   : > { %v5819_v50 = vpop.permute.xlu0 %5818 }
 0x441   : > { %v5772_v48 = vpop.permute.xlu1 %5771 }
 0x442   : > { %6767 = vmatmul.mubr.msk.bf16.vlgmr.msra.gmra.mxu0 %vm2868_vm2, %v9486_v19 }
 0x443   : > { %6777 = vmatpush3.bf16.msra.mxu0 %v5349_v15  ;;  %6778 = vmatprep.mubr.msk.bf16.mxu0 %vm9485_vm0, %v9484_v51 }
 0x444   : > { %6788 = vmatprep.subr.bf16.mxu0 %v9484_v51  ;;  %v5913_v52 = vpop.permute.xlu0 %5912 }
 0x445   : > { %6773 = vmatmul.mubr.msk.bf16.vlgmr.msra.gmra.mxu1 %vm2868_vm2, %v9487_v49  ;;  %v5866_v4 = vpop.permute.xlu1 %5865 }
 0x446   : > { %6783 = vmatpush3.bf16.msra.mxu1 %v5396_v36  ;;  %6784 = vmatprep.mubr.msk.bf16.mxu1 %vm9485_vm0, %v9484_v51 }
 0x447   : > { %6794 = vmatprep.subr.bf16.mxu1 %v9484_v51 }
 0x449   : > { %v5960_v58 = vpop.permute.xlu1 %5959 }
 0x44a   : > { %6779 = vmatmul.mubr.msk.bf16.vlgmr.msra.gmra.mxu0 %vm2868_vm2, %v9488_v27 }
 0x44b   : > { %6789 = vmatpush3.bf16.msra.mxu0 %v5443_v39  ;;  %6790 = vmatprep.mubr.msk.bf16.mxu0 %vm9485_vm0, %v9484_v51 }
 0x44c   : > { %6800 = vmatprep.subr.bf16.mxu0 %v9484_v51 }
 0x44d   : > { %6785 = vmatmul.mubr.msk.bf16.vlgmr.msra.gmra.mxu1 %vm2868_vm2, %v9489_v10 }
 0x44e   : > { %6795 = vmatpush3.bf16.msra.mxu1 %v5490_v28  ;;  %6796 = vmatprep.mubr.msk.bf16.mxu1 %vm9485_vm0, %v9484_v51 }
 0x44f   : > { %6806 = vmatprep.subr.bf16.mxu1 %v9484_v51 }
 0x452   : > { %6791 = vmatmul.mubr.msk.bf16.vlgmr.msra.gmra.mxu0 %vm2868_vm2, %v9490_v16  ;;  %v9091_v16 = vld [vmem:[%s9007_s8 + $0xa0] sm:$0xff] }
 0x453   : > { %6801 = vmatpush3.bf16.msra.mxu0 %v5537_v14  ;;  %6802 = vmatprep.mubr.msk.bf16.mxu0 %vm9485_vm0, %v9484_v51  ;;  %9532 = vst [vmem:[#allocation17_spill] sm:$0xff] %v9091_v16 }
 0x454   : > { %6812 = vmatprep.subr.bf16.mxu0 %v9484_v51 }
 0x455   : > { %6797 = vmatmul.mubr.msk.bf16.vlgmr.msra.gmra.mxu1 %vm2868_vm2, %v9492_v22 }
 0x456   : > { %6807 = vmatpush3.bf16.msra.mxu1 %v5584_v47  ;;  %6808 = vmatprep.mubr.msk.bf16.mxu1 %vm9485_vm0, %v9484_v51  ;;  %v9088_v47 = vld [vmem:[%s9007_s8 + $0x98] sm:$0xff] }
 0x457   : > { %6818 = vmatprep.subr.bf16.mxu1 %v9484_v51  ;;  %9531 = vst [vmem:[#allocation8_spill] sm:$0xff] %v9088_v47 }
 0x45a   : > { %6803 = vmatmul.mubr.msk.bf16.vlgmr.msra.gmra.mxu0 %vm2868_vm2, %v9495_v33 }
 0x45b   : > { %6813 = vmatpush3.bf16.msra.mxu0 %v5631_v40  ;;  %6814 = vmatprep.mubr.msk.bf16.mxu0 %vm9485_vm0, %v9484_v51 }
 0x45c   : > { %6824 = vmatprep.subr.bf16.mxu0 %v9484_v51 }
 0x45d   : > { %6809 = vmatmul.mubr.msk.bf16.vlgmr.msra.gmra.mxu1 %vm2868_vm2, %v9498_v24 }
 0x45e   : > { %6819 = vmatpush3.bf16.msra.mxu1 %v5678_v34  ;;  %6820 = vmatprep.mubr.msk.bf16.mxu1 %vm9485_vm0, %v9484_v51 }
 0x45f   : > { %6830 = vmatprep.subr.bf16.mxu1 %v9484_v51 }
 0x462   : > { %6815 = vmatmul.mubr.msk.bf16.vlgmr.msra.gmra.mxu0 %vm2868_vm2, %v9501_v57 }
 0x463   : > { %6825 = vmatpush3.bf16.msra.mxu0 %v5725_v63  ;;  %6826 = vmatprep.mubr.msk.bf16.mxu0 %vm9485_vm0, %v9484_v51 }
 0x464   : > { %6836 = vmatprep.subr.bf16.mxu0 %v9484_v51 }
 0x465   : > { %6821 = vmatmul.mubr.msk.bf16.vlgmr.msra.gmra.mxu1 %vm2868_vm2, %v9504_v46 }
 0x466   : > { %6831 = vmatpush3.bf16.msra.mxu1 %v5772_v48  ;;  %6832 = vmatprep.mubr.msk.bf16.mxu1 %vm9485_vm0, %v9484_v51 }
 0x467   : > { %6842 = vmatprep.subr.bf16.mxu1 %v9484_v51 }
 0x46a   : > { %6827 = vmatmul.mubr.msk.bf16.vlgmr.msra.gmra.mxu0 %vm2868_vm2, %v9507_v32 }
 0x46b   : > { %6837 = vmatpush3.bf16.msra.mxu0 %v5819_v50  ;;  %6838 = vmatprep.mubr.msk.bf16.mxu0 %vm9485_vm0, %v9484_v51 }
 0x46c   : > { %6848 = vmatprep.subr.bf16.mxu0 %v9484_v51 }
 0x46d   : > { %6833 = vmatmul.mubr.msk.bf16.vlgmr.msra.gmra.mxu1 %vm2868_vm2, %v9510_v30 }
 0x46e   : > { %6843 = vmatpush3.bf16.msra.mxu1 %v5866_v4  ;;  %6844 = vmatprep.mubr.msk.bf16.mxu1 %vm9485_vm0, %v9484_v51 }
 0x46f   : > { %6854 = vmatprep.subr.bf16.mxu1 %v9484_v51 }
 0x472   : > { %6839 = vmatmul.mubr.msk.bf16.vlgmr.msra.gmra.mxu0 %vm2868_vm2, %v9513_v23 }
 0x473   : > { %6849 = vmatpush3.bf16.msra.mxu0 %v5913_v52  ;;  %6850 = vmatprep.mubr.msk.bf16.mxu0 %vm9485_vm0, %v9484_v51 }
 0x475   : > { %6845 = vmatmul.mubr.msk.bf16.vlgmr.msra.gmra.mxu1 %vm2868_vm2, %v9516_v35 }
 0x476   : > { %6855 = vmatpush3.bf16.msra.mxu1 %v5960_v58  ;;  %6856 = vmatprep.mubr.msk.bf16.mxu1 %vm9485_vm0, %v9484_v51 }
 0x47a   : > { %6851 = vmatmul.mubr.msk.bf16.vlgmr.msra.gmra.mxu0 %vm2868_vm2, %v9519_v42 }
 0x47d   : > { %6857 = vmatmul.mubr.msk.bf16.vlgmr.msra.gmra.mxu1 %vm2868_vm2, %v9522_v29 }
 0x4c2   : > { %v8843_v61 = vpop.f32.mrf.mxu0  ;;  %v8845_v26 = vpop.f32.mrf.mxu1 }
 0x4c4   : > { %v6672_v56 = vpop.f32.mrf.mxu0  ;;  %v6678_v3 = vpop.f32.mrf.mxu1 }
 0x4c6   : > { %v4001_v6 = vpop.f32.mrf.mxu0  ;;  %v4048_v54 = vpop.f32.mrf.mxu1 }
 0x4c8   : > { %v6673_v31 = vpop.f32.mrf.mxu0  ;;  %v6679_v51 = vpop.f32.mrf.mxu1 }
 0x4ca   : > { %v8847_v13 = vpop.f32.mrf.mxu0  ;;  %v8851_v62 = vpop.f32.mrf.mxu1 }
 0x4cb   : > { %v4711_v53 = vcombine.high %v8843_v61, %v8847_v13  ;;  %v4727_v15 = vcombine.high %v8845_v26, %v8851_v62 }
 0x4cc   : > { %v6684_v19 = vpop.f32.mrf.mxu0  ;;  %v6690_v49 = vpop.f32.mrf.mxu1 }
 0x4cd   : > { %v8856_v36 = vrot.slane %v4711_v53, %v7616_v55  ;;  %v8859_v39 = vrot.slane %v4727_v15, %v7616_v55 }
 0x4ce   : > { %v4095_v27 = vpop.f32.mrf.mxu0  ;;  %v4142_v14 = vpop.f32.mrf.mxu1 }
 0x4cf   : > { %v4982_v28 = vcombine.low %v4001_v6, %v4095_v27  ;;  %v4983_v10 = vcombine.high %v4001_v6, %v4095_v27  ;;  %v4998_v21 = vcombine.low %v4048_v54, %v4142_v14  ;;  %v4999_v2 = vcombine.high %v4048_v54, %v4142_v14 }
 0x4d0   : > { %v6685_v25 = vpop.f32.mrf.mxu0  ;;  %v6691_v33 = vpop.f32.mrf.mxu1 }
 0x4d1   : > { %v4990_v22 = vrot.slane %v4982_v28, %v7616_v55  ;;  %v4997_v40 = vrot.slane %v4983_v10, %v7616_v55  ;;  %v5006_v9 = vrot.slane %v4998_v21, %v7616_v55  ;;  %v5013_v44 = vrot.slane %v4999_v2, %v7616_v55  ;;  %v9079_v33 = vld [vmem:[%s9007_s8 + $0x80] sm:$0xff]  ;;  %v9082_v2 = vld [vmem:[%s9007_s8 + $0x90] sm:$0xff]  ;;  %v9085_v21 = vld [vmem:[%s9007_s8 + $0x88] sm:$0xff] }
 0x4d2   : > { %v8867_v34 = vpop.f32.mrf.mxu0  ;;  %v8871_v24 = vpop.f32.mrf.mxu1 }
 0x4d3   : > { %v5046_v0 = vcombine.low %v4990_v22, %v5006_v9  ;;  %v5047_v5 = vcombine.high %v4990_v22, %v5006_v9  ;;  %v5062_v57 = vcombine.low %v4997_v40, %v5013_v44  ;;  %v5063_v48 = vcombine.high %v4997_v40, %v5013_v44  ;;  %v9073_v44 = vld [vmem:[%s9007_s8 + $0x68] sm:$0xff]  ;;  %v9076_v9 = vld [vmem:[%s9007_s8 + $0x78] sm:$0xff] }
 0x4d4   : > { %v6696_v63 = vpop.f32.mrf.mxu0  ;;  %v6702_v1 = vpop.f32.mrf.mxu1 }
 0x4d5   : > { %v8888_v51 = vrot.slane %v5046_v0, %v7623_v38  ;;  %v8891_v53 = vrot.slane %v5047_v5, %v7623_v38  ;;  %v8908_v14 = vrot.slane %v5062_v57, %v7623_v38  ;;  %v8911_v25 = vrot.slane %v5063_v48, %v7623_v38  ;;  %v9058_v57 = vld [vmem:[%s9007_s8 + $0x50] sm:$0xff]  ;;  %v9067_v63 = vld [vmem:[%s9007_s8 + $0x60] sm:$0xff] }
 0x4d6   : > { %v4189_v17 = vpop.f32.mrf.mxu0  ;;  %v4236_v46 = vpop.f32.mrf.mxu1 }
 0x4d7   : > { %9523 = vst [vmem:[#allocation4_spill] sm:$0xff] %v8891_v53  ;;  %9527 = vst [vmem:[#allocation6_spill] sm:$0xff] %v8908_v14 }
 0x4d8   : > { %v6697_v50 = vpop.f32.mrf.mxu0  ;;  %v6703_v18 = vpop.f32.mrf.mxu1  ;;  %9528 = vst [vmem:[#allocation15_spill] sm:$0xff] %v8911_v25  ;;  %v9097_v25 = vld [vmem:[%s9007_s8 + $0xa8] sm:$0xff] }
 0x4d9   : > { %9534 = vst [vmem:[#allocation20_spill] sm:$0xff] %v9097_v25  ;;  %v9116_v25 = vld [vmem:[%s9007_s8 + $0xd8] sm:$0xff] }
 0x4da   : > { %v8873_v60 = vpop.f32.mrf.mxu0  ;;  %9539 = vst [vmem:[#allocation12_spill] sm:$0xff] %v9116_v25  ;;  %v9138_v25 = vld [vmem:[%s9007_s8 + $0xf0] sm:$0xff] }
 0x4dc   : > { %v6708_v32 = vpop.f32.mrf.mxu0 }
 0x4dd   : > { %v8875_v4 = vpop.f32.mrf.mxu1 }
 0x4de   : > { %v4283_v20 = vpop.f32.mrf.mxu0  ;;  %v4758_v32 = vcombine.low %v8871_v24, %v8875_v4 }
 0x4df   : > { %v6714_v43 = vpop.f32.mrf.mxu1  ;;  %v5015_v30 = vcombine.high %v4189_v17, %v4283_v20  ;;  %v5014_v52 = vcombine.low %v4189_v17, %v4283_v20 }
 0x4e0   : > { %v6709_v37 = vpop.f32.mrf.mxu0 }
 0x4e1   : > { %v4330_v11 = vpop.f32.mrf.mxu1  ;;  %v5022_v35 = vrot.slane %v5014_v52, %v7616_v55  ;;  %v5029_v8 = vrot.slane %v5015_v30, %v7616_v55  ;;  %v4710_v52 = vcombine.low %v8843_v61, %v8847_v13  ;;  %v4726_v37 = vcombine.low %v8845_v26, %v8851_v62  ;;  %v9055_v26 = vld [vmem:[%s9007_s8 + $0x40] sm:$0xff]  ;;  %v9070_v61 = vld [vmem:[%s9007_s8 + $0x70] sm:$0xff] }
 0x4e2   : > { %v5030_v23 = vcombine.low %v4236_v46, %v4330_v11  ;;  %v5031_v58 = vcombine.high %v4236_v46, %v4330_v11  ;;  %v8877_v59 = vpop.f32.mrf.mxu0  ;;  %v4742_v11 = vcombine.low %v8867_v34, %v8873_v60 }
 0x4e3   : > { %v6715_v41 = vpop.f32.mrf.mxu1 }
 0x4e4   : > { %v5038_v12 = vrot.slane %v5030_v23, %v7616_v55  ;;  %v5045_v42 = vrot.slane %v5031_v58, %v7616_v55  ;;  %v6720_v45 = vpop.f32.mrf.mxu0 }
 0x4e5   : > { %v8883_v7 = vpop.f32.mrf.mxu1  ;;  %v4750_v45 = vrot.slane %v4742_v11, %v7616_v55 }
 0x4e6   : > { %v5078_v29 = vcombine.low %v5022_v35, %v5038_v12  ;;  %v5079_v56 = vcombine.high %v5022_v35, %v5038_v12  ;;  %v5094_v3 = vcombine.low %v5029_v8, %v5045_v42  ;;  %v5095_v6 = vcombine.high %v5029_v8, %v5045_v42  ;;  %v8885_v54 = vpop.f32.mrf.mxu0 }
 0x4e7   : > { %v6726_v31 = vpop.f32.mrf.mxu1  ;;  %v4766_v8 = vrot.slane %v4758_v32, %v7616_v55  ;;  %v4718_v12 = vrot.slane %v4710_v52, %v7616_v55  ;;  %v4734_v42 = vrot.slane %v4726_v37, %v7616_v55 }
 0x4e8   : > { %v6721_v15 = vpop.f32.mrf.mxu0  ;;  %v8896_v49 = vrot.slane %v5078_v29, %v7623_v38  ;;  %v8899_v27 = vrot.slane %v5079_v56, %v7623_v38  ;;  %v8902_v28 = vrot.slane %v5094_v3, %v7623_v38  ;;  %v8905_v10 = vrot.slane %v5095_v6, %v7623_v38 }
 0x4e9   : > { %v8893_v19 = vpop.f32.mrf.mxu1  ;;  %v4806_v6 = vcombine.low %v4750_v45, %v4766_v8 }
 0x4ea   : > { %9524 = vst [vmem:[#allocation14_spill] sm:$0xff] %v8899_v27  ;;  %9525 = vst [vmem:[#allocation3_spill] sm:$0xff] %v8902_v28  ;;  %v8913_v22 = vpop.f32.mrf.mxu0  ;;  %v9106_v28 = vld [vmem:[%s9007_s8 + $0xd0] sm:$0xff] }
 0x4eb   : > { %9526 = vst [vmem:[#allocation16_spill] sm:$0xff] %v8905_v10  ;;  %v6727_v40 = vpop.f32.mrf.mxu1  ;;  %v4846_v31 = vcombine.low %v8877_v59, %v8913_v22  ;;  %v4814_v52 = vrot.slane %v4806_v6, %v7623_v38  ;;  %v4775_v6 = vcombine.high %v4718_v12, %v4734_v42  ;;  %v9094_v10 = vld [vmem:[%s9007_s8 + $0xb0] sm:$0xff]  ;;  %9537 = vst [vmem:[#allocation9_spill] sm:$0xff] %v9106_v28  ;;  %v9144_v28 = vld [vmem:[%s9007_s8 + $0xf8] sm:$0xff] }
 0x4ec   : > { %v6732_v0 = vpop.f32.mrf.mxu0  ;;  %9533 = vst [vmem:[#allocation7_spill] sm:$0xff] %v9094_v10  ;;  %v9113_v10 = vld [vmem:[%s9007_s8 + $0xc8] sm:$0xff] }
 0x4ed   : > { %v8927_v5 = vpop.f32.mrf.mxu1  ;;  %v4774_v0 = vcombine.low %v4718_v12, %v4734_v42  ;;  %v9017_v12 = vstv %s304_s30  ;;  %9538 = vst [vmem:[#allocation22_spill] sm:$0xff] %v9113_v10  ;;  %v9141_v10 = vld [vmem:[%s9007_s8 + $0xe8] sm:$0xff] }
 0x4ee   : > { %v8933_v1 = vpop.f32.mrf.mxu0  ;;  %v4862_v29 = vcombine.low %v8883_v7, %v8927_v5 }
 0x4ef   : > { %v6738_v17 = vpop.f32.mrf.mxu1  ;;  %v5119_v46 = vcombine.high %v8885_v54, %v8933_v1 }
 0x4f0   : > { %v6733_v50 = vpop.f32.mrf.mxu0  ;;  %v8978_v17 = vrot.slane %v4862_v29, %v7616_v55 }
 0x4f1   : > { %v8937_v18 = vpop.f32.mrf.mxu1  ;;  %v8952_v23 = vrot.slane %v5119_v46, %v7616_v55 }
 0x4f2   : > { %v5135_v20 = vcombine.high %v8893_v19, %v8937_v18  ;;  %v8943_v43 = vpop.f32.mrf.mxu0 }
 0x4f3   : > { %v6739_v30 = vpop.f32.mrf.mxu1  ;;  %9529 = vst [vmem:[#allocation5_spill] sm:$0xff] %v8952_v23  ;;  %v9103_v23 = vld [vmem:[%s9007_s8 + $0xc0] sm:$0xff] }
 0x4f4   : > { %v8955_v58 = vrot.slane %v5135_v20, %v7616_v55  ;;  %v6744_v41 = vpop.f32.mrf.mxu0  ;;  %v8986_v20 = vrot.slane %v4846_v31, %v7616_v55  ;;  %v4759_v31 = vcombine.high %v8871_v24, %v8875_v4  ;;  %v369_v24 = vld [vmem:[%s9007_s8] sm:$0xff]  ;;  %9536 = vst [vmem:[#allocation19_spill] sm:$0xff] %v9103_v23 }
 0x4f5   : > { %v8957_v35 = vpop.f32.mrf.mxu1 }
 0x4f6   : > { %9530 = vst [vmem:[#allocation18_spill] sm:$0xff] %v8955_v58  ;;  %v8964_v13 = vpop.f32.mrf.mxu0  ;;  %v4910_v41 = vcombine.low %v8986_v20, %v8978_v17  ;;  %v9100_v58 = vld [vmem:[%s9007_s8 + $0xb8] sm:$0xff] }
 0x4f7   : > { %v6750_v62 = vpop.f32.mrf.mxu1  ;;  %9535 = vst [vmem:[#allocation10_spill] sm:$0xff] %v9100_v58  ;;  %v9119_v58 = vld [vmem:[%s9007_s8 + $0xe0] sm:$0xff] }
 0x4f8   : > { %v6745_v56 = vpop.f32.mrf.mxu0  ;;  %9540 = vst [vmem:[#allocation21_spill] sm:$0xff] %v9119_v58 }
 0x4f9   : > { %v8971_v3 = vpop.f32.mrf.mxu1  ;;  %v4782_v56 = vrot.slane %v4774_v0, %v7623_v38 }
 0x4fa   : > { %v8975_v15 = vpop.f32.mrf.mxu0 }
 0x4fb   : > { %v6751_v40 = vpop.f32.mrf.mxu1  ;;  %v4878_v46 = vcombine.low %v8943_v43, %v8975_v15  ;;  %v4838_v0 = vcombine.low %v4782_v56, %v4814_v52 }
 0x4fc   : > { %v6756_v50 = vpop.f32.mrf.mxu0  ;;  %v4807_v40 = vcombine.high %v4750_v45, %v4766_v8  ;;  %v4839_v8 = vcombine.high %v4782_v56, %v4814_v52  ;;  %v9021_v45 = vrot.slane %v4910_v41, %v7623_v38  ;;  %v9031_v41 = vld [vmem:[%s9007_s8 + $0x8] sm:$0xff]  ;;  %v9034_v56 = vld [vmem:[%s9007_s8 + $0x18] sm:$0xff] }
 0x4fd   : > { %v8982_v32 = vpop.f32.mrf.mxu1  ;;  %v8996_v62 = vrot.slane %v4878_v46, %v7616_v55 }
 0x4fe   : > { %v4894_v30 = vcombine.low %v8957_v35, %v8982_v32  ;;  %v8991_v37 = vpop.f32.mrf.mxu0 }
 0x4ff   : > { %v6762_v11 = vpop.f32.mrf.mxu1 }
 0x500   : > { %v8999_v29 = vrot.slane %v4894_v30, %v7616_v55  ;;  %v6757_v50 = vpop.f32.mrf.mxu0  ;;  %v4743_v11 = vcombine.high %v8867_v34, %v8873_v60  ;;  %v9025_v60 = vrot.slane %v4759_v31, %v7616_v55  ;;  %v9040_v31 = vrot.slane %v4775_v6, %v7623_v38  ;;  %v9061_v6 = vld [vmem:[%s9007_s8 + $0x48] sm:$0xff] }
 0x501   : > { %v9011_v46 = vpop.f32.mrf.mxu1  ;;  %v4895_v50 = vcombine.high %v8957_v35, %v8982_v32  ;;  %v9043_v35 = vrot.slane %v4807_v40, %v7623_v38  ;;  %v9046_v32 = vld [vmem:[%s9007_s8 + $0x30] sm:$0xff]  ;;  %v9064_v40 = vld [vmem:[%s9007_s8 + $0x58] sm:$0xff] }
 0x502   : > { %v4942_v30 = vcombine.low %v8996_v62, %v8999_v29  ;;  %v5294_v48 = vpop.f32.mrf.mxu0  ;;  %v4943_v14 = vcombine.high %v8996_v62, %v8999_v29  ;;  %v9129_v62 = vrot.slane %v4743_v11, %v7616_v55  ;;  %v4863_v29 = vcombine.high %v8883_v7, %v8927_v5 }
 0x503   : > { %v6763_v42 = vpop.f32.mrf.mxu1  ;;  %v5295_v4 = vadd.f32 %v5294_v48, %v4838_v0  ;;  %v371_v48 = vld [vmem:[%s9007_s8 + $0x10] sm:$0xff]  ;;  %v9049_v0 = vld [vmem:[%s9007_s8 + $0x28] sm:$0xff] }
 0x504   : > { %v4950_v34 = vrot.slane %v4942_v30, %v7623_v38  ;;  %v6768_v42 = vpop.f32.mrf.mxu0  ;;  %v9037_v30 = vld [vmem:[%s9007_s8 + $0x20] sm:$0xff]  ;;  %v4822_v5 = vcombine.low %v9129_v62, %v9025_v60 }
 0x505   : > { %v5341_v52 = vpop.f32.mrf.mxu1  ;;  %v9052_v42 = vld [vmem:[%s9007_s8 + $0x38] sm:$0xff]  ;;  %v6007_v47 = vmul.f32 %v9017_v12, %v5295_v4  ;;  %v4911_v4 = vcombine.high %v8986_v20, %v8978_v17 }
 0x506   : > { %v5342_v27 = vadd.f32 %v5341_v52, %v4839_v8  ;;  %v4974_v16 = vcombine.low %v9021_v45, %v4950_v34  ;;  %v4879_v8 = vcombine.high %v8943_v43, %v8975_v15  ;;  %v5297_v52 = vpop.f32.mrf.mxu0  ;;  %v4975_v7 = vcombine.high %v9021_v45, %v4950_v34 }
 0x507   : > { %v6774_v58 = vpop.f32.mrf.mxu1  ;;  %v6039_v11 = vadd.f32 %v6007_v47, %v369_v24  ;;  %v4847_v43 = vcombine.high %v8877_v59, %v8913_v22  ;;  %v4840_v47 = vcombine.low %v9040_v31, %v9043_v35  ;;  %v4957_v24 = vrot.slane %v4943_v14, %v7623_v38 }
 0x508   : > { %v6009_v23 = vmul.f32 %v9017_v12, %v5342_v27  ;;  %v5298_v53 = vadd.f32 %v5297_v52, %v4974_v16  ;;  %v9153_v58 = vrot.slane %v4895_v50, %v7616_v55  ;;  %v6769_v15 = vpop.f32.mrf.mxu0  ;;  %v9162_v45 = vrot.slane %v4863_v29, %v7616_v55 }
 0x509   : > { %v5344_v17 = vpop.f32.mrf.mxu1  ;;  %6072 = vst.msk [vmem:[%s9126_s11] sm:$0xff] %vm6071_vm4, %v6039_v11  ;;  %v9165_v59 = vrot.slane %v4879_v8, %v7616_v55  ;;  %v4841_v50 = vcombine.high %v9040_v31, %v9043_v35  ;;  %v4925_v14 = vrot.slane %v4911_v4, %v7623_v38  ;;  %v9175_v29 = vrot.slane %v4847_v43, %v7616_v55 }
 0x50a   : > { %v6041_v20 = vadd.f32 %v6009_v23, %v371_v48  ;;  %v6008_v16 = vmul.f32 %v9017_v12, %v5298_v53  ;;  %v5345_v27 = vadd.f32 %v5344_v17, %v4975_v7  ;;  %v5388_v22 = vpop.f32.mrf.mxu0  ;;  %v4830_v31 = vrot.slane %v4822_v5, %v7623_v38 }
 0x50b   : > { %v6775_v34 = vpop.f32.mrf.mxu1  ;;  %v5389_v48 = vadd.f32 %v5388_v22, %v4840_v47  ;;  %v4958_v8 = vcombine.low %v9165_v59, %v9153_v58  ;;  %v4976_v15 = vcombine.low %v4925_v14, %v4957_v24  ;;  %v4926_v4 = vcombine.low %v9175_v29, %v9162_v45 }
 0x50c   : > { %v6040_v23 = vadd.f32 %v6008_v16, %v9031_v41  ;;  %v6010_v53 = vmul.f32 %v9017_v12, %v5345_v27  ;;  %6074 = vst.msk [vmem:[%s9126_s11 + $0x10] sm:$0xff] %vm6071_vm4, %v6041_v20  ;;  %v6780_v52 = vpop.f32.mrf.mxu0  ;;  %v9541_v47 = vcombine.low %v8856_v36, %v8859_v39  ;;  %v4977_v27 = vcombine.high %v4925_v14, %v4957_v24 }
 0x50d   : > { %v5435_v11 = vpop.f32.mrf.mxu1  ;;  %v6011_v35 = vmul.f32 %v9017_v12, %v5389_v48  ;;  %v4823_v22 = vcombine.high %v9129_v62, %v9025_v60 }
 0x50e   : > { %v6042_v41 = vadd.f32 %v6010_v53, %v9034_v56  ;;  %v5436_v7 = vadd.f32 %v5435_v11, %v4841_v50  ;;  %6073 = vst.msk [vmem:[%s9126_s11 + $0x8] sm:$0xff] %vm6071_vm4, %v6040_v23  ;;  %v5391_v43 = vpop.f32.mrf.mxu0  ;;  %v4798_v20 = vrot.slane %v9541_v47, %v7623_v38 }
 0x50f   : > { %v6786_v17 = vpop.f32.mrf.mxu1  ;;  %v6043_v5 = vadd.f32 %v6011_v35, %v9037_v30  ;;  %v5392_v16 = vadd.f32 %v5391_v43, %v4976_v15  ;;  %v4966_v30 = vrot.slane %v4958_v8, %v7623_v38  ;;  %v4934_v35 = vrot.slane %v4926_v4, %v7623_v38 }
 0x510   : > { %v6013_v56 = vmul.f32 %v9017_v12, %v5436_v7  ;;  %6075 = vst.msk [vmem:[%s9126_s11 + $0x18] sm:$0xff] %vm6071_vm4, %v6042_v41  ;;  %v6781_v34 = vpop.f32.mrf.mxu0  ;;  %v4842_v23 = vcombine.low %v4798_v20, %v4830_v31  ;;  %v4843_v14 = vcombine.high %v4798_v20, %v4830_v31  ;;  %v5166_v8 = vcombine.low %v8971_v3, %v9011_v46 }
 0x511   : > { %v5438_v50 = vpop.f32.mrf.mxu1  ;;  %v6012_v48 = vmul.f32 %v9017_v12, %v5392_v16  ;;  %6076 = vst.msk [vmem:[%s9126_s11 + $0x20] sm:$0xff] %vm6071_vm4, %v6043_v5  ;;  %v4837_v43 = vrot.slane %v4823_v22, %v7623_v38  ;;  %v4978_v47 = vcombine.low %v4934_v35, %v4966_v30  ;;  %v4927_v4 = vcombine.high %v9175_v29, %v9162_v45 }
 0x512   : > { %v6045_v53 = vadd.f32 %v6013_v56, %v9046_v32  ;;  %v5439_v52 = vadd.f32 %v5438_v50, %v4977_v27  ;;  %v5482_v11 = vpop.f32.mrf.mxu0  ;;  %v4959_v32 = vcombine.high %v9165_v59, %v9153_v58  ;;  %v5134_v58 = vcombine.low %v8893_v19, %v8937_v18 }
 0x513   : > { %v6787_v24 = vpop.f32.mrf.mxu1  ;;  %v6044_v41 = vadd.f32 %v6012_v48, %v9049_v0  ;;  %v5483_v62 = vadd.f32 %v5482_v11, %v4842_v23  ;;  %v5150_v59 = vcombine.low %v8964_v13, %v8991_v37  ;;  %v4979_v45 = vcombine.high %v4934_v35, %v4966_v30 }
 0x514   : > { %v6014_v60 = vmul.f32 %v9017_v12, %v5439_v52  ;;  %6078 = vst.msk [vmem:[%s9126_s11 + $0x30] sm:$0xff] %vm6071_vm4, %v6045_v53  ;;  %v6792_v7 = vpop.f32.mrf.mxu0  ;;  %v5118_v19 = vcombine.low %v8885_v54, %v8933_v1  ;;  %v9232_v18 = vrot.slane %v5166_v8, %v7616_v55  ;;  %v4973_v23 = vrot.slane %v4959_v32, %v7623_v38 }
 0x515   : > { %v5529_v15 = vpop.f32.mrf.mxu1  ;;  %v6015_v31 = vmul.f32 %v9017_v12, %v5483_v62  ;;  %6077 = vst.msk [vmem:[%s9126_s11 + $0x28] sm:$0xff] %vm6071_vm4, %v6044_v41  ;;  %v9240_v53 = vrot.slane %v5134_v58, %v7616_v55  ;;  %v9243_v54 = vrot.slane %v5150_v59, %v7616_v55  ;;  %v4941_v24 = vrot.slane %v4927_v4, %v7623_v38 }
 0x516   : > { %v6046_v0 = vadd.f32 %v6014_v60, %v9052_v42  ;;  %v5530_v17 = vadd.f32 %v5529_v15, %v4843_v14  ;;  %v5485_v20 = vpop.f32.mrf.mxu0  ;;  %v9542_v42 = vcombine.high %v8856_v36, %v8859_v39  ;;  %v9251_v14 = vrot.slane %v5118_v19, %v7616_v55 }
 0x517   : > { %v6798_v5 = vpop.f32.mrf.mxu1  ;;  %v6047_v16 = vadd.f32 %v6015_v31, %v9055_v26  ;;  %v5486_v22 = vadd.f32 %v5485_v20, %v4978_v47  ;;  %v5214_v41 = vcombine.low %v9243_v54, %v9232_v18  ;;  %v4980_v8 = vcombine.low %v4941_v24, %v4973_v23 }
 0x518   : > { %v4805_v56 = vrot.slane %v9542_v42, %v7623_v38  ;;  %v6017_v27 = vmul.f32 %v9017_v12, %v5530_v17  ;;  %6079 = vst.msk [vmem:[%s9126_s11 + $0x38] sm:$0xff] %vm6071_vm4, %v6046_v0  ;;  %v6793_v29 = vpop.f32.mrf.mxu0  ;;  %v5182_v7 = vcombine.low %v9251_v14, %v9240_v53  ;;  %v4981_v47 = vcombine.high %v4941_v24, %v4973_v23 }
 0x519   : > { %v5532_v34 = vpop.f32.mrf.mxu1  ;;  %v6016_v26 = vmul.f32 %v9017_v12, %v5486_v22  ;;  %6080 = vst.msk [vmem:[%s9126_s11 + $0x40] sm:$0xff] %vm6071_vm4, %v6047_v16  ;;  %v5222_v5 = vrot.slane %v5214_v41, %v7623_v38  ;;  %v5215_v19 = vcombine.high %v9243_v54, %v9232_v18  ;;  %v9545_v41 = vld [vmem:[#allocation4_spill] sm:$0xff] }
 0x51a   : > { %v4844_v36 = vcombine.low %v4805_v56, %v4837_v43  ;;  %v6049_v39 = vadd.f32 %v6017_v27, %v9058_v57  ;;  %v5533_v50 = vadd.f32 %v5532_v34, %v4979_v45  ;;  %v5576_v1 = vpop.f32.mrf.mxu0  ;;  %v4845_v52 = vcombine.high %v4805_v56, %v4837_v43 }
 0x51b   : > { %v6799_v48 = vpop.f32.mrf.mxu1  ;;  %v6048_v30 = vadd.f32 %v6016_v26, %v9061_v6  ;;  %v9543_v27 = vcombine.low %v8888_v51, %v8896_v49  ;;  %v5167_v45 = vcombine.high %v8971_v3, %v9011_v46  ;;  %v5183_v3 = vcombine.high %v9251_v14, %v9240_v53 }
 0x51c   : > { %v6018_v57 = vmul.f32 %v9017_v12, %v5533_v50  ;;  %v5577_v11 = vadd.f32 %v5576_v1, %v4844_v36  ;;  %6082 = vst.msk [vmem:[%s9126_s11 + $0x50] sm:$0xff] %vm6071_vm4, %v6049_v39  ;;  %v6804_v60 = vpop.f32.mrf.mxu0  ;;  %v9544_v39 = vcombine.high %v8888_v51, %v8896_v49  ;;  %v5151_v46 = vcombine.high %v8964_v13, %v8991_v37 }
 0x51d   : > { %v5623_v62 = vpop.f32.mrf.mxu1  ;;  %6081 = vst.msk [vmem:[%s9126_s11 + $0x48] sm:$0xff] %vm6071_vm4, %v6048_v30  ;;  %v9298_v51 = vrot.slane %v5167_v45, %v7616_v55  ;;  %v5229_v30 = vrot.slane %v5215_v19, %v7623_v38  ;;  %v9546_v60 = vld [vmem:[#allocation14_spill] sm:$0xff]  ;;  %v9552_v45 = vld [vmem:[#allocation20_spill] sm:$0xff] }
 0x51e   : > { %v6050_v35 = vadd.f32 %v6018_v57, %v9064_v40  ;;  %v6019_v6 = vmul.f32 %v9017_v12, %v5577_v11  ;;  %v5624_v32 = vadd.f32 %v5623_v62, %v4845_v52  ;;  %v5579_v15 = vpop.f32.mrf.mxu0  ;;  %v9547_v62 = vcombine.low %v9545_v41, %v9546_v60 }
 0x51f   : > { %v6810_v43 = vpop.f32.mrf.mxu1  ;;  %v5580_v17 = vadd.f32 %v5579_v15, %v4980_v8 }
 0x520   : > { %v6051_v0 = vadd.f32 %v6019_v6, %v9067_v63  ;;  %v6021_v31 = vmul.f32 %v9017_v12, %v5624_v32  ;;  %6083 = vst.msk [vmem:[%s9126_s11 + $0x58] sm:$0xff] %vm6071_vm4, %v6050_v35  ;;  %v6805_v40 = vpop.f32.mrf.mxu0  ;;  %v5197_v35 = vrot.slane %v5183_v3, %v7623_v38 }
 0x521   : > { %v5626_v4 = vpop.f32.mrf.mxu1  ;;  %v6020_v59 = vmul.f32 %v9017_v12, %v5580_v17 }
 0x522   : > { %v6053_v58 = vadd.f32 %v6021_v31, %v9070_v61  ;;  %v5627_v20 = vadd.f32 %v5626_v4, %v4981_v47  ;;  %6084 = vst.msk [vmem:[%s9126_s11 + $0x60] sm:$0xff] %vm6071_vm4, %v6051_v0  ;;  %v5670_v63 = vpop.f32.mrf.mxu0  ;;  %v5190_v61 = vrot.slane %v5182_v7, %v7623_v38  ;;  %v5248_v0 = vcombine.low %v5197_v35, %v5229_v30  ;;  %v9550_v47 = vld [vmem:[#allocation17_spill] sm:$0xff] }
 0x523   : > { %v6811_v42 = vpop.f32.mrf.mxu1  ;;  %v6052_v56 = vadd.f32 %v6020_v59, %v9073_v44  ;;  %v5671_v22 = vadd.f32 %v5670_v63, %v9543_v27  ;;  %v5249_v59 = vcombine.high %v5197_v35, %v5229_v30  ;;  %v9551_v63 = vld [vmem:[#allocation7_spill] sm:$0xff] }
 0x524   : > { %v6022_v16 = vmul.f32 %v9017_v12, %v5627_v20  ;;  %6086 = vst.msk [vmem:[%s9126_s11 + $0x70] sm:$0xff] %vm6071_vm4, %v6053_v58  ;;  %v6816_v29 = vpop.f32.mrf.mxu0  ;;  %v5246_v50 = vcombine.low %v5190_v61, %v5222_v5  ;;  %v5247_v48 = vcombine.high %v5190_v61, %v5222_v5  ;;  %v9561_v30 = vld [vmem:[#allocation19_spill] sm:$0xff] }
 0x525   : > { %v5717_v34 = vpop.f32.mrf.mxu1  ;;  %v6023_v36 = vmul.f32 %v9017_v12, %v5671_v22  ;;  %6085 = vst.msk [vmem:[%s9126_s11 + $0x68] sm:$0xff] %vm6071_vm4, %v6052_v56 }
 0x526   : > { %v6054_v44 = vadd.f32 %v6022_v16, %v9076_v9  ;;  %v5718_v26 = vadd.f32 %v5717_v34, %v9544_v39  ;;  %v5673_v18 = vpop.f32.mrf.mxu0  ;;  %v9553_v34 = vld [vmem:[#allocation6_spill] sm:$0xff] }
 0x527   : > { %v6822_v23 = vpop.f32.mrf.mxu1  ;;  %v6055_v9 = vadd.f32 %v6023_v36, %v9079_v33  ;;  %v5674_v1 = vadd.f32 %v5673_v18, %v5246_v50  ;;  %v5165_v33 = vrot.slane %v5151_v46, %v7616_v55  ;;  %v9548_v55 = vld [vmem:[#allocation8_spill] sm:$0xff]  ;;  %v9557_v50 = vld [vmem:[#allocation18_spill] sm:$0xff] }
 0x528   : > { %v6025_v54 = vmul.f32 %v9017_v12, %v5718_v26  ;;  %6087 = vst.msk [vmem:[%s9126_s11 + $0x78] sm:$0xff] %vm6071_vm4, %v6054_v44  ;;  %v6817_v49 = vpop.f32.mrf.mxu0  ;;  %v9554_v44 = vld [vmem:[#allocation3_spill] sm:$0xff]  ;;  %v9556_v26 = vld [vmem:[#allocation5_spill] sm:$0xff] }
 0x529   : > { %v5720_v53 = vpop.f32.mrf.mxu1  ;;  %v6024_v13 = vmul.f32 %v9017_v12, %v5674_v1  ;;  %6088 = vst.msk [vmem:[%s9126_s11 + $0x80] sm:$0xff] %vm6071_vm4, %v6055_v9  ;;  %v5230_v6 = vcombine.low %v5165_v33, %v9298_v51  ;;  %v9555_v36 = vcombine.low %v9553_v34, %v9554_v44  ;;  %v9558_v3 = vcombine.low %v9556_v26, %v9557_v50 }
 0x52a   : > { %v6057_v52 = vadd.f32 %v6025_v54, %v9082_v2  ;;  %v5721_v37 = vadd.f32 %v5720_v53, %v5247_v48  ;;  %v5764_v57 = vpop.f32.mrf.mxu0  ;;  %v5231_v18 = vcombine.high %v5165_v33, %v9298_v51  ;;  %v9559_v54 = vld [vmem:[#allocation10_spill] sm:$0xff]  ;;  %v9560_v49 = vcombine.high %v9553_v34, %v9554_v44 }
 0x52b   : > { %v6823_v11 = vpop.f32.mrf.mxu1  ;;  %v6056_v24 = vadd.f32 %v6024_v13, %v9085_v21  ;;  %v5765_v2 = vadd.f32 %v5764_v57, %v9547_v62  ;;  %v9549_v21 = vcombine.high %v9545_v41, %v9546_v60  ;;  %v5238_v27 = vrot.slane %v5230_v6, %v7623_v38  ;;  %v9562_v41 = vld [vmem:[#allocation9_spill] sm:$0xff] }
 0x52c   : > { %v6026_v14 = vmul.f32 %v9017_v12, %v5721_v37  ;;  %6090 = vst.msk [vmem:[%s9126_s11 + $0x90] sm:$0xff] %vm6071_vm4, %v6057_v52  ;;  %v6828_v32 = vpop.f32.mrf.mxu0  ;;  %v5206_v46 = vrot.slane %v9558_v3, %v7623_v38  ;;  %v5245_v35 = vrot.slane %v5231_v18, %v7623_v38 }
 0x52d   : > { %v5811_v8 = vpop.f32.mrf.mxu1  ;;  %v6027_v15 = vmul.f32 %v9017_v12, %v5765_v2  ;;  %6089 = vst.msk [vmem:[%s9126_s11 + $0x88] sm:$0xff] %vm6071_vm4, %v6056_v24 }
 0x52e   : > { %v6058_v7 = vadd.f32 %v6026_v14, %v9548_v55  ;;  %v5812_v43 = vadd.f32 %v5811_v8, %v9549_v21  ;;  %v5767_v31 = vpop.f32.mrf.mxu0  ;;  %v5250_v52 = vcombine.low %v5206_v46, %v5238_v27  ;;  %v5251_v11 = vcombine.high %v5206_v46, %v5238_v27  ;;  %v9563_v8 = vld [vmem:[#allocation22_spill] sm:$0xff]  ;;  %v9565_v21 = vld [vmem:[#allocation16_spill] sm:$0xff] }
 0x52f   : > { %v6834_v17 = vpop.f32.mrf.mxu1  ;;  %v6059_v40 = vadd.f32 %v6027_v15, %v9550_v47  ;;  %v5768_v58 = vadd.f32 %v5767_v31, %v5248_v0  ;;  %v9564_v15 = vld [vmem:[#allocation15_spill] sm:$0xff]  ;;  %v9567_v31 = vcombine.high %v9556_v26, %v9557_v50 }
 0x530   : > { %v6029_v4 = vmul.f32 %v9017_v12, %v5812_v43  ;;  %6091 = vst.msk [vmem:[%s9126_s11 + $0x98] sm:$0xff] %vm6071_vm4, %v6058_v7  ;;  %v6829_v20 = vpop.f32.mrf.mxu0  ;;  %v9566_v43 = vcombine.low %v9564_v15, %v9565_v21 }
 0x531   : > { %v5814_v5 = vpop.f32.mrf.mxu1  ;;  %v6028_v56 = vmul.f32 %v9017_v12, %v5768_v58  ;;  %6092 = vst.msk [vmem:[%s9126_s11 + $0xa0] sm:$0xff] %vm6071_vm4, %v6059_v40  ;;  %v5213_v17 = vrot.slane %v9567_v31, %v7623_v38  ;;  %v9569_v20 = vcombine.high %v9564_v15, %v9565_v21  ;;  %v9570_v38 = vld [vmem:[#allocation21_spill] sm:$0xff] }
 0x532   : > { %v6061_v42 = vadd.f32 %v6029_v4, %v9551_v63  ;;  %v5815_v16 = vadd.f32 %v5814_v5, %v5249_v59  ;;  %v5858_v22 = vpop.f32.mrf.mxu0  ;;  %v9568_v4 = vld [vmem:[#allocation12_spill] sm:$0xff] }
 0x533   : > { %v6835_v61 = vpop.f32.mrf.mxu1  ;;  %v6060_v19 = vadd.f32 %v6028_v56, %v9552_v45  ;;  %v5859_v39 = vadd.f32 %v5858_v22, %v9555_v36  ;;  %v5252_v63 = vcombine.low %v5213_v17, %v5245_v35 }
 0x534   : > { %v6030_v29 = vmul.f32 %v9017_v12, %v5815_v16  ;;  %6094 = vst.msk [vmem:[%s9126_s11 + $0xb0] sm:$0xff] %vm6071_vm4, %v6061_v42  ;;  %v6840_v23 = vpop.f32.mrf.mxu0  ;;  %v5253_v61 = vcombine.high %v5213_v17, %v5245_v35 }
 0x535   : > { %v5905_v9 = vpop.f32.mrf.mxu1  ;;  %v6031_v48 = vmul.f32 %v9017_v12, %v5859_v39  ;;  %6093 = vst.msk [vmem:[%s9126_s11 + $0xa8] sm:$0xff] %vm6071_vm4, %v6060_v19 }
 0x536   : > { %v6062_v1 = vadd.f32 %v6030_v29, %v9559_v54  ;;  %v5906_v53 = vadd.f32 %v5905_v9, %v9560_v49  ;;  %v5861_v13 = vpop.f32.mrf.mxu0 }
 0x537   : > { %v6846_v37 = vpop.f32.mrf.mxu1  ;;  %v6063_v57 = vadd.f32 %v6031_v48, %v9561_v30  ;;  %v5862_v33 = vadd.f32 %v5861_v13, %v5250_v52 }
 0x538   : > { %v6033_v51 = vmul.f32 %v9017_v12, %v5906_v53  ;;  %6095 = vst.msk [vmem:[%s9126_s11 + $0xb8] sm:$0xff] %vm6071_vm4, %v6062_v1  ;;  %v6841_v24 = vpop.f32.mrf.mxu0 }
 0x539   : > { %v5908_v14 = vpop.f32.mrf.mxu1  ;;  %v6032_v62 = vmul.f32 %v9017_v12, %v5862_v33  ;;  %6096 = vst.msk [vmem:[%s9126_s11 + $0xc0] sm:$0xff] %vm6071_vm4, %v6063_v57 }
 0x53a   : > { %v6065_v60 = vadd.f32 %v6033_v51, %v9562_v41  ;;  %v5909_v2 = vadd.f32 %v5908_v14, %v5251_v11  ;;  %v5952_v6 = vpop.f32.mrf.mxu0 }
 0x53b   : > { %v6847_v32 = vpop.f32.mrf.mxu1  ;;  %v6064_v55 = vadd.f32 %v6032_v62, %v9563_v8  ;;  %v5953_v0 = vadd.f32 %v5952_v6, %v9566_v43 }
 0x53c   : > { %v6034_v7 = vmul.f32 %v9017_v12, %v5909_v2  ;;  %6098 = vst.msk [vmem:[%s9126_s11 + $0xd0] sm:$0xff] %vm6071_vm4, %v6065_v60  ;;  %v6852_v47 = vpop.f32.mrf.mxu0 }
 0x53d   : > { %v5999_v40 = vpop.f32.mrf.mxu1  ;;  %v6035_v59 = vmul.f32 %v9017_v12, %v5953_v0  ;;  %6097 = vst.msk [vmem:[%s9126_s11 + $0xc8] sm:$0xff] %vm6071_vm4, %v6064_v55 }
 0x53e   : > { %v6066_v58 = vadd.f32 %v6034_v7, %v9568_v4  ;;  %v6000_v5 = vadd.f32 %v5999_v40, %v9569_v20  ;;  %v5955_v42 = vpop.f32.mrf.mxu0 }
 0x53f   : > { %v6858_v56 = vpop.f32.mrf.mxu1  ;;  %v6067_v16 = vadd.f32 %v6035_v59, %v9570_v38  ;;  %v5956_v22 = vadd.f32 %v5955_v42, %v5252_v63 }
 0x540   : > { %v6037_v27 = vmul.f32 %v9017_v12, %v6000_v5  ;;  %6099 = vst.msk [vmem:[%s9126_s11 + $0xd8] sm:$0xff] %vm6071_vm4, %v6066_v58  ;;  %v6853_v45 = vpop.f32.mrf.mxu0 }
 0x541   : > { %v6002_v19 = vpop.f32.mrf.mxu1  ;;  %v6036_v34 = vmul.f32 %v9017_v12, %v5956_v22  ;;  %6100 = vst.msk [vmem:[%s9126_s11 + $0xe0] sm:$0xff] %vm6071_vm4, %v6067_v16 }
 0x542   : > { %v6069_v29 = vadd.f32 %v6037_v27, %v9138_v25  ;;  %v6003_v44 = vadd.f32 %v6002_v19, %v5253_v61 }
 0x543   : > { %v6859_v36 = vpop.f32.mrf.mxu1  ;;  %v6068_v39 = vadd.f32 %v6036_v34, %v9141_v10 }
 0x544   : > { %v6038_v26 = vmul.f32 %v9017_v12, %v6003_v44  ;;  %6102 = vst.msk [vmem:[%s9126_s11 + $0xf0] sm:$0xff] %vm6071_vm4, %v6069_v29 }
 0x545   : > { %6101 = vst.msk [vmem:[%s9126_s11 + $0xe8] sm:$0xff] %vm6071_vm4, %v6068_v39 }
 0x546   : > { %v6070_v50 = vadd.f32 %v6038_v26, %v9144_v28 }
 0x548   : > { %6103 = vst.msk [vmem:[%s9126_s11 + $0xf8] sm:$0xff] %vm6071_vm4, %v6070_v50 }
 0x549 PF: > { %s15_s19 = sadd.s32 1, %s7101_s19   ;;  %s9571_s17 = smov %s7097_s18 }
 0x54a   : > { %p12_p5 = scmp.ge.s32.totalorder %s15_s19, 4   ;;  %s9572_s18 = smov %s9574_s0 }
 0x54c   :  { %14 = sbr.rel (!%p12_p5) target bundleno = 2 (0x2), region = 72 }

</bundles_post_ra>
